<compile_context>
chip_gen: v5e
topology: v5e:2x2
jax: 0.10.0
libtpu: 0.0.40
codegen_flags: <defaults>
</compile_context>

<pallas_src>
import numpy as np

import jax
import jax.numpy as jnp
from jax.experimental import pallas as pl
from jax.experimental.pallas import tpu as pltpu


# ----------------------------------------------------------------------------
# Pallas kernels
# ----------------------------------------------------------------------------
def _conv_stage_kernel(xsh_ref, m1_ref, m2_ref, b1_ref, b2_ref,
                       p1_ref, ph2_ref, pw2_ref, o_ref):
    """Whole conv stage for NB images, fully fused and VMEM resident.

    Row axis merges (image, height): row = b*H + h.  Lane axis is W*C.
      xsh_ref: (3, NB*28, 28)   3 H-shifted, H-zero-padded input slabs
      m1_ref : (3, 28, 448)     conv1 tap matrices (BN1 scale + W-pad folded)
      m2_ref : (3, 448, 448)    conv2 tap matrices (BN2 scale + W-pad +
                                layer-1 W-pool folded)
      b1_ref : (1, 448)         conv1 bias (+BN1 shift), tiled over W
      b2_ref : (1, 448)         conv2 bias (+BN2 shift), tiled over W
      p1_ref : (3, NB*14, NB*28)  per-tap layer-1 H-pool + H-pad + row-shift,
                                block-diagonal over the NB images
      ph2_ref: (NB*7, NB*14)    block-diag H-avgpool 14->7
      pw2_ref: (448, 224)       W-avgpool 14->7 for the 32-channel output
      o_ref  : (NB*7, 224)      pooled layer-2 output, layout [b*7+h, w*32+c]
    """
    n1 = xsh_ref.shape[1]                 # NB*28
    n2 = p1_ref.shape[1]                  # NB*14
    wc = m1_ref.shape[2]                  # 448

    # conv1 + BN1 (folded): 3 MXU matmuls over the pre-shifted input slabs.
    y1 = jnp.zeros((n1, wc), jnp.float32)
    for kh in range(3):
        y1 = y1 + jnp.dot(xsh_ref[kh], m1_ref[kh],
                          preferred_element_type=jnp.float32)
    z1 = jnp.maximum(y1 + b1_ref[...], 0.0)                      # ReLU

    # conv2 + BN2 (folded).  p1_ref[kh] performs layer-1 H-pool, H zero-pad
    # and the per-tap row shift in one matmul; layer-1 W-pool lives in m2.
    y2 = jnp.zeros((n2, wc), jnp.float32)
    for kh in range(3):
        a1 = jnp.dot(p1_ref[kh], z1, preferred_element_type=jnp.float32)
        y2 = y2 + jnp.dot(a1, m2_ref[kh], preferred_element_type=jnp.float32)
    z2 = jnp.maximum(y2 + b2_ref[...], 0.0)                      # ReLU

    # layer-2 2x2 average pool = block-diag H-pool (left) then W-pool (right).
    a2 = jnp.dot(ph2_ref[...], z2, preferred_element_type=jnp.float32)
    o_ref[...] = jnp.dot(a2, pw2_ref[...], preferred_element_type=jnp.float32)


def _fc_kernel(x_ref, w1_ref, b1_ref, w2_ref, b2_ref, o_ref):
    """fc1 + ReLU + (dropout = identity in eval) + fc2, fused.

      x_ref: (bt, 1568), w1_ref: (1568, 64), w2_ref: (64, 128) zero-padded,
      o_ref: (bt, 128) lane-dense logits (first 10 columns are real).
    """
    h = jnp.dot(x_ref[...], w1_ref[...], preferred_element_type=jnp.float32)
    h = jnp.maximum(h + b1_ref[...], 0.0)
    # TODO(synk): training-mode dropout (p=0.5) not implemented (eval identity).
    o_ref[...] = jnp.dot(h, w2_ref[...],
                         preferred_element_type=jnp.float32) + b2_ref[...]


# ----------------------------------------------------------------------------
# Structural (weight-independent) constant matrices
# ----------------------------------------------------------------------------
def _wpool_matrix(w_in, c):
    """(w_in*c, (w_in//2)*c) right-matmul 2-wide W average pool."""
    w_out = w_in // 2
    m = np.zeros((w_in * c, w_out * c), np.float32)
    eye = 0.5 * np.eye(c, dtype=np.float32)
    for j in range(w_out):
        for d in range(2):
            m[(2 * j + d) * c:(2 * j + d + 1) * c, j * c:(j + 1) * c] = eye
    return m


def _structural_mats(nb):
    """Block-diagonal pooling/shift matrices for nb images per grid step."""
    # Per-tap: layer-1 H-avgpool 28->14 + zero H-border + conv2 row shift.
    p1 = np.zeros((3, 14, 28), np.float32)
    for kh in range(3):
        for h in range(14):
            p = h + kh                     # padded-frame row index, 0..15
            if 1 <= p <= 14:               # p==0 / p==15 are the zero borders
                i = p - 1
                p1[kh, h, 2 * i] = 0.5
                p1[kh, h, 2 * i + 1] = 0.5
    eye = np.eye(nb, dtype=np.float32)
    p1_bd = np.stack([np.kron(eye, p1[kh]) for kh in range(3)])   # (3,nb*14,nb*28)

    ph2 = np.zeros((7, 14), np.float32)                           # H-pool 14->7
    for i in range(7):
        ph2[i, 2 * i] = 0.5
        ph2[i, 2 * i + 1] = 0.5
    ph2_bd = np.kron(eye, ph2)                                    # (nb*7, nb*14)

    pw2 = _wpool_matrix(14, 32)                                   # (448, 224)
    return p1_bd, ph2_bd, pw2


# ----------------------------------------------------------------------------
# Forward pass
# ----------------------------------------------------------------------------
@jax.jit
def forward(x_nchw, kp):
    """x_nchw: (B, 1, 28, 28) float32 -> logits (B, 10)."""
    B = x_nchw.shape[0]
    NB = min(8, B)                         # images per conv grid step
    G = -(-B // NB)
    Bp = G * NB

    # XLA glue (tiny): batch pad, H zero-pad, build the 3 row-shifted slabs and
    # merge NB images per grid step on the sublane axis (row = b*28 + h).
    xp = jnp.pad(x_nchw[:, 0, :, :], ((0, Bp - B), (1, 1), (0, 0)))   # (Bp,30,28)
    xsh = jnp.stack([xp[:, k:k + 28, :] for k in range(3)], axis=1)   # (Bp,3,28,28)
    xsh = (xsh.reshape(G, NB, 3, 28, 28)
              .transpose(0, 2, 1, 3, 4)
              .reshape(G, 3, NB * 28, 28))                            # (G,3,NB*28,28)

    p1_bd, ph2_bd, pw2 = _structural_mats(NB)

    feats = pl.pallas_call(
        _conv_stage_kernel,
        out_shape=jax.ShapeDtypeStruct((G, NB * 7, 224), jnp.float32),
        grid=(G,),
        in_specs=[
            pl.BlockSpec((None, 3, NB * 28, 28), lambda g: (g, 0, 0, 0)),
            pl.BlockSpec((3, 28, 448), lambda g: (0, 0, 0)),
            pl.BlockSpec((3, 448, 448), lambda g: (0, 0, 0)),
            pl.BlockSpec((1, 448), lambda g: (0, 0)),
            pl.BlockSpec((1, 448), lambda g: (0, 0)),
            pl.BlockSpec((3, NB * 14, NB * 28), lambda g: (0, 0, 0)),
            pl.BlockSpec((NB * 7, NB * 14), lambda g: (0, 0)),
            pl.BlockSpec((448, 224), lambda g: (0, 0)),
        ],
        out_specs=pl.BlockSpec((None, NB * 7, 224), lambda g: (g, 0, 0)),
        compiler_params=pltpu.CompilerParams(
            dimension_semantics=("parallel",),
            vmem_limit_bytes=32 * 1024 * 1024),
    )(xsh, kp["m1"], kp["m2"], kp["b1row"], kp["b2row"],
      jnp.asarray(p1_bd), jnp.asarray(ph2_bd), jnp.asarray(pw2))

    # Free reshape: (G, NB*7, 224) -> (Bp, 1568).  (h, w, c) flatten order is
    # baked into the permuted wfc1 -> no runtime transpose.
    flat = feats.reshape(Bp, 32 * 7 * 7)

    bt = min(Bp, 256)
    logits_pad = pl.pallas_call(
        _fc_kernel,
        out_shape=jax.ShapeDtypeStruct((Bp, 128), jnp.float32),
        grid=(pl.cdiv(Bp, bt),),
        in_specs=[
            pl.BlockSpec((bt, 1568), lambda i: (i, 0)),
            pl.BlockSpec((1568, 64), lambda i: (0, 0)),
            pl.BlockSpec((1, 64), lambda i: (0, 0)),
            pl.BlockSpec((64, 128), lambda i: (0, 0)),
            pl.BlockSpec((1, 128), lambda i: (0, 0)),
        ],
        out_specs=pl.BlockSpec((bt, 128), lambda i: (i, 0)),
        compiler_params=pltpu.CompilerParams(
            dimension_semantics=("parallel",)),
    )(flat, kp["wfc1"], kp["bfc1"], kp["wfc2"], kp["bfc2"])

    return logits_pad[:B, :10]


# ----------------------------------------------------------------------------
# Parameter construction (PyTorch-layout synthetic params -> kernel params)
# ----------------------------------------------------------------------------
def init_torch_params(key):
    ks = jax.random.split(key, 16)
    nrm = lambda k, shape, s: s * jax.random.normal(k, shape, jnp.float32)
    return dict(
        w1=nrm(ks[0], (16, 1, 3, 3), 0.3), b1=nrm(ks[1], (16,), 0.1),
        g1=1.0 + nrm(ks[2], (16,), 0.1), be1=nrm(ks[3], (16,), 0.1),
        rm1=nrm(ks[4], (16,), 0.1),
        rv1=0.5 + jax.nn.softplus(nrm(ks[5], (16,), 1.0)),
        w2=nrm(ks[6], (32, 16, 3, 3), 0.1), b2=nrm(ks[7], (32,), 0.1),
        g2=1.0 + nrm(ks[8], (32,), 0.1), be2=nrm(ks[9], (32,), 0.1),
        rm2=nrm(ks[10], (32,), 0.1),
        rv2=0.5 + jax.nn.softplus(nrm(ks[11], (32,), 1.0)),
        wfc1=nrm(ks[12], (64, 32 * 7 * 7), 0.05), bfc1=nrm(ks[13], (64,), 0.1),
        wfc2=nrm(ks[14], (10, 64), 0.3), bfc2=nrm(ks[15], (10,), 0.1),
    )


def _conv_tap_matrices(w_eff, width):
    """w_eff (Cout, Cin, 3, 3) -> (3, width*Cin, width*Cout) tap matrices.

    M[kh, w_in*Cin + c, w*Cout + o] = w_eff[o, c, kh, w_in - w + 1]
    (zero where the tap falls outside [0, width) => conv's W zero-padding).
    """
    cout, cin = w_eff.shape[0], w_eff.shape[1]
    m = np.zeros((3, width * cin, width * cout), np.float32)
    for kh in range(3):
        for kw in range(3):
            blk = np.asarray(w_eff[:, :, kh, kw], np.float32).T   # (Cin, Cout)
            for w in range(width):
                w_in = w + kw - 1
                if 0 <= w_in < width:
                    m[kh, w_in * cin:(w_in + 1) * cin,
                      w * cout:(w + 1) * cout] = blk
    return m


def build_kernel_params(tp):
    eps = 1e-5
    tp = {k: np.asarray(v, np.float32) for k, v in tp.items()}

    # Fold eval-mode BatchNorm (and conv bias) into a pure weight + bias form.
    s1 = tp["g1"] / np.sqrt(tp["rv1"] + eps)
    w1_eff = tp["w1"] * s1[:, None, None, None]
    b1_eff = (tp["b1"] - tp["rm1"]) * s1 + tp["be1"]
    s2 = tp["g2"] / np.sqrt(tp["rv2"] + eps)
    w2_eff = tp["w2"] * s2[:, None, None, None]
    b2_eff = (tp["b2"] - tp["rm2"]) * s2 + tp["be2"]

    m1 = _conv_tap_matrices(w1_eff, 28)                  # (3, 28, 448)
    m2_raw = _conv_tap_matrices(w2_eff, 14)              # (3, 224, 448)
    pw1 = _wpool_matrix(28, 16)                          # layer-1 W-pool (448,224)
    m2 = np.stack([pw1 @ m2_raw[k] for k in range(3)])   # fold layer-1 W-pool in

    kp = dict(
        m1=m1, m2=m2,
        b1row=np.tile(b1_eff, 28)[None, :],              # (1, 448)
        b2row=np.tile(b2_eff, 14)[None, :],              # (1, 448)
    )

    # fc1: permute rows so it accepts the conv kernel's (h, w, c) flatten order
    # (PyTorch flattens NCHW as (c, h, w)); done once here -> no runtime
    # transpose between the conv and FC kernels.
    wfc1_t = tp["wfc1"].T                                # (1568, 64), torch order
    p = np.arange(32 * 7 * 7)
    i, j, o = p // 224, (p % 224) // 32, p % 32
    kp["wfc1"] = np.ascontiguousarray(wfc1_t[o * 49 + i * 7 + j, :])
    kp["bfc1"] = tp["bfc1"][None, :]

    # fc2: zero-pad the 10 output columns to 128 so the logits store is a full
    # unmasked 128-lane store; the wrapper slices [:, :10].
    wfc2 = np.zeros((64, 128), np.float32)
    wfc2[:, :10] = tp["wfc2"].T
    bfc2 = np.zeros((1, 128), np.float32)
    bfc2[0, :10] = tp["bfc2"]
    kp["wfc2"], kp["bfc2"] = wfc2, bfc2

    return {k: jnp.asarray(v) for k, v in kp.items()}


# ----------------------------------------------------------------------------
# Pure-XLA reference of the PyTorch module (eval mode) for a numerical check
# ----------------------------------------------------------------------------
@jax.jit
def reference_forward(x, tp):
    eps = 1e-5
    hi = jax.lax.Precision.HIGHEST

    def block(h, w, b, g, be, rm, rv):
        y = jax.lax.conv_general_dilated(
            h, w, window_strides=(1, 1), padding=((1, 1), (1, 1)),
            dimension_numbers=("NCHW", "OIHW", "NCHW"), precision=hi)
        y = y + b[None, :, None, None]
        s = g / jnp.sqrt(rv + eps)
        y = (y - rm[None, :, None, None]) * s[None, :, None, None] \
            + be[None, :, None, None]
        y = jnp.maximum(y, 0.0)
        B, C, H, W = y.shape
        return y.reshape(B, C, H // 2, 2, W // 2, 2).mean(axis=(3, 5))

    h = block(x, tp["w1"], tp["b1"], tp["g1"], tp["be1"], tp["rm1"], tp["rv1"])
    h = block(h, tp["w2"], tp["b2"], tp["g2"], tp["be2"], tp["rm2"], tp["rv2"])
    flat = h.reshape(x.shape[0], -1)
    h = jnp.maximum(jnp.dot(flat, tp["wfc1"].T, precision=hi) + tp["bfc1"], 0.0)
    return jnp.dot(h, tp["wfc2"].T, precision=hi) + tp["bfc2"]


if __name__ == "__main__":
    key = jax.random.PRNGKey(0)
    k_params, k_x = jax.random.split(key)

    torch_params = init_torch_params(k_params)
    kernel_params = build_kernel_params(torch_params)

    # Input matching the module: 1 channel, 28x28 (fc1 expects 32*7*7).
    x = jax.random.normal(k_x, (2, 1, 28, 28), jnp.float32)

    logits = forward(x, kernel_params)
    jax.block_until_ready(logits)
    assert logits.shape == (2, 10)

    # Numerical check against the pure-XLA reference of the PyTorch module.
    ref = reference_forward(x, torch_params)
    assert jnp.allclose(logits, ref, rtol=2e-2, atol=2e-2), (
        float(jnp.max(jnp.abs(logits - ref))))

    print("KERNEL_OK")
</pallas_src>

<mosaic_0001>
module attributes {stable_mosaic.version = 11 : i64} {
  func.func @_conv_stage_kernel(%arg0: i32, %arg1: memref<1x3x56x28xf32, #tpu.memory_space<vmem>>, %arg2: memref<3x28x448xf32, #tpu.memory_space<vmem>>, %arg3: memref<3x448x448xf32, #tpu.memory_space<vmem>>, %arg4: memref<1x448xf32, #tpu.memory_space<vmem>>, %arg5: memref<1x448xf32, #tpu.memory_space<vmem>>, %arg6: memref<3x28x56xf32, #tpu.memory_space<vmem>>, %arg7: memref<14x28xf32, #tpu.memory_space<vmem>>, %arg8: memref<448x224xf32, #tpu.memory_space<vmem>>, %arg9: memref<1x14x224xf32, #tpu.memory_space<vmem>>) attributes {dimension_semantics = [#tpu.dimension_semantics<parallel>], iteration_bounds = array<i64: 1>, scalar_prefetch = 0 : i64, scratch_operands = 0 : i64, tpu.core_type = #tpu.core_type<tc>, window_params = [{transform_indices = @transform_0, window_bounds = array<i64: 1, 3, 56, 28>}, {pipeline_mode = #tpu.pipeline_mode<synchronous>, transform_indices = @transform_1, window_bounds = array<i64: 3, 28, 448>}, {pipeline_mode = #tpu.pipeline_mode<synchronous>, transform_indices = @transform_2, window_bounds = array<i64: 3, 448, 448>}, {pipeline_mode = #tpu.pipeline_mode<synchronous>, transform_indices = @transform_3, window_bounds = array<i64: 1, 448>}, {pipeline_mode = #tpu.pipeline_mode<synchronous>, transform_indices = @transform_4, window_bounds = array<i64: 1, 448>}, {pipeline_mode = #tpu.pipeline_mode<synchronous>, transform_indices = @transform_5, window_bounds = array<i64: 3, 28, 56>}, {pipeline_mode = #tpu.pipeline_mode<synchronous>, transform_indices = @transform_6, window_bounds = array<i64: 14, 28>}, {pipeline_mode = #tpu.pipeline_mode<synchronous>, transform_indices = @transform_7, window_bounds = array<i64: 448, 224>}, {transform_indices = @transform_8, window_bounds = array<i64: 1, 14, 224>}]} {
    %cst = arith.constant 0.000000e+00 : f32
    %0 = vector.broadcast %cst : f32 to vector<56x448xf32>
    %c0 = arith.constant 0 : index
    %c0_0 = arith.constant 0 : index
    %c0_1 = arith.constant 0 : index
    %c0_2 = arith.constant 0 : index
    %1 = vector.load %arg1[%c0, %c0_0, %c0_1, %c0_2] : memref<1x3x56x28xf32, #tpu.memory_space<vmem>>, vector<1x1x56x28xf32>
    %2 = vector.shape_cast %1 : vector<1x1x56x28xf32> to vector<56x28xf32>
    %c0_3 = arith.constant 0 : index
    %c0_4 = arith.constant 0 : index
    %c0_5 = arith.constant 0 : index
    %3 = vector.load %arg2[%c0_3, %c0_4, %c0_5] : memref<3x28x448xf32, #tpu.memory_space<vmem>>, vector<1x28x448xf32>
    %4 = vector.shape_cast %3 : vector<1x28x448xf32> to vector<28x448xf32>
    %cst_6 = arith.constant dense<0.000000e+00> : vector<56x448xf32>
    %5 = tpu.matmul %2, %4, %cst_6 {dimension_numbers = #tpu.dot_dimension_numbers<[1], [0], [0], [1], [0, 0, 1, 1], [], []>} : vector<56x28xf32>, vector<28x448xf32>, vector<56x448xf32> -> vector<56x448xf32>
    %6 = arith.addf %0, %5 : vector<56x448xf32>
    %c0_7 = arith.constant 0 : index
    %c1 = arith.constant 1 : index
    %c0_8 = arith.constant 0 : index
    %c0_9 = arith.constant 0 : index
    %7 = vector.load %arg1[%c0_7, %c1, %c0_8, %c0_9] : memref<1x3x56x28xf32, #tpu.memory_space<vmem>>, vector<1x1x56x28xf32>
    %8 = vector.shape_cast %7 : vector<1x1x56x28xf32> to vector<56x28xf32>
    %c1_10 = arith.constant 1 : index
    %c0_11 = arith.constant 0 : index
    %c0_12 = arith.constant 0 : index
    %9 = vector.load %arg2[%c1_10, %c0_11, %c0_12] : memref<3x28x448xf32, #tpu.memory_space<vmem>>, vector<1x28x448xf32>
    %10 = vector.shape_cast %9 : vector<1x28x448xf32> to vector<28x448xf32>
    %cst_13 = arith.constant dense<0.000000e+00> : vector<56x448xf32>
    %11 = tpu.matmul %8, %10, %cst_13 {dimension_numbers = #tpu.dot_dimension_numbers<[1], [0], [0], [1], [0, 0, 1, 1], [], []>} : vector<56x28xf32>, vector<28x448xf32>, vector<56x448xf32> -> vector<56x448xf32>
    %12 = arith.addf %6, %11 : vector<56x448xf32>
    %c0_14 = arith.constant 0 : index
    %c2 = arith.constant 2 : index
    %c0_15 = arith.constant 0 : index
    %c0_16 = arith.constant 0 : index
    %13 = vector.load %arg1[%c0_14, %c2, %c0_15, %c0_16] : memref<1x3x56x28xf32, #tpu.memory_space<vmem>>, vector<1x1x56x28xf32>
    %14 = vector.shape_cast %13 : vector<1x1x56x28xf32> to vector<56x28xf32>
    %c2_17 = arith.constant 2 : index
    %c0_18 = arith.constant 0 : index
    %c0_19 = arith.constant 0 : index
    %15 = vector.load %arg2[%c2_17, %c0_18, %c0_19] : memref<3x28x448xf32, #tpu.memory_space<vmem>>, vector<1x28x448xf32>
    %16 = vector.shape_cast %15 : vector<1x28x448xf32> to vector<28x448xf32>
    %cst_20 = arith.constant dense<0.000000e+00> : vector<56x448xf32>
    %17 = tpu.matmul %14, %16, %cst_20 {dimension_numbers = #tpu.dot_dimension_numbers<[1], [0], [0], [1], [0, 0, 1, 1], [], []>} : vector<56x28xf32>, vector<28x448xf32>, vector<56x448xf32> -> vector<56x448xf32>
    %18 = arith.addf %12, %17 : vector<56x448xf32>
    %c0_21 = arith.constant 0 : index
    %c0_22 = arith.constant 0 : index
    %19 = vector.load %arg4[%c0_21, %c0_22] : memref<1x448xf32, #tpu.memory_space<vmem>>, vector<1x448xf32>
    %20 = vector.broadcast %19 : vector<1x448xf32> to vector<56x448xf32>
    %21 = arith.addf %18, %20 : vector<56x448xf32>
    %cst_23 = arith.constant 0.000000e+00 : f32
    %22 = vector.broadcast %cst_23 : f32 to vector<56x448xf32>
    %23 = arith.maximumf %21, %22 : vector<56x448xf32>
    %cst_24 = arith.constant 0.000000e+00 : f32
    %24 = vector.broadcast %cst_24 : f32 to vector<28x448xf32>
    %c0_25 = arith.constant 0 : index
    %c0_26 = arith.constant 0 : index
    %c0_27 = arith.constant 0 : index
    %25 = vector.load %arg6[%c0_25, %c0_26, %c0_27] : memref<3x28x56xf32, #tpu.memory_space<vmem>>, vector<1x28x56xf32>
    %26 = vector.shape_cast %25 : vector<1x28x56xf32> to vector<28x56xf32>
    %cst_28 = arith.constant dense<0.000000e+00> : vector<28x448xf32>
    %27 = tpu.matmul %26, %23, %cst_28 {dimension_numbers = #tpu.dot_dimension_numbers<[1], [0], [0], [1], [0, 0, 1, 1], [], []>} : vector<28x56xf32>, vector<56x448xf32>, vector<28x448xf32> -> vector<28x448xf32>
    %c0_29 = arith.constant 0 : index
    %c0_30 = arith.constant 0 : index
    %c0_31 = arith.constant 0 : index
    %28 = vector.load %arg3[%c0_29, %c0_30, %c0_31] : memref<3x448x448xf32, #tpu.memory_space<vmem>>, vector<1x448x448xf32>
    %29 = vector.shape_cast %28 : vector<1x448x448xf32> to vector<448x448xf32>
    %cst_32 = arith.constant dense<0.000000e+00> : vector<28x448xf32>
    %30 = tpu.matmul %27, %29, %cst_32 {dimension_numbers = #tpu.dot_dimension_numbers<[1], [0], [0], [1], [0, 0, 1, 1], [], []>} : vector<28x448xf32>, vector<448x448xf32>, vector<28x448xf32> -> vector<28x448xf32>
    %31 = arith.addf %24, %30 : vector<28x448xf32>
    %c1_33 = arith.constant 1 : index
    %c0_34 = arith.constant 0 : index
    %c0_35 = arith.constant 0 : index
    %32 = vector.load %arg6[%c1_33, %c0_34, %c0_35] : memref<3x28x56xf32, #tpu.memory_space<vmem>>, vector<1x28x56xf32>
    %33 = vector.shape_cast %32 : vector<1x28x56xf32> to vector<28x56xf32>
    %cst_36 = arith.constant dense<0.000000e+00> : vector<28x448xf32>
    %34 = tpu.matmul %33, %23, %cst_36 {dimension_numbers = #tpu.dot_dimension_numbers<[1], [0], [0], [1], [0, 0, 1, 1], [], []>} : vector<28x56xf32>, vector<56x448xf32>, vector<28x448xf32> -> vector<28x448xf32>
    %c1_37 = arith.constant 1 : index
    %c0_38 = arith.constant 0 : index
    %c0_39 = arith.constant 0 : index
    %35 = vector.load %arg3[%c1_37, %c0_38, %c0_39] : memref<3x448x448xf32, #tpu.memory_space<vmem>>, vector<1x448x448xf32>
    %36 = vector.shape_cast %35 : vector<1x448x448xf32> to vector<448x448xf32>
    %cst_40 = arith.constant dense<0.000000e+00> : vector<28x448xf32>
    %37 = tpu.matmul %34, %36, %cst_40 {dimension_numbers = #tpu.dot_dimension_numbers<[1], [0], [0], [1], [0, 0, 1, 1], [], []>} : vector<28x448xf32>, vector<448x448xf32>, vector<28x448xf32> -> vector<28x448xf32>
    %38 = arith.addf %31, %37 : vector<28x448xf32>
    %c2_41 = arith.constant 2 : index
    %c0_42 = arith.constant 0 : index
    %c0_43 = arith.constant 0 : index
    %39 = vector.load %arg6[%c2_41, %c0_42, %c0_43] : memref<3x28x56xf32, #tpu.memory_space<vmem>>, vector<1x28x56xf32>
    %40 = vector.shape_cast %39 : vector<1x28x56xf32> to vector<28x56xf32>
    %cst_44 = arith.constant dense<0.000000e+00> : vector<28x448xf32>
    %41 = tpu.matmul %40, %23, %cst_44 {dimension_numbers = #tpu.dot_dimension_numbers<[1], [0], [0], [1], [0, 0, 1, 1], [], []>} : vector<28x56xf32>, vector<56x448xf32>, vector<28x448xf32> -> vector<28x448xf32>
    %c2_45 = arith.constant 2 : index
    %c0_46 = arith.constant 0 : index
    %c0_47 = arith.constant 0 : index
    %42 = vector.load %arg3[%c2_45, %c0_46, %c0_47] : memref<3x448x448xf32, #tpu.memory_space<vmem>>, vector<1x448x448xf32>
    %43 = vector.shape_cast %42 : vector<1x448x448xf32> to vector<448x448xf32>
    %cst_48 = arith.constant dense<0.000000e+00> : vector<28x448xf32>
    %44 = tpu.matmul %41, %43, %cst_48 {dimension_numbers = #tpu.dot_dimension_numbers<[1], [0], [0], [1], [0, 0, 1, 1], [], []>} : vector<28x448xf32>, vector<448x448xf32>, vector<28x448xf32> -> vector<28x448xf32>
    %45 = arith.addf %38, %44 : vector<28x448xf32>
    %c0_49 = arith.constant 0 : index
    %c0_50 = arith.constant 0 : index
    %46 = vector.load %arg5[%c0_49, %c0_50] : memref<1x448xf32, #tpu.memory_space<vmem>>, vector<1x448xf32>
    %47 = vector.broadcast %46 : vector<1x448xf32> to vector<28x448xf32>
    %48 = arith.addf %45, %47 : vector<28x448xf32>
    %cst_51 = arith.constant 0.000000e+00 : f32
    %49 = vector.broadcast %cst_51 : f32 to vector<28x448xf32>
    %50 = arith.maximumf %48, %49 : vector<28x448xf32>
    %c0_52 = arith.constant 0 : index
    %c0_53 = arith.constant 0 : index
    %51 = vector.load %arg7[%c0_52, %c0_53] : memref<14x28xf32, #tpu.memory_space<vmem>>, vector<14x28xf32>
    %cst_54 = arith.constant dense<0.000000e+00> : vector<14x448xf32>
    %52 = tpu.matmul %51, %50, %cst_54 {dimension_numbers = #tpu.dot_dimension_numbers<[1], [0], [0], [1], [0, 0, 1, 1], [], []>} : vector<14x28xf32>, vector<28x448xf32>, vector<14x448xf32> -> vector<14x448xf32>
    %c0_55 = arith.constant 0 : index
    %c0_56 = arith.constant 0 : index
    %53 = vector.load %arg8[%c0_55, %c0_56] : memref<448x224xf32, #tpu.memory_space<vmem>>, vector<448x224xf32>
    %cst_57 = arith.constant dense<0.000000e+00> : vector<14x224xf32>
    %54 = tpu.matmul %52, %53, %cst_57 {dimension_numbers = #tpu.dot_dimension_numbers<[1], [0], [0], [1], [0, 0, 1, 1], [], []>} : vector<14x448xf32>, vector<448x224xf32>, vector<14x224xf32> -> vector<14x224xf32>
    %c0_58 = arith.constant 0 : index
    %c0_59 = arith.constant 0 : index
    %c0_60 = arith.constant 0 : index
    %55 = vector.load %arg9[%c0_58, %c0_59, %c0_60] : memref<1x14x224xf32, #tpu.memory_space<vmem>>, vector<1x14x224xf32>
    %56 = vector.shape_cast %55 : vector<1x14x224xf32> to vector<14x224xf32>
    %57 = vector.shape_cast %54 : vector<14x224xf32> to vector<1x14x224xf32>
    tpu.vector_store %arg9[%c0_58, %c0_59, %c0_60], %57 {strides = array<i32>} : memref<1x14x224xf32, #tpu.memory_space<vmem>>, vector<1x14x224xf32>,
    return
  }
  func.func @transform_0(%arg0: i32) -> (i32, i32, i32, i32) {
    %c0_i32 = arith.constant 0 : i32
    %c0_i32_0 = arith.constant 0 : i32
    %c0_i32_1 = arith.constant 0 : i32
    %c0_i32_2 = arith.constant 0 : i32
    return %arg0, %c0_i32, %c0_i32_0, %c0_i32_1 : i32, i32, i32, i32
  }
  func.func @transform_1(%arg0: i32) -> (i32, i32, i32) {
    %c0_i32 = arith.constant 0 : i32
    %c0_i32_0 = arith.constant 0 : i32
    %c0_i32_1 = arith.constant 0 : i32
    %c0_i32_2 = arith.constant 0 : i32
    return %c0_i32, %c0_i32_0, %c0_i32_1 : i32, i32, i32
  }
  func.func @transform_2(%arg0: i32) -> (i32, i32, i32) {
    %c0_i32 = arith.constant 0 : i32
    %c0_i32_0 = arith.constant 0 : i32
    %c0_i32_1 = arith.constant 0 : i32
    %c0_i32_2 = arith.constant 0 : i32
    return %c0_i32, %c0_i32_0, %c0_i32_1 : i32, i32, i32
  }
  func.func @transform_3(%arg0: i32) -> (i32, i32) {
    %c0_i32 = arith.constant 0 : i32
    %c0_i32_0 = arith.constant 0 : i32
    %c0_i32_1 = arith.constant 0 : i32
    return %c0_i32, %c0_i32_0 : i32, i32
  }
  func.func @transform_4(%arg0: i32) -> (i32, i32) {
    %c0_i32 = arith.constant 0 : i32
    %c0_i32_0 = arith.constant 0 : i32
    %c0_i32_1 = arith.constant 0 : i32
    return %c0_i32, %c0_i32_0 : i32, i32
  }
  func.func @transform_5(%arg0: i32) -> (i32, i32, i32) {
    %c0_i32 = arith.constant 0 : i32
    %c0_i32_0 = arith.constant 0 : i32
    %c0_i32_1 = arith.constant 0 : i32
    %c0_i32_2 = arith.constant 0 : i32
    return %c0_i32, %c0_i32_0, %c0_i32_1 : i32, i32, i32
  }
  func.func @transform_6(%arg0: i32) -> (i32, i32) {
    %c0_i32 = arith.constant 0 : i32
    %c0_i32_0 = arith.constant 0 : i32
    %c0_i32_1 = arith.constant 0 : i32
    return %c0_i32, %c0_i32_0 : i32, i32
  }
  func.func @transform_7(%arg0: i32) -> (i32, i32) {
    %c0_i32 = arith.constant 0 : i32
    %c0_i32_0 = arith.constant 0 : i32
    %c0_i32_1 = arith.constant 0 : i32
    return %c0_i32, %c0_i32_0 : i32, i32
  }
  func.func @transform_8(%arg0: i32) -> (i32, i32, i32) {
    %c0_i32 = arith.constant 0 : i32
    %c0_i32_0 = arith.constant 0 : i32
    %c0_i32_1 = arith.constant 0 : i32
    return %arg0, %c0_i32, %c0_i32_0 : i32, i32, i32
  }
}

module attributes {stable_mosaic.version = 11 : i64} {
  func.func @_fc_kernel(%arg0: i32, %arg1: memref<2x1568xf32, #tpu.memory_space<vmem>>, %arg2: memref<1568x64xf32, #tpu.memory_space<vmem>>, %arg3: memref<1x64xf32, #tpu.memory_space<vmem>>, %arg4: memref<64x128xf32, #tpu.memory_space<vmem>>, %arg5: memref<1x128xf32, #tpu.memory_space<vmem>>, %arg6: memref<2x128xf32, #tpu.memory_space<vmem>>) attributes {dimension_semantics = [#tpu.dimension_semantics<parallel>], iteration_bounds = array<i64: 1>, scalar_prefetch = 0 : i64, scratch_operands = 0 : i64, tpu.core_type = #tpu.core_type<tc>, window_params = [{transform_indices = @transform_0, window_bounds = array<i64: 2, 1568>}, {pipeline_mode = #tpu.pipeline_mode<synchronous>, transform_indices = @transform_1, window_bounds = array<i64: 1568, 64>}, {pipeline_mode = #tpu.pipeline_mode<synchronous>, transform_indices = @transform_2, window_bounds = array<i64: 1, 64>}, {pipeline_mode = #tpu.pipeline_mode<synchronous>, transform_indices = @transform_3, window_bounds = array<i64: 64, 128>}, {pipeline_mode = #tpu.pipeline_mode<synchronous>, transform_indices = @transform_4, window_bounds = array<i64: 1, 128>}, {transform_indices = @transform_5, window_bounds = array<i64: 2, 128>}]} {
    %c0 = arith.constant 0 : index
    %c0_0 = arith.constant 0 : index
    %0 = vector.load %arg1[%c0, %c0_0] : memref<2x1568xf32, #tpu.memory_space<vmem>>, vector<2x1568xf32>
    %c0_1 = arith.constant 0 : index
    %c0_2 = arith.constant 0 : index
    %1 = vector.load %arg2[%c0_1, %c0_2] : memref<1568x64xf32, #tpu.memory_space<vmem>>, vector<1568x64xf32>
    %cst = arith.constant dense<0.000000e+00> : vector<2x64xf32>
    %2 = tpu.matmul %0, %1, %cst {dimension_numbers = #tpu.dot_dimension_numbers<[1], [0], [0], [1], [0, 0, 1, 1], [], []>} : vector<2x1568xf32>, vector<1568x64xf32>, vector<2x64xf32> -> vector<2x64xf32>
    %c0_3 = arith.constant 0 : index
    %c0_4 = arith.constant 0 : index
    %3 = vector.load %arg3[%c0_3, %c0_4] : memref<1x64xf32, #tpu.memory_space<vmem>>, vector<1x64xf32>
    %4 = vector.broadcast %3 : vector<1x64xf32> to vector<2x64xf32>
    %5 = arith.addf %2, %4 : vector<2x64xf32>
    %cst_5 = arith.constant 0.000000e+00 : f32
    %6 = vector.broadcast %cst_5 : f32 to vector<2x64xf32>
    %7 = arith.maximumf %5, %6 : vector<2x64xf32>
    %c0_6 = arith.constant 0 : index
    %c0_7 = arith.constant 0 : index
    %8 = vector.load %arg4[%c0_6, %c0_7] : memref<64x128xf32, #tpu.memory_space<vmem>>, vector<64x128xf32>
    %cst_8 = arith.constant dense<0.000000e+00> : vector<2x128xf32>
    %9 = tpu.matmul %7, %8, %cst_8 {dimension_numbers = #tpu.dot_dimension_numbers<[1], [0], [0], [1], [0, 0, 1, 1], [], []>} : vector<2x64xf32>, vector<64x128xf32>, vector<2x128xf32> -> vector<2x128xf32>
    %c0_9 = arith.constant 0 : index
    %c0_10 = arith.constant 0 : index
    %10 = vector.load %arg5[%c0_9, %c0_10] : memref<1x128xf32, #tpu.memory_space<vmem>>, vector<1x128xf32>
    %11 = vector.broadcast %10 : vector<1x128xf32> to vector<2x128xf32>
    %12 = arith.addf %9, %11 : vector<2x128xf32>
    %c0_11 = arith.constant 0 : index
    %c0_12 = arith.constant 0 : index
    %13 = vector.load %arg6[%c0_11, %c0_12] : memref<2x128xf32, #tpu.memory_space<vmem>>, vector<2x128xf32>
    tpu.vector_store %arg6[%c0_11, %c0_12], %12 {strides = array<i32>} : memref<2x128xf32, #tpu.memory_space<vmem>>, vector<2x128xf32>,
    return
  }
  func.func @transform_0(%arg0: i32) -> (i32, i32) {
    %c0_i32 = arith.constant 0 : i32
    %c0_i32_0 = arith.constant 0 : i32
    return %arg0, %c0_i32 : i32, i32
  }
  func.func @transform_1(%arg0: i32) -> (i32, i32) {
    %c0_i32 = arith.constant 0 : i32
    %c0_i32_0 = arith.constant 0 : i32
    %c0_i32_1 = arith.constant 0 : i32
    return %c0_i32, %c0_i32_0 : i32, i32
  }
  func.func @transform_2(%arg0: i32) -> (i32, i32) {
    %c0_i32 = arith.constant 0 : i32
    %c0_i32_0 = arith.constant 0 : i32
    %c0_i32_1 = arith.constant 0 : i32
    return %c0_i32, %c0_i32_0 : i32, i32
  }
  func.func @transform_3(%arg0: i32) -> (i32, i32) {
    %c0_i32 = arith.constant 0 : i32
    %c0_i32_0 = arith.constant 0 : i32
    %c0_i32_1 = arith.constant 0 : i32
    return %c0_i32, %c0_i32_0 : i32, i32
  }
  func.func @transform_4(%arg0: i32) -> (i32, i32) {
    %c0_i32 = arith.constant 0 : i32
    %c0_i32_0 = arith.constant 0 : i32
    %c0_i32_1 = arith.constant 0 : i32
    return %c0_i32, %c0_i32_0 : i32, i32
  }
  func.func @transform_5(%arg0: i32) -> (i32, i32) {
    %c0_i32 = arith.constant 0 : i32
    %c0_i32_0 = arith.constant 0 : i32
    return %arg0, %c0_i32 : i32, i32
  }
}

</mosaic_0001>

<bundles_post_ra>
// kernel: forward.3
= control target key start
LH: loop header
LB: loop body
LE: loop exit
PB: predicated region body
PF: predicated region fallthrough
CT: control target
= control target key end

     0   :  { %10 = vsyncpa [#allocation3], 0  ;;  %s1399_s0 = inlined_call_operand.vmem [shape: f32[2,1568], index: 0, kind: input, shape index: {}]   ;;  %s1400_s1 = inlined_call_operand.vmem [shape: f32[1568,64], index: 1, kind: input, shape index: {}]   ;;  %s1401_s2 = inlined_call_operand.hbm [shape: f32[1,64], index: 2, kind: input, shape index: {}]   ;;  %s1402_s3 = inlined_call_operand.hbm [shape: f32[64,128], index: 3, kind: input, shape index: {}]   ;;  %s1403_s4 = inlined_call_operand.hbm [shape: f32[1,128], index: 4, kind: input, shape index: {}]   ;;  %s1404_s5 = inlined_call_operand.hbm [shape: f32[2,128], index: 5, kind: output, shape index: {}]  }
   0x1   :  { %11 = vsyncpa [#allocation6], 0  ;;  %s32_s20 = sshll.u32 %s1402_s3, 4  ;;  %s33_s20 = int_to_ptr.hbm [resolvable:$true] %s32_s20 }
   0x2   :  { %12 = vsyncpa [#allocation4], 0  ;;  %s733_s21 = smov [#allocation5]   ;;  %s22_s25 = sshll.u32 %s1401_s2, 4  ;;  %s23_s25 = int_to_ptr.hbm [resolvable:$true] %s22_s25 }
   0x3   :  { %s34_s22 = sshll.u32 %s733_s21, 4  ;;  %s734_s26 = smov 128   ;;  %s35_s22 = int_to_ptr.vmem [resolvable:$true] %s34_s22 }
   0x4   :  { %s735_s27 = smov 8   ;;  %s736_s28 = smov [#allocation2]  }
   0x5   :  { %40 = dma.hbm_to_vmem [thread:$0]  %s33_s20, 1024, %s35_s22, [#allocation6], %s734_s26, %s734_s26, %s735_s27  }
   0x6   :  { %s24_s29 = sshll.u32 %s736_s28, 4  ;;  %s46_s7 = sshll.u32 %s1403_s4, 4  ;;  %s25_s29 = int_to_ptr.vmem [resolvable:$true] %s24_s29  ;;  %s47_s7 = int_to_ptr.hbm [resolvable:$true] %s46_s7 }
   0x7   :  { %27 = dma.hbm_to_vmem [thread:$0]  %s23_s25, 16, %s25_s29, [#allocation3]  }
   0x8   :  { %s737_s3 = smov [#allocation7]  }
   0x9   :  { %s48_s8 = sshll.u32 %s737_s3, 4  ;;  %s49_s8 = int_to_ptr.vmem [resolvable:$true] %s48_s8 }
   0xa   :  { %51 = dma.hbm_to_vmem [thread:$0]  %s47_s7, 16, %s49_s8, [#allocation6]  }
   0xb   :  { %727 = dma.done.wait [#allocation3], 16  }
   0xc   :  { %728 = vsyncadd [#allocation3], 4294967280 }
   0xd   :  { %729 = dma.done.wait [#allocation6], 1040  }
   0xe   :  { %730 = vsyncadd [#allocation6], 4294966256  ;;  %v83_v0 = vld [vmem:[%s1400_s1 + $0x78] sm:$0xff]  ;;  %v82_v2 = vld [vmem:[%s1400_s1 + $0x70] sm:$0xff]  ;;  %vm302_vm0 = vcmask 261120   ;;  %vm578_vm1 = vcmask 523264  }
   0xf   :  { %v115_v1 = vld [vmem:[%s1400_s1 + $0x178] sm:$0xff]  ;;  %305 = vmatpush.msra.mxu0 %v83_v0  ;;  %v114_v4 = vld [vmem:[%s1400_s1 + $0x170] sm:$0xff]  ;;  %v81_v6 = vld [vmem:[%s1400_s1 + $0x68] sm:$0xff]  ;;  %s610_s12 = sshll.u32 %s1404_s5, 4  ;;  %s611_s12 = int_to_ptr.hbm [resolvable:$true] %s610_s12 }
  0x10   :  { %345 = vmatpush.msra.mxu2 %v115_v1  ;;  %v99_v3 = vld [vmem:[%s1400_s1 + $0xf8] sm:$0xff]  ;;  %v98_v7 = vld [vmem:[%s1400_s1 + $0xf0] sm:$0xff]  ;;  %v113_v8 = vld [vmem:[%s1400_s1 + $0x168] sm:$0xff] }
  0x11   :  { %v131_v5 = vld [vmem:[%s1400_s1 + $0x1f8] sm:$0xff]  ;;  %325 = vmatpush.msra.mxu1 %v99_v3  ;;  %306 = vmatpush.msra.mxu0 %v82_v2  ;;  %v130_v9 = vld [vmem:[%s1400_s1 + $0x1f0] sm:$0xff]  ;;  %v97_v10 = vld [vmem:[%s1400_s1 + $0xe8] sm:$0xff] }
  0x12   :  { %365 = vmatpush.msra.mxu3 %v131_v5  ;;  %346 = vmatpush.msra.mxu2 %v114_v4  ;;  %v80_v11 = vld [vmem:[%s1400_s1 + $0x60] sm:$0xff]  ;;  %v129_v13 = vld [vmem:[%s1400_s1 + $0x1e8] sm:$0xff]  ;;  %v79_v16 = vld [vmem:[%s1400_s1 + $0x58] sm:$0xff] }
  0x13   :  { %326 = vmatpush.msra.mxu1 %v98_v7  ;;  %v112_v12 = vld [vmem:[%s1400_s1 + $0x160] sm:$0xff]  ;;  %307 = vmatpush.msra.mxu0 %v81_v6  ;;  %v111_v17 = vld [vmem:[%s1400_s1 + $0x158] sm:$0xff]  ;;  %v78_v20 = vld [vmem:[%s1400_s1 + $0x50] sm:$0xff] }
  0x14   :  { %366 = vmatpush.msra.mxu3 %v130_v9  ;;  %347 = vmatpush.msra.mxu2 %v113_v8  ;;  %v96_v14 = vld [vmem:[%s1400_s1 + $0xe0] sm:$0xff]  ;;  %v95_v18 = vld [vmem:[%s1400_s1 + $0xd8] sm:$0xff]  ;;  %v110_v21 = vld [vmem:[%s1400_s1 + $0x150] sm:$0xff] }
  0x15   :  { %v128_v15 = vld [vmem:[%s1400_s1 + $0x1e0] sm:$0xff]  ;;  %327 = vmatpush.msra.mxu1 %v97_v10  ;;  %308 = vmatpush.msra.mxu0 %v80_v11  ;;  %v127_v19 = vld [vmem:[%s1400_s1 + $0x1d8] sm:$0xff]  ;;  %v94_v22 = vld [vmem:[%s1400_s1 + $0xd0] sm:$0xff] }
  0x16   :  { %367 = vmatpush.msra.mxu3 %v129_v13  ;;  %348 = vmatpush.msra.mxu2 %v112_v12  ;;  %v126_v23 = vld [vmem:[%s1400_s1 + $0x1d0] sm:$0xff]  ;;  %v77_v24 = vld [vmem:[%s1400_s1 + $0x48] sm:$0xff]  ;;  %v76_v28 = vld [vmem:[%s1400_s1 + $0x40] sm:$0xff] }
  0x17   :  { %328 = vmatpush.msra.mxu1 %v96_v14  ;;  %309 = vmatpush.msra.mxu0 %v79_v16  ;;  %v109_v25 = vld [vmem:[%s1400_s1 + $0x148] sm:$0xff]  ;;  %v108_v29 = vld [vmem:[%s1400_s1 + $0x140] sm:$0xff]  ;;  %v75_v32 = vld [vmem:[%s1400_s1 + $0x38] sm:$0xff] }
  0x18   :  { %368 = vmatpush.msra.mxu3 %v128_v15  ;;  %349 = vmatpush.msra.mxu2 %v111_v17  ;;  %v93_v26 = vld [vmem:[%s1400_s1 + $0xc8] sm:$0xff]  ;;  %v92_v30 = vld [vmem:[%s1400_s1 + $0xc0] sm:$0xff]  ;;  %v107_v33 = vld [vmem:[%s1400_s1 + $0x138] sm:$0xff] }
  0x19   :  { %329 = vmatpush.msra.mxu1 %v95_v18  ;;  %310 = vmatpush.msra.mxu0 %v78_v20  ;;  %v125_v27 = vld [vmem:[%s1400_s1 + $0x1c8] sm:$0xff]  ;;  %v124_v31 = vld [vmem:[%s1400_s1 + $0x1c0] sm:$0xff]  ;;  %v91_v34 = vld [vmem:[%s1400_s1 + $0xb8] sm:$0xff] }
  0x1a   :  { %369 = vmatpush.msra.mxu3 %v127_v19  ;;  %350 = vmatpush.msra.mxu2 %v110_v21  ;;  %v123_v35 = vld [vmem:[%s1400_s1 + $0x1b8] sm:$0xff]  ;;  %v74_v36 = vld [vmem:[%s1400_s1 + $0x30] sm:$0xff]  ;;  %v73_v40 = vld [vmem:[%s1400_s1 + $0x28] sm:$0xff] }
  0x1b   :  { %330 = vmatpush.msra.mxu1 %v94_v22  ;;  %311 = vmatpush.msra.mxu0 %v77_v24  ;;  %v106_v37 = vld [vmem:[%s1400_s1 + $0x130] sm:$0xff]  ;;  %v105_v41 = vld [vmem:[%s1400_s1 + $0x128] sm:$0xff]  ;;  %v72_v44 = vld [vmem:[%s1400_s1 + $0x20] sm:$0xff] }
  0x1c   :  { %370 = vmatpush.msra.mxu3 %v126_v23  ;;  %351 = vmatpush.msra.mxu2 %v109_v25  ;;  %v90_v38 = vld [vmem:[%s1400_s1 + $0xb0] sm:$0xff]  ;;  %v89_v42 = vld [vmem:[%s1400_s1 + $0xa8] sm:$0xff]  ;;  %v104_v45 = vld [vmem:[%s1400_s1 + $0x120] sm:$0xff] }
  0x1d   :  { %331 = vmatpush.msra.mxu1 %v93_v26  ;;  %312 = vmatpush.msra.mxu0 %v76_v28  ;;  %v122_v39 = vld [vmem:[%s1400_s1 + $0x1b0] sm:$0xff]  ;;  %v121_v43 = vld [vmem:[%s1400_s1 + $0x1a8] sm:$0xff]  ;;  %v88_v46 = vld [vmem:[%s1400_s1 + $0xa0] sm:$0xff] }
  0x1e   :  { %371 = vmatpush.msra.mxu3 %v125_v27  ;;  %352 = vmatpush.msra.mxu2 %v108_v29  ;;  %v120_v47 = vld [vmem:[%s1400_s1 + $0x1a0] sm:$0xff]  ;;  %v71_v48 = vld [vmem:[%s1400_s1 + $0x18] sm:$0xff]  ;;  %v70_v52 = vld [vmem:[%s1400_s1 + $0x10] sm:$0xff] }
  0x1f   :  { %332 = vmatpush.msra.mxu1 %v92_v30  ;;  %313 = vmatpush.msra.mxu0 %v75_v32  ;;  %v103_v49 = vld [vmem:[%s1400_s1 + $0x118] sm:$0xff]  ;;  %v102_v53 = vld [vmem:[%s1400_s1 + $0x110] sm:$0xff]  ;;  %v69_v56 = vld [vmem:[%s1400_s1 + $0x8] sm:$0xff] }
  0x20   :  { %372 = vmatpush.msra.mxu3 %v124_v31  ;;  %353 = vmatpush.msra.mxu2 %v107_v33  ;;  %v87_v50 = vld [vmem:[%s1400_s1 + $0x98] sm:$0xff]  ;;  %v86_v54 = vld [vmem:[%s1400_s1 + $0x90] sm:$0xff]  ;;  %v101_v57 = vld [vmem:[%s1400_s1 + $0x108] sm:$0xff] }
  0x21   :  { %333 = vmatpush.msra.mxu1 %v91_v34  ;;  %314 = vmatpush.msra.mxu0 %v74_v36  ;;  %v119_v51 = vld [vmem:[%s1400_s1 + $0x198] sm:$0xff]  ;;  %v118_v55 = vld [vmem:[%s1400_s1 + $0x190] sm:$0xff]  ;;  %v85_v58 = vld [vmem:[%s1400_s1 + $0x88] sm:$0xff] }
  0x22   :  { %373 = vmatpush.msra.mxu3 %v123_v35  ;;  %354 = vmatpush.msra.mxu2 %v106_v37  ;;  %v117_v59 = vld [vmem:[%s1400_s1 + $0x188] sm:$0xff]  ;;  %v68_v60 = vld [vmem:[%s1400_s1] sm:$0xff]  ;;  %v147_v62 = vld [vmem:[%s1400_s1 + $0x278] sm:$0xff] }
  0x23   :  { %334 = vmatpush.msra.mxu1 %v90_v38  ;;  %315 = vmatpush.msra.mxu0 %v73_v40  ;;  %v100_v61 = vld [vmem:[%s1400_s1 + $0x100] sm:$0xff]  ;;  %v179_v63 = vld [vmem:[%s1400_s1 + $0x378] sm:$0xff]  ;;  %v146_v2 = vld [vmem:[%s1400_s1 + $0x270] sm:$0xff] }
  0x24   :  { %374 = vmatpush.msra.mxu3 %v122_v39  ;;  %355 = vmatpush.msra.mxu2 %v105_v41  ;;  %v84_v0 = vld [vmem:[%s1400_s1 + $0x80] sm:$0xff]  ;;  %v163_v3 = vld [vmem:[%s1400_s1 + $0x2f8] sm:$0xff]  ;;  %v178_v4 = vld [vmem:[%s1400_s1 + $0x370] sm:$0xff] }
  0x25   :  { %335 = vmatpush.msra.mxu1 %v89_v42  ;;  %316 = vmatpush.msra.mxu0 %v72_v44  ;;  %v116_v1 = vld [vmem:[%s1400_s1 + $0x180] sm:$0xff]  ;;  %v195_v5 = vld [vmem:[%s1400_s1 + $0x3f8] sm:$0xff]  ;;  %v145_v6 = vld [vmem:[%s1400_s1 + $0x268] sm:$0xff] }
  0x26   :  { %375 = vmatpush.msra.mxu3 %v121_v43  ;;  %356 = vmatpush.msra.mxu2 %v104_v45  ;;  %v162_v7 = vld [vmem:[%s1400_s1 + $0x2f0] sm:$0xff]  ;;  %v177_v8 = vld [vmem:[%s1400_s1 + $0x368] sm:$0xff]  ;;  %v144_v10 = vld [vmem:[%s1400_s1 + $0x260] sm:$0xff] }
  0x27   :  { %336 = vmatpush.msra.mxu1 %v88_v46  ;;  %317 = vmatpush.msra.mxu0 %v71_v48  ;;  %v194_v9 = vld [vmem:[%s1400_s1 + $0x3f0] sm:$0xff]  ;;  %v161_v11 = vld [vmem:[%s1400_s1 + $0x2e8] sm:$0xff]  ;;  %v176_v12 = vld [vmem:[%s1400_s1 + $0x360] sm:$0xff] }
  0x28   :  { %376 = vmatpush.msra.mxu3 %v120_v47  ;;  %357 = vmatpush.msra.mxu2 %v103_v49  ;;  %v193_v13 = vld [vmem:[%s1400_s1 + $0x3e8] sm:$0xff]  ;;  %v143_v14 = vld [vmem:[%s1400_s1 + $0x258] sm:$0xff]  ;;  %v160_v15 = vld [vmem:[%s1400_s1 + $0x2e0] sm:$0xff] }
  0x29   :  { %337 = vmatpush.msra.mxu1 %v87_v50  ;;  %318 = vmatpush.msra.mxu0 %v70_v52  ;;  %v175_v16 = vld [vmem:[%s1400_s1 + $0x358] sm:$0xff]  ;;  %v192_v17 = vld [vmem:[%s1400_s1 + $0x3e0] sm:$0xff]  ;;  %v142_v18 = vld [vmem:[%s1400_s1 + $0x250] sm:$0xff] }
  0x2a   :  { %377 = vmatpush.msra.mxu3 %v119_v51  ;;  %358 = vmatpush.msra.mxu2 %v102_v53  ;;  %v159_v19 = vld [vmem:[%s1400_s1 + $0x2d8] sm:$0xff]  ;;  %v174_v20 = vld [vmem:[%s1400_s1 + $0x350] sm:$0xff]  ;;  %v141_v22 = vld [vmem:[%s1400_s1 + $0x248] sm:$0xff] }
  0x2b   :  { %338 = vmatpush.msra.mxu1 %v86_v54  ;;  %319 = vmatpush.msra.mxu0 %v69_v56  ;;  %v191_v21 = vld [vmem:[%s1400_s1 + $0x3d8] sm:$0xff]  ;;  %v158_v23 = vld [vmem:[%s1400_s1 + $0x2d0] sm:$0xff]  ;;  %v173_v24 = vld [vmem:[%s1400_s1 + $0x348] sm:$0xff] }
  0x2c   :  { %378 = vmatpush.msra.mxu3 %v118_v55  ;;  %359 = vmatpush.msra.mxu2 %v101_v57  ;;  %v190_v25 = vld [vmem:[%s1400_s1 + $0x3d0] sm:$0xff]  ;;  %v64_v26 = vld [vmem:[%s1399_s0] sm:$0xff]  ;;  %v157_v28 = vld [vmem:[%s1400_s1 + $0x2c8] sm:$0xff] }
  0x2d   :  { %339 = vmatpush.msra.mxu1 %v85_v58  ;;  %320 = vmatpush.msra.mxu0 %v68_v60  ;;  %v140_v27 = vld [vmem:[%s1400_s1 + $0x240] sm:$0xff]  ;;  %272 = vst [vmem:[#allocation1] ss:$4 sm:$0xff] %v64_v26  ;;  %v189_v30 = vld [vmem:[%s1400_s1 + $0x3c8] sm:$0xff]  ;;  %v139_v31 = vld [vmem:[%s1400_s1 + $0x238] sm:$0xff] }
  0x2e   :  { %379 = vmatpush.msra.mxu3 %v117_v59  ;;  %360 = vmatpush.msra.mxu2 %v100_v61  ;;  %v172_v29 = vld [vmem:[%s1400_s1 + $0x340] sm:$0xff]  ;;  %v171_v33 = vld [vmem:[%s1400_s1 + $0x338] sm:$0xff]  ;;  %v138_v35 = vld [vmem:[%s1400_s1 + $0x230] sm:$0xff] }
  0x2f   :  { %385 = vmatpush.msrb.mxu0 %v147_v62  ;;  %340 = vmatpush.msra.mxu1 %v84_v0  ;;  %v156_v32 = vld [vmem:[%s1400_s1 + $0x2c0] sm:$0xff]  ;;  %v155_v36 = vld [vmem:[%s1400_s1 + $0x2b8] sm:$0xff]  ;;  %v170_v37 = vld [vmem:[%s1400_s1 + $0x330] sm:$0xff] }
  0x30   :  { %425 = vmatpush.msrb.mxu2 %v179_v63  ;;  %380 = vmatpush.msra.mxu3 %v116_v1  ;;  %v188_v34 = vld [vmem:[%s1400_s1 + $0x3c0] sm:$0xff]  ;;  %v187_v38 = vld [vmem:[%s1400_s1 + $0x3b8] sm:$0xff]  ;;  %v137_v39 = vld [vmem:[%s1400_s1 + $0x228] sm:$0xff] }
  0x31   :  { %386 = vmatpush.msrb.mxu0 %v146_v2  ;;  %405 = vmatpush.msrb.mxu1 %v163_v3  ;;  %v154_v40 = vld [vmem:[%s1400_s1 + $0x2b0] sm:$0xff]  ;;  %v169_v41 = vld [vmem:[%s1400_s1 + $0x328] sm:$0xff]  ;;  %v136_v44 = vld [vmem:[%s1400_s1 + $0x220] sm:$0xff] }
  0x32   :  { %426 = vmatpush.msrb.mxu2 %v178_v4  ;;  %445 = vmatpush.msrb.mxu3 %v195_v5  ;;  %v186_v42 = vld [vmem:[%s1400_s1 + $0x3b0] sm:$0xff]  ;;  %v65_v43 = vld [vmem:[%s1399_s0 + $0x8] sm:$0xff]  ;;  %v168_v47 = vld [vmem:[%s1400_s1 + $0x320] sm:$0xff] }
  0x33   :  { %387 = vmatpush.msrb.mxu0 %v145_v6  ;;  %406 = vmatpush.msrb.mxu1 %v162_v7  ;;  %v153_v45 = vld [vmem:[%s1400_s1 + $0x2a8] sm:$0xff]  ;;  %v66_v46 = vld [vmem:[%s1399_s0 + $0x10] sm:$0xff]  ;;  %274 = vst [vmem:[#allocation1 + $0x20] ss:$4 sm:$0xff] %v65_v43  ;;  %v135_v53 = vld [vmem:[%s1400_s1 + $0x218] sm:$0xff] }
  0x34   :  { %427 = vmatpush.msrb.mxu2 %v177_v8  ;;  %446 = vmatpush.msrb.mxu3 %v194_v9  ;;  %v275_v48 = vld.sshfl [vmem:[#allocation1] sm:$0xff pattern:$0x73625140]  ;;  %v277_v49 = vld.sshfl [vmem:[#allocation1 + $0x10] sm:$0xff pattern:$0x73625140] }
  0x35   :  { %388 = vmatpush.msrb.mxu0 %v144_v10  ;;  %407 = vmatpush.msrb.mxu1 %v161_v11  ;;  %v1114_v50 = vld.sshfl [vmem:[#allocation1 + $0x8] sm:$0xff pattern:$0x73625140]  ;;  %v1116_v51 = vld.sshfl [vmem:[#allocation1 + $0x18] sm:$0xff pattern:$0x73625140] }
  0x36   :  { %428 = vmatpush.msrb.mxu2 %v176_v12  ;;  %447 = vmatpush.msrb.mxu3 %v193_v13  ;;  %v185_v52 = vld [vmem:[%s1400_s1 + $0x3a8] sm:$0xff]  ;;  %v152_v54 = vld [vmem:[%s1400_s1 + $0x2a0] sm:$0xff]  ;;  %283 = vst [vmem:[#allocation1] ss:$4 sm:$0xff] %v66_v46  ;;  %v167_v55 = vld [vmem:[%s1400_s1 + $0x318] sm:$0xff] }
  0x37   :  { %389 = vmatpush.msrb.mxu0 %v143_v14  ;;  %408 = vmatpush.msrb.mxu1 %v160_v15  ;;  %v184_v56 = vld [vmem:[%s1400_s1 + $0x3a0] sm:$0xff]  ;;  %v134_v57 = vld [vmem:[%s1400_s1 + $0x210] sm:$0xff]  ;;  %v151_v58 = vld [vmem:[%s1400_s1 + $0x298] sm:$0xff] }
  0x38   :  { %429 = vmatpush.msrb.mxu2 %v175_v16  ;;  %448 = vmatpush.msrb.mxu3 %v192_v17  ;;  %v166_v59 = vld [vmem:[%s1400_s1 + $0x310] sm:$0xff]  ;;  %v183_v60 = vld [vmem:[%s1400_s1 + $0x398] sm:$0xff]  ;;  %v133_v61 = vld [vmem:[%s1400_s1 + $0x208] sm:$0xff] }
  0x39   :  { %390 = vmatpush.msrb.mxu0 %v142_v18  ;;  %409 = vmatpush.msrb.mxu1 %v159_v19  ;;  %v150_v62 = vld [vmem:[%s1400_s1 + $0x290] sm:$0xff]  ;;  %v67_v63 = vld [vmem:[%s1399_s0 + $0x18] sm:$0x3]  ;;  %v165_v4 = vld [vmem:[%s1400_s1 + $0x308] sm:$0xff] }
  0x3a   :  { %430 = vmatpush.msrb.mxu2 %v174_v20  ;;  %449 = vmatpush.msrb.mxu3 %v191_v21  ;;  %v1154_v0 = vld.sshfl [vmem:[#allocation1 + $0x30] sm:$0xff pattern:$0x73625140]  ;;  %v1156_v1 = vld.sshfl [vmem:[#allocation1 + $0x20] sm:$0xff pattern:$0x73625140] }
  0x3b   :  { %391 = vmatpush.msrb.mxu0 %v141_v22  ;;  %410 = vmatpush.msrb.mxu1 %v158_v23  ;;  %v1158_v2 = vld.sshfl [vmem:[#allocation1 + $0x38] sm:$0xff pattern:$0x73625140]  ;;  %v1160_v3 = vld.sshfl [vmem:[#allocation1 + $0x28] sm:$0xff pattern:$0x73625140] }
  0x3c   :  { %431 = vmatpush.msrb.mxu2 %v173_v24  ;;  %450 = vmatpush.msrb.mxu3 %v190_v25  ;;  %v182_v5 = vld [vmem:[%s1400_s1 + $0x390] sm:$0xff]  ;;  %284 = vst [vmem:[#allocation1 + $0x20] ss:$4 sm:$0xff] %v67_v63  ;;  %v132_v6 = vld [vmem:[%s1400_s1 + $0x200] sm:$0xff]  ;;  %v149_v7 = vld [vmem:[%s1400_s1 + $0x288] sm:$0xff] }
  0x3d   :  { %392 = vmatpush.msrb.mxu0 %v140_v27  ;;  %411 = vmatpush.msrb.mxu1 %v157_v28  ;;  %v164_v8 = vld [vmem:[%s1400_s1 + $0x300] sm:$0xff]  ;;  %v181_v9 = vld [vmem:[%s1400_s1 + $0x388] sm:$0xff]  ;;  %v211_v10 = vld [vmem:[%s1400_s1 + $0x478] sm:$0xff] }
  0x3e   :  { %432 = vmatpush.msrb.mxu2 %v172_v29  ;;  %451 = vmatpush.msrb.mxu3 %v189_v30  ;;  %v243_v11 = vld [vmem:[%s1400_s1 + $0x578] sm:$0xff]  ;;  %v148_v12 = vld [vmem:[%s1400_s1 + $0x280] sm:$0xff]  ;;  %v210_v14 = vld [vmem:[%s1400_s1 + $0x470] sm:$0xff] }
  0x3f   :  { %393 = vmatpush.msrb.mxu0 %v139_v31  ;;  %412 = vmatpush.msrb.mxu1 %v156_v32  ;;  %v180_v13 = vld [vmem:[%s1400_s1 + $0x380] sm:$0xff]  ;;  %v227_v15 = vld [vmem:[%s1400_s1 + $0x4f8] sm:$0xff]  ;;  %v242_v16 = vld [vmem:[%s1400_s1 + $0x570] sm:$0xff] }
  0x40   :  { %433 = vmatpush.msrb.mxu2 %v171_v33  ;;  %452 = vmatpush.msrb.mxu3 %v188_v34  ;;  %v259_v17 = vld [vmem:[%s1400_s1 + $0x5f8] sm:$0xff]  ;;  %v209_v18 = vld [vmem:[%s1400_s1 + $0x468] sm:$0xff]  ;;  %v226_v19 = vld [vmem:[%s1400_s1 + $0x4f0] sm:$0xff] }
  0x41   :  { %394 = vmatpush.msrb.mxu0 %v138_v35  ;;  %413 = vmatpush.msrb.mxu1 %v155_v36  ;;  %v241_v20 = vld [vmem:[%s1400_s1 + $0x568] sm:$0xff]  ;;  %v258_v21 = vld [vmem:[%s1400_s1 + $0x5f0] sm:$0xff]  ;;  %v208_v22 = vld [vmem:[%s1400_s1 + $0x460] sm:$0xff] }
  0x42   :  { %434 = vmatpush.msrb.mxu2 %v170_v37  ;;  %453 = vmatpush.msrb.mxu3 %v187_v38  ;;  %v225_v23 = vld [vmem:[%s1400_s1 + $0x4e8] sm:$0xff]  ;;  %v240_v24 = vld [vmem:[%s1400_s1 + $0x560] sm:$0xff]  ;;  %v207_v26 = vld [vmem:[%s1400_s1 + $0x458] sm:$0xff] }
  0x43   :  { %395 = vmatpush.msrb.mxu0 %v137_v39  ;;  %414 = vmatpush.msrb.mxu1 %v154_v40  ;;  %v257_v25 = vld [vmem:[%s1400_s1 + $0x5e8] sm:$0xff]  ;;  %v224_v27 = vld [vmem:[%s1400_s1 + $0x4e0] sm:$0xff]  ;;  %v239_v28 = vld [vmem:[%s1400_s1 + $0x558] sm:$0xff] }
  0x44   :  { %435 = vmatpush.msrb.mxu2 %v169_v41  ;;  %454 = vmatpush.msrb.mxu3 %v186_v42  ;;  %v256_v29 = vld [vmem:[%s1400_s1 + $0x5e0] sm:$0xff]  ;;  %v206_v30 = vld [vmem:[%s1400_s1 + $0x450] sm:$0xff]  ;;  %v223_v31 = vld [vmem:[%s1400_s1 + $0x4d8] sm:$0xff] }
  0x45   :  { %396 = vmatpush.msrb.mxu0 %v136_v44  ;;  %415 = vmatpush.msrb.mxu1 %v153_v45  ;;  %v238_v32 = vld [vmem:[%s1400_s1 + $0x550] sm:$0xff]  ;;  %v255_v33 = vld [vmem:[%s1400_s1 + $0x5d8] sm:$0xff]  ;;  %v205_v34 = vld [vmem:[%s1400_s1 + $0x448] sm:$0xff] }
  0x46   :  { %436 = vmatpush.msrb.mxu2 %v168_v47  ;;  %455 = vmatpush.msrb.mxu3 %v185_v52  ;;  %v222_v35 = vld [vmem:[%s1400_s1 + $0x4d0] sm:$0xff]  ;;  %v237_v36 = vld [vmem:[%s1400_s1 + $0x548] sm:$0xff]  ;;  %v204_v38 = vld [vmem:[%s1400_s1 + $0x440] sm:$0xff] }
  0x47   :  { %397 = vmatpush.msrb.mxu0 %v135_v53  ;;  %416 = vmatpush.msrb.mxu1 %v152_v54  ;;  %v254_v37 = vld [vmem:[%s1400_s1 + $0x5d0] sm:$0xff]  ;;  %v221_v39 = vld [vmem:[%s1400_s1 + $0x4c8] sm:$0xff]  ;;  %v236_v40 = vld [vmem:[%s1400_s1 + $0x540] sm:$0xff] }
  0x48   :  { %437 = vmatpush.msrb.mxu2 %v167_v55  ;;  %456 = vmatpush.msrb.mxu3 %v184_v56  ;;  %v253_v41 = vld [vmem:[%s1400_s1 + $0x5c8] sm:$0xff]  ;;  %v203_v42 = vld [vmem:[%s1400_s1 + $0x438] sm:$0xff]  ;;  %v220_v43 = vld [vmem:[%s1400_s1 + $0x4c0] sm:$0xff] }
  0x49   :  { %398 = vmatpush.msrb.mxu0 %v134_v57  ;;  %417 = vmatpush.msrb.mxu1 %v151_v58  ;;  %v235_v44 = vld [vmem:[%s1400_s1 + $0x538] sm:$0xff]  ;;  %v252_v45 = vld [vmem:[%s1400_s1 + $0x5c0] sm:$0xff]  ;;  %v202_v46 = vld [vmem:[%s1400_s1 + $0x430] sm:$0xff] }
  0x4a   :  { %438 = vmatpush.msrb.mxu2 %v166_v59  ;;  %457 = vmatpush.msrb.mxu3 %v183_v60  ;;  %v219_v47 = vld [vmem:[%s1400_s1 + $0x4b8] sm:$0xff]  ;;  %v233_v52 = vld [vmem:[%s1400_s1 + $0x528] sm:$0xff]  ;;  %v250_v53 = vld [vmem:[%s1400_s1 + $0x5b0] sm:$0xff] }
  0x4b   :  { %399 = vmatpush.msrb.mxu0 %v133_v61  ;;  %418 = vmatpush.msrb.mxu1 %v150_v62  ;;  %v200_v54 = vld [vmem:[%s1400_s1 + $0x420] sm:$0xff]  ;;  %v217_v55 = vld [vmem:[%s1400_s1 + $0x4a8] sm:$0xff]  ;;  %v199_v58 = vld [vmem:[%s1400_s1 + $0x418] sm:$0xff] }
  0x4c   :  { %439 = vmatpush.msrb.mxu2 %v165_v4  ;;  %458 = vmatpush.msrb.mxu3 %v182_v5  ;;  %v232_v56 = vld [vmem:[%s1400_s1 + $0x520] sm:$0xff]  ;;  %v249_v57 = vld [vmem:[%s1400_s1 + $0x5a8] sm:$0xff]  ;;  %v231_v60 = vld [vmem:[%s1400_s1 + $0x518] sm:$0xff] }
  0x4d   :  { %400 = vmatpush.msrb.mxu0 %v132_v6  ;;  %419 = vmatpush.msrb.mxu1 %v149_v7  ;;  %v216_v59 = vld [vmem:[%s1400_s1 + $0x4a0] sm:$0xff]  ;;  %v198_v62 = vld [vmem:[%s1400_s1 + $0x410] sm:$0xff]  ;;  %v215_v63 = vld [vmem:[%s1400_s1 + $0x498] sm:$0xff] }
  0x4e   :  { %440 = vmatpush.msrb.mxu2 %v164_v8  ;;  %459 = vmatpush.msrb.mxu3 %v181_v9  ;;  %v248_v61 = vld [vmem:[%s1400_s1 + $0x5a0] sm:$0xff]  ;;  %v229_v4 = vld [vmem:[%s1400_s1 + $0x508] sm:$0xff]  ;;  %v246_v5 = vld [vmem:[%s1400_s1 + $0x590] sm:$0xff] }
  0x4f   :  { %321 = vmatmul.f32.vlgmr.msra.gmra.mxu0 %v275_v48  ;;  %361 = vmatmul.f32.vlgmr.msra.gmra.mxu2 %v277_v49  ;;  %v234_v48 = vld [vmem:[%s1400_s1 + $0x530] sm:$0xff]  ;;  %v251_v49 = vld [vmem:[%s1400_s1 + $0x5b8] sm:$0xff]  ;;  %v196_v6 = vld [vmem:[%s1400_s1 + $0x400] sm:$0xff] }
  0x50   :  { %465 = vmatpush.msra.mxu0 %v211_v10  ;;  %505 = vmatpush.msra.mxu2 %v243_v11  ;;  %v213_v7 = vld [vmem:[%s1400_s1 + $0x488] sm:$0xff]  ;;  %v228_v8 = vld [vmem:[%s1400_s1 + $0x500] sm:$0xff]  ;;  %v287_v11 = vld.sshfl [vmem:[#allocation1 + $0x10] sm:$0xff pattern:$0x73625140] }
  0x51   :  { %420 = vmatpush.msrb.mxu1 %v148_v12  ;;  %460 = vmatpush.msrb.mxu3 %v180_v13  ;;  %v245_v9 = vld [vmem:[%s1400_s1 + $0x588] sm:$0xff]  ;;  %v285_v10 = vld.sshfl [vmem:[#allocation1] sm:$0xff pattern:$0x73625140] }
  0x52   :  { %341 = vmatmul.f32.vlgmr.msra.gmra.mxu1 %v1114_v50  ;;  %381 = vmatmul.f32.vlgmr.msra.gmra.mxu3 %v1116_v51  ;;  %v201_v50 = vld [vmem:[%s1400_s1 + $0x428] sm:$0xff]  ;;  %v218_v51 = vld [vmem:[%s1400_s1 + $0x4b0] sm:$0xff]  ;;  %v212_v12 = vld [vmem:[%s1400_s1 + $0x480] sm:$0xff] }
  0x53   :  { %466 = vmatpush.msra.mxu0 %v210_v14  ;;  %485 = vmatpush.msra.mxu1 %v227_v15  ;;  %v244_v13 = vld [vmem:[%s1400_s1 + $0x580] sm:$0xff]  ;;  %v286_v14 = vld.sshfl [vmem:[#allocation1 + $0x8] sm:$0xff pattern:$0x73625140] }
  0x54   :  { %506 = vmatpush.msra.mxu2 %v242_v16  ;;  %525 = vmatpush.msra.mxu3 %v259_v17  ;;  %v288_v15 = vld.sshfl [vmem:[#allocation1 + $0x18] sm:$0xff pattern:$0x73625140]  ;;  %v262_v17 = vld [vmem:[%s1400_s1 + $0x610] sm:$0xff] }
  0x55   :  { %467 = vmatpush.msra.mxu0 %v209_v18  ;;  %486 = vmatpush.msra.mxu1 %v226_v19  ;;  %v263_v16 = vld [vmem:[%s1400_s1 + $0x618] sm:$0xff]  ;;  %v261_v18 = vld [vmem:[%s1400_s1 + $0x608] sm:$0xff]  ;;  %v260_v19 = vld [vmem:[%s1400_s1 + $0x600] sm:$0xff] }
  0x56   :  { %507 = vmatpush.msra.mxu2 %v241_v20  ;;  %526 = vmatpush.msra.mxu3 %v258_v21  ;;  %v289_v20 = vld.sshfl [vmem:[#allocation1 + $0x20] sm:$0xff pattern:$0x73625140]  ;;  %v629_v21 = vld [vmem:[#allocation2] ss:$0 sm:$0xff] }
  0x57   :  { %468 = vmatpush.msra.mxu0 %v208_v22  ;;  %487 = vmatpush.msra.mxu1 %v225_v23  ;;  %v573_v22 = vld [vmem:[#allocation5 + $0x38] sm:$0xff] }
  0x58   :  { %508 = vmatpush.msra.mxu2 %v240_v24  ;;  %527 = vmatpush.msra.mxu3 %v257_v25  ;;  %v572_v24 = vld [vmem:[#allocation5 + $0x30] sm:$0xff] }
  0x59   :  { %441 = vmatmul.f32.vlgmr.msrb.gmra.mxu2 %v1154_v0  ;;  %469 = vmatpush.msra.mxu0 %v207_v26  ;;  %v230_v0 = vld [vmem:[%s1400_s1 + $0x510] sm:$0xff] }
  0x5a   :  { %488 = vmatpush.msra.mxu1 %v224_v27  ;;  %509 = vmatpush.msra.mxu2 %v239_v28  ;;  %v571_v26 = vld [vmem:[#allocation5 + $0x28] sm:$0xff]  ;;  %v570_v28 = vld [vmem:[#allocation5 + $0x20] sm:$0xff] }
  0x5b   :  { %528 = vmatpush.msra.mxu3 %v256_v29  ;;  %401 = vmatmul.f32.vlgmr.msrb.gmra.mxu0 %v1156_v1  ;;  %v247_v1 = vld [vmem:[%s1400_s1 + $0x598] sm:$0xff] }
  0x5c   :  { %461 = vmatmul.f32.vlgmr.msrb.gmra.mxu3 %v1158_v2  ;;  %470 = vmatpush.msra.mxu0 %v206_v30  ;;  %v197_v2 = vld [vmem:[%s1400_s1 + $0x408] sm:$0xff] }
  0x5d   :  { %489 = vmatpush.msra.mxu1 %v223_v31  ;;  %510 = vmatpush.msra.mxu2 %v238_v32  ;;  %v569_v30 = vld [vmem:[#allocation5 + $0x18] sm:$0xff]  ;;  %v568_v32 = vld [vmem:[#allocation5 + $0x10] sm:$0xff] }
  0x5e   :  { %529 = vmatpush.msra.mxu3 %v255_v33  ;;  %421 = vmatmul.f32.vlgmr.msrb.gmra.mxu1 %v1160_v3  ;;  %v214_v3 = vld [vmem:[%s1400_s1 + $0x490] sm:$0xff]  ;;  %s738_s1 = smov [#allocation8]  }
  0x5f   :  { %471 = vmatpush.msra.mxu0 %v205_v34  ;;  %490 = vmatpush.msra.mxu1 %v222_v35  ;;  %v567_v34 = vld [vmem:[#allocation5 + $0x8] sm:$0xff]  ;;  %s608_s10 = sshll.u32 %s738_s1, 4  ;;  %s609_s10 = int_to_ptr.vmem [resolvable:$true] %s608_s10 }
  0x60   :  { %511 = vmatpush.msra.mxu2 %v237_v36  ;;  %530 = vmatpush.msra.mxu3 %v254_v37  ;;  %v566_v36 = vld [vmem:[#allocation5] sm:$0xff] }
  0x61   :  { %472 = vmatpush.msra.mxu0 %v204_v38  ;;  %491 = vmatpush.msra.mxu1 %v221_v39 }
  0x62   :  { %512 = vmatpush.msra.mxu2 %v236_v40  ;;  %531 = vmatpush.msra.mxu3 %v253_v41 }
  0x63   :  { %473 = vmatpush.msra.mxu0 %v203_v42  ;;  %492 = vmatpush.msra.mxu1 %v220_v43 }
  0x64   :  { %513 = vmatpush.msra.mxu2 %v235_v44  ;;  %532 = vmatpush.msra.mxu3 %v252_v45 }
  0x65   :  { %474 = vmatpush.msra.mxu0 %v202_v46  ;;  %493 = vmatpush.msra.mxu1 %v219_v47 }
  0x66   :  { %514 = vmatpush.msra.mxu2 %v234_v48  ;;  %533 = vmatpush.msra.mxu3 %v251_v49 }
  0x67   :  { %475 = vmatpush.msra.mxu0 %v201_v50  ;;  %494 = vmatpush.msra.mxu1 %v218_v51 }
  0x68   :  { %515 = vmatpush.msra.mxu2 %v233_v52  ;;  %534 = vmatpush.msra.mxu3 %v250_v53 }
  0x69   :  { %476 = vmatpush.msra.mxu0 %v200_v54  ;;  %495 = vmatpush.msra.mxu1 %v217_v55 }
  0x6a   :  { %516 = vmatpush.msra.mxu2 %v232_v56  ;;  %535 = vmatpush.msra.mxu3 %v249_v57  ;;  %v630_v57 = vld [vmem:[#allocation7] ss:$0 sm:$0xff] }
  0x6b   :  { %477 = vmatpush.msra.mxu0 %v199_v58  ;;  %496 = vmatpush.msra.mxu1 %v216_v59 }
  0x6c   :  { %517 = vmatpush.msra.mxu2 %v231_v60  ;;  %536 = vmatpush.msra.mxu3 %v248_v61 }
  0x6d   :  { %478 = vmatpush.msra.mxu0 %v198_v62  ;;  %497 = vmatpush.msra.mxu1 %v215_v63 }
  0x6e   :  { %518 = vmatpush.msra.mxu2 %v230_v0  ;;  %537 = vmatpush.msra.mxu3 %v247_v1 }
  0x6f   :  { %479 = vmatpush.msra.mxu0 %v197_v2  ;;  %498 = vmatpush.msra.mxu1 %v214_v3 }
  0x70   :  { %519 = vmatpush.msra.mxu2 %v229_v4  ;;  %538 = vmatpush.msra.mxu3 %v246_v5 }
  0x71   :  { %480 = vmatpush.msra.mxu0 %v196_v6  ;;  %499 = vmatpush.msra.mxu1 %v213_v7 }
  0x72   :  { %520 = vmatpush.msra.mxu2 %v228_v8  ;;  %539 = vmatpush.msra.mxu3 %v245_v9 }
  0x73   :  { %481 = vmatmul.f32.vlgmr.msra.gmra.mxu0 %v285_v10  ;;  %521 = vmatmul.f32.vlgmr.msra.gmra.mxu2 %v287_v11 }
  0x74   :  { %500 = vmatpush.msra.mxu1 %v212_v12  ;;  %540 = vmatpush.msra.mxu3 %v244_v13 }
  0x75   :  { %501 = vmatmul.f32.vlgmr.msra.gmra.mxu1 %v286_v14  ;;  %541 = vmatmul.f32.vlgmr.msra.gmra.mxu3 %v288_v15 }
  0x76   :  { %557 = vmatpush.msrb.mxu0 %v263_v16  ;;  %590 = vmatpush.msrb.mxu1 %v573_v22 }
  0x78   :  { %558 = vmatpush.msrb.mxu0 %v262_v17  ;;  %591 = vmatpush.msrb.mxu1 %v572_v24 }
  0x7a   :  { %559 = vmatpush.msrb.mxu0 %v261_v18  ;;  %592 = vmatpush.msrb.mxu1 %v571_v26 }
  0x7c   :  { %560 = vmatpush.msrb.mxu0 %v260_v19  ;;  %593 = vmatpush.msrb.mxu1 %v570_v28 }
  0x7d   :  { %621 = vmatmul.msk.f32.vlgmr.msrb.gmra.mxu0 %vm302_vm0, %v289_v20 }
  0x7e   :  { %594 = vmatpush.msrb.mxu1 %v569_v30 }
  0x80   :  { %595 = vmatpush.msrb.mxu1 %v568_v32 }
  0x82   :  { %596 = vmatpush.msrb.mxu1 %v567_v34 }
  0x84   :  { %597 = vmatpush.msrb.mxu1 %v566_v36 }
  0xcc   :  { %v322_v23 = vpop.f32.mrf.mxu0 }
  0xcd   :  { %v323_v25 = vadd.f32 %v629_v21, %v322_v23 }
  0xcf   :  { %v342_v27 = vpop.f32.mrf.mxu1 }
  0xd0   :  { %v343_v29 = vadd.f32 %v342_v27, %v323_v25 }
  0xd2   :  { %v362_v31 = vpop.f32.mrf.mxu2 }
  0xd3   :  { %v363_v33 = vadd.f32 %v362_v31, %v343_v29 }
  0xd5   :  { %v382_v35 = vpop.f32.mrf.mxu3 }
  0xd6   :  { %v383_v37 = vadd.f32 %v382_v35, %v363_v33 }
  0xd8   :  { %v402_v38 = vpop.f32.mrf.mxu0 }
  0xd9   :  { %v403_v39 = vadd.f32 %v402_v38, %v383_v37 }
  0xdb   :  { %v422_v40 = vpop.f32.mrf.mxu1 }
  0xdc   :  { %v423_v41 = vadd.f32 %v422_v40, %v403_v39  ;;  %v442_v42 = vpop.f32.mrf.mxu2 }
  0xde   :  { %v443_v43 = vadd.f32 %v442_v42, %v423_v41 }
  0xdf   :  { %v462_v44 = vpop.f32.mrf.mxu3 }
  0xe0   :  { %v463_v45 = vadd.f32 %v462_v44, %v443_v43 }
  0xf0   :  { %v482_v46 = vpop.f32.mrf.mxu0 }
  0xf1   :  { %v483_v47 = vadd.f32 %v482_v46, %v463_v45 }
  0xf2   :  { %v502_v48 = vpop.f32.mrf.mxu1 }
  0xf3   :  { %v503_v49 = vadd.f32 %v502_v48, %v483_v47 }
  0xf6   :  { %v522_v50 = vpop.f32.mrf.mxu2 }
  0xf7   :  { %v523_v51 = vadd.f32 %v522_v50, %v503_v49 }
  0xf8   :  { %v542_v52 = vpop.f32.mrf.mxu3 }
  0xf9   :  { %v543_v53 = vadd.f32 %v542_v52, %v523_v51 }
  0xfa   :  { %v562_v54 = vpop.f32.mrf.mxu0 }
  0xfb   :  { %v563_v55 = vadd.f32 %v562_v54, %v543_v53 }
  0xfd   :  { %v565_v56 = vmax.f32 %v563_v55, 0.0 }
  0xff   :  { %622 = vmatmul.msk.f32.vlgmr.msrb.gmra.mxu1 %vm578_vm1, %v565_v56 }
 0x17c   :  { %v599_v58 = vpop.f32.mrf.mxu1 }
 0x17d   :  { %v600_v59 = vadd.f32 %v630_v57, %v599_v58 }
 0x17f   :  { %602 = vst [vmem:[#allocation8] sm:$0x3] %v600_v59 }
 0x180   :  { %613 = dma.vmem_to_hbm [thread:$0]  %s609_s10, 32, %s611_s12, [#allocation4]  }
 0x181   :  { %731 = dma.done.wait [#allocation4], 32  }
 0x182   :  { %732 = vsyncadd [#allocation4], 4294967264 }
 0x183   :  { %618 = vsyncpa [#allocation3], 1 }
 0x184   :  { %619 = vsyncpa [#allocation6], 1 }
 0x185   :  { %620 = vsyncpa [#allocation4], 1 }

// kernel: forward.2
= control target key start
LH: loop header
LB: loop body
LE: loop exit
PB: predicated region body
PF: predicated region fallthrough
CT: control target
= control target key end

     0   :  { %13 = vsyncpa [#allocation3], 0  ;;  %s5695_s0 = inlined_call_operand.vmem [shape: f32[1,3,56,28], index: 0, kind: input, shape index: {}]   ;;  %s5696_s1 = inlined_call_operand.hbm [shape: f32[3,28,448], index: 1, kind: input, shape index: {}]   ;;  %s5697_s2 = inlined_call_operand.hbm [shape: f32[3,448,448], index: 2, kind: input, shape index: {}]   ;;  %s5698_s3 = inlined_call_operand.hbm [shape: f32[1,448], index: 3, kind: input, shape index: {}]   ;;  %s5699_s4 = inlined_call_operand.hbm [shape: f32[1,448], index: 4, kind: input, shape index: {}]   ;;  %s5700_s5 = inlined_call_operand.hbm [shape: f32[3,28,56], index: 5, kind: input, shape index: {}]   ;;  %s5701_s6 = inlined_call_operand.hbm [shape: f32[14,28], index: 6, kind: input, shape index: {}]   ;;  %s5702_s7 = inlined_call_operand.hbm [shape: f32[448,224], index: 7, kind: input, shape index: {}]   ;;  %s5703_s8 = inlined_call_operand.vmem [shape: f32[1,14,224], index: 8, kind: output, shape index: {}]  }
   0x1   :  { %14 = vsyncpa [#allocation5], 0 }
   0x2   :  { %15 = vsyncpa [#allocation8], 0 }
   0x3   :  { %16 = vsyncpa [#allocation11], 0  ;;  %s36_s29 = sshll.u32 %s5697_s2, 4  ;;  %s4265_s30 = smov [#allocation4]   ;;  %s37_s29 = int_to_ptr.hbm [resolvable:$true] %s36_s29 }
   0x4   :  { %s38_s9 = sshll.u32 %s4265_s30, 4  ;;  %s61_s12 = sshll.u32 %s5699_s4, 4  ;;  %s39_s9 = int_to_ptr.vmem [resolvable:$true] %s38_s9  ;;  %s62_s12 = int_to_ptr.hbm [resolvable:$true] %s61_s12 }
   0x5   :  { %s4266_s13 = smov 512   ;;  %s4267_s14 = smov 32  }
   0x6   :  { %44 = dma.hbm_to_vmem [thread:$0]  %s37_s29, 86016, %s39_s9, [#allocation5], %s4266_s13, %s4266_s13, %s4267_s14  }
   0x7   :  { %s4268_s15 = smov [#allocation7]   ;;  %s84_s2 = sshll.u32 %s5701_s6, 4  ;;  %s85_s2 = int_to_ptr.hbm [resolvable:$true] %s84_s2 }
   0x8   :  { %s63_s16 = sshll.u32 %s4268_s15, 4  ;;  %s4269_s19 = smov [#allocation10]   ;;  %s64_s16 = int_to_ptr.vmem [resolvable:$true] %s63_s16 }
   0x9   :  { %66 = dma.hbm_to_vmem [thread:$0]  %s62_s12, 64, %s64_s16, [#allocation8]  }
   0xa   :  { %s86_s20 = sshll.u32 %s4269_s19, 4  ;;  %s23_s4 = sshll.u32 %s5696_s1, 4  ;;  %s87_s20 = int_to_ptr.vmem [resolvable:$true] %s86_s20  ;;  %s24_s4 = int_to_ptr.hbm [resolvable:$true] %s23_s4 }
   0xb   :  { %s4270_s23 = smov 128   ;;  %s4271_s24 = smov 8  }
   0xc   :  { %92 = dma.hbm_to_vmem [thread:$0]  %s85_s2, 256, %s87_s20, [#allocation11], %s4270_s23, %s4270_s23, %s4271_s24  }
   0xd   :  { %s4272_s25 = smov [#allocation2]   ;;  %s50_s29 = sshll.u32 %s5698_s3, 4  ;;  %s51_s29 = int_to_ptr.hbm [resolvable:$true] %s50_s29 }
   0xe   :  { %s25_s26 = sshll.u32 %s4272_s25, 4  ;;  %s71_s9 = sshll.u32 %s5700_s5, 4  ;;  %s26_s26 = int_to_ptr.vmem [resolvable:$true] %s25_s26  ;;  %s72_s9 = int_to_ptr.hbm [resolvable:$true] %s71_s9 }
   0xf   :  { %31 = dma.hbm_to_vmem [thread:$0]  %s24_s4, 6144, %s26_s26, [#allocation3], %s4266_s13, %s4266_s13, %s4267_s14  }
  0x10   :  { %s4273_s10 = smov [#allocation6]   ;;  %s4274_s1 = smov [#allocation9]  }
  0x11   :  { %s52_s11 = sshll.u32 %s4273_s10, 4  ;;  %s73_s12 = sshll.u32 %s4274_s1, 4  ;;  %s53_s11 = int_to_ptr.vmem [resolvable:$true] %s52_s11  ;;  %s74_s12 = int_to_ptr.vmem [resolvable:$true] %s73_s12 }
  0x12   :  { %55 = dma.hbm_to_vmem [thread:$0]  %s51_s29, 64, %s53_s11, [#allocation5]  }
  0x13   :  { %s97_s17 = sshll.u32 %s5702_s7, 4  ;;  %s4275_s3 = smov [#allocation12]   ;;  %s98_s17 = int_to_ptr.hbm [resolvable:$true] %s97_s17 }
  0x14   :  { %79 = dma.hbm_to_vmem [thread:$0]  %s72_s9, 1536, %s74_s12, [#allocation8], %s4270_s23, %s4270_s23, %s4271_s24  }
  0x15   :  { %s99_s13 = sshll.u32 %s4275_s3, 4  ;;  %s4276_s14 = smov 256   ;;  %s100_s13 = int_to_ptr.vmem [resolvable:$true] %s99_s13 }
  0x16   :  { %s4277_s18 = smov 16  }
  0x17   :  { %105 = dma.hbm_to_vmem [thread:$0]  %s98_s17, 14336, %s100_s13, [#allocation11], %s4276_s14, %s4276_s14, %s4277_s18  }
  0x18   :  { %4257 = dma.done.wait [#allocation3], 6144  }
  0x19   :  { %4258 = vsyncadd [#allocation3], 4294961152 }
  0x1a   :  { %4259 = dma.done.wait [#allocation5], 86080  }
  0x1b   :  { %4260 = vsyncadd [#allocation5], 4294881216 }
  0x1c   :  { %4261 = dma.done.wait [#allocation8], 1600  }
  0x1d   :  { %4262 = vsyncadd [#allocation8], 4294965696 }
  0x1e   :  { %4263 = dma.done.wait [#allocation11], 14592  }
  0x1f   :  { %4264 = vsyncadd [#allocation11], 4294952704  ;;  %vm204_vm0 = vcmask 1043456   ;;  %v178_v0 = vld [vmem:[#allocation2 + $0xe0] sm:$0xf]  ;;  %v175_v3 = vld [vmem:[#allocation2 + $0xc8] sm:$0xff] }
  0x20   :  { %v179_v1 = vld [vmem:[#allocation2 + $0xe8] sm:$0xf]  ;;  %v174_v2 = vld [vmem:[#allocation2 + $0xc0] sm:$0xff]  ;;  %3853 = vmatpush.msk.msra.mxu0 %vm204_vm0, %v178_v0  ;;  %4068 = vmatpush.msk.msra.mxu2 %vm204_vm0, %v178_v0  ;;  %v3846_v8 = vld [vmem:[%s5695_s0 + $0x38] sm:$0xff]  ;;  %vm182_vm1 = vcmask 228352   ;;  %vm862_vm2 = vcmask 457728  }
  0x21   :  { %3861 = vmatpush.msk.msra.mxu1 %vm204_vm0, %v179_v1  ;;  %4072 = vmatpush.msk.msra.mxu3 %vm204_vm0, %v179_v1  ;;  %v170_v4 = vld [vmem:[#allocation2 + $0xa0] sm:$0xff]  ;;  %v171_v5 = vld [vmem:[#allocation2 + $0xa8] sm:$0xff]  ;;  %v180_v10 = vld [vmem:[#allocation2 + $0xf0] sm:$0xf]  ;;  %vm1573_vm3 = vcmask 523264   ;;  %vm3833_vm4 = vcmask 785408  }
  0x22   :  { %230 = vmatpush.msra.mxu0 %v174_v2  ;;  %4069 = vmatpush.msra.mxu2 %v174_v2  ;;  %v166_v6 = vld [vmem:[#allocation2 + $0x80] sm:$0xff]  ;;  %v167_v7 = vld [vmem:[#allocation2 + $0x88] sm:$0xff]  ;;  %v181_v11 = vld [vmem:[#allocation2 + $0xf8] sm:$0xf]  ;;  %vm3836_vm5 = vcmask 783360  }
  0x23   :  { %268 = vmatpush.msra.mxu1 %v175_v3  ;;  %4073 = vmatpush.msra.mxu3 %v175_v3  ;;  %v4354_v9 = vld [vmem:[%s5695_s0 + $0x68] sm:$0xff]  ;;  %v176_v12 = vld [vmem:[#allocation2 + $0xd0] sm:$0xff]  ;;  %v177_v13 = vld [vmem:[#allocation2 + $0xd8] sm:$0xff] }
  0x24   :  { %231 = vmatpush.msra.mxu0 %v170_v4  ;;  %4070 = vmatpush.msra.mxu2 %v170_v4  ;;  %v172_v14 = vld [vmem:[#allocation2 + $0xb0] sm:$0xff]  ;;  %v173_v15 = vld [vmem:[#allocation2 + $0xb8] sm:$0xff]  ;;  %v3847_v18 = vld [vmem:[%s5695_s0 + $0x40] sm:$0xff] }
  0x25   :  { %269 = vmatpush.msra.mxu1 %v171_v5  ;;  %4074 = vmatpush.msra.mxu3 %v171_v5  ;;  %v168_v16 = vld [vmem:[#allocation2 + $0x90] sm:$0xff]  ;;  %v169_v17 = vld [vmem:[#allocation2 + $0x98] sm:$0xff]  ;;  %v153_v19 = vld [vmem:[#allocation2 + $0x60] sm:$0xf] }
  0x26   :  { %232 = vmatpush.msra.mxu0 %v166_v6  ;;  %4071 = vmatpush.msra.mxu2 %v166_v6  ;;  %v154_v20 = vld [vmem:[#allocation2 + $0x68] sm:$0xf]  ;;  %v149_v21 = vld [vmem:[#allocation2 + $0x40] sm:$0xff]  ;;  %v155_v28 = vld [vmem:[#allocation2 + $0x70] sm:$0xf] }
  0x27   :  { %270 = vmatpush.msra.mxu1 %v167_v7  ;;  %4075 = vmatpush.msra.mxu3 %v167_v7  ;;  %v150_v22 = vld [vmem:[#allocation2 + $0x48] sm:$0xff]  ;;  %v145_v23 = vld [vmem:[#allocation2 + $0x20] sm:$0xff]  ;;  %v156_v29 = vld [vmem:[#allocation2 + $0x78] sm:$0xf] }
  0x28   :  { %3854 = vmatmul.msk.f32.vlgmr.msra.gmra.mxu0 %vm182_vm1, %v3846_v8  ;;  %3860 = vmatmul.msk.f32.vlgmr.msra.gmra.mxu2 %vm182_vm1, %v4354_v9  ;;  %v146_v24 = vld [vmem:[#allocation2 + $0x28] sm:$0xff]  ;;  %v141_v26 = vld [vmem:[#allocation2] sm:$0xff]  ;;  %v3849_v30 = vld [vmem:[%s5695_s0 + $0x50] sm:$0xff] }
  0x29   :  { %3862 = vmatmul.msk.f32.vlgmr.msra.gmra.mxu1 %vm182_vm1, %v3846_v8  ;;  %3868 = vmatmul.msk.f32.vlgmr.msra.gmra.mxu3 %vm182_vm1, %v4354_v9  ;;  %v3848_v25 = vld [vmem:[%s5695_s0 + $0x48] sm:$0xff]  ;;  %v151_v31 = vld [vmem:[#allocation2 + $0x50] sm:$0xff]  ;;  %v152_v32 = vld [vmem:[#allocation2 + $0x58] sm:$0xff] }
  0x2a   :  { %3869 = vmatpush.msk.msrb.mxu2 %vm204_vm0, %v180_v10  ;;  %3877 = vmatpush.msk.msrb.mxu3 %vm204_vm0, %v181_v11  ;;  %v142_v27 = vld [vmem:[#allocation2 + $0x8] sm:$0xff]  ;;  %v147_v33 = vld [vmem:[#allocation2 + $0x30] sm:$0xff]  ;;  %v148_v34 = vld [vmem:[#allocation2 + $0x38] sm:$0xff] }
  0x2b   :  { %3885 = vmatpush.msk.msrb.mxu0 %vm204_vm0, %v153_v19  ;;  %3893 = vmatpush.msk.msrb.mxu1 %vm204_vm0, %v154_v20  ;;  %v143_v35 = vld [vmem:[#allocation2 + $0x10] sm:$0xff]  ;;  %v144_v36 = vld [vmem:[#allocation2 + $0x18] sm:$0xff]  ;;  %v3851_v38 = vld [vmem:[%s5695_s0 + $0x60] sm:$0xff] }
  0x2c   :  { %306 = vmatpush.msrb.mxu2 %v176_v12  ;;  %344 = vmatpush.msrb.mxu3 %v177_v13  ;;  %v3850_v37 = vld [vmem:[%s5695_s0 + $0x58] sm:$0xff]  ;;  %v134_v39 = vld [vmem:[%s5695_s0] sm:$0xff]  ;;  %v135_v40 = vld [vmem:[%s5695_s0 + $0x8] sm:$0xff] }
  0x2d   :  { %415 = vmatpush.msrb.mxu0 %v149_v21  ;;  %453 = vmatpush.msrb.mxu1 %v150_v22  ;;  %v136_v41 = vld [vmem:[%s5695_s0 + $0x10] sm:$0xff]  ;;  %v575_v42 = vld [vmem:[#allocation2 + $0x160] sm:$0xf]  ;;  %v576_v43 = vld [vmem:[#allocation2 + $0x168] sm:$0xf] }
  0x2e   :  { %307 = vmatpush.msrb.mxu2 %v172_v14  ;;  %345 = vmatpush.msrb.mxu3 %v173_v15  ;;  %v571_v44 = vld [vmem:[#allocation2 + $0x140] sm:$0xff]  ;;  %v572_v45 = vld [vmem:[#allocation2 + $0x148] sm:$0xff]  ;;  %v137_v48 = vld [vmem:[%s5695_s0 + $0x18] sm:$0xff] }
  0x2f   :  { %416 = vmatpush.msrb.mxu0 %v145_v23  ;;  %454 = vmatpush.msrb.mxu1 %v146_v24  ;;  %v567_v46 = vld [vmem:[#allocation2 + $0x120] sm:$0xff]  ;;  %v568_v47 = vld [vmem:[#allocation2 + $0x128] sm:$0xff]  ;;  %v577_v51 = vld [vmem:[#allocation2 + $0x170] sm:$0xf] }
  0x30   :  { %308 = vmatpush.msrb.mxu2 %v168_v16  ;;  %346 = vmatpush.msrb.mxu3 %v169_v17  ;;  %v563_v49 = vld [vmem:[#allocation2 + $0x100] sm:$0xff]  ;;  %v564_v50 = vld [vmem:[#allocation2 + $0x108] sm:$0xff]  ;;  %v578_v52 = vld [vmem:[#allocation2 + $0x178] sm:$0xf] }
  0x31   :  { %3855 = vmatmul.msk.f32.gmra.mxu0 %vm182_vm1, %v3847_v18  ;;  %3863 = vmatmul.msk.f32.gmra.mxu1 %vm182_vm1, %v3847_v18  ;;  %v138_v53 = vld [vmem:[%s5695_s0 + $0x20] sm:$0xff]  ;;  %v573_v54 = vld [vmem:[#allocation2 + $0x150] sm:$0xff]  ;;  %v574_v55 = vld [vmem:[#allocation2 + $0x158] sm:$0xff] }
  0x32   :  { %3870 = vmatmul.msk.f32.vlgmr.msrb.gmra.mxu2 %vm182_vm1, %v3846_v8  ;;  %3878 = vmatmul.msk.f32.vlgmr.msrb.gmra.mxu3 %vm182_vm1, %v3846_v8  ;;  %v569_v56 = vld [vmem:[#allocation2 + $0x130] sm:$0xff]  ;;  %v570_v57 = vld [vmem:[#allocation2 + $0x138] sm:$0xff]  ;;  %v139_v60 = vld [vmem:[%s5695_s0 + $0x28] sm:$0xff] }
  0x33   :  { %417 = vmatpush.msrb.mxu0 %v141_v26  ;;  %455 = vmatpush.msrb.mxu1 %v142_v27  ;;  %v565_v58 = vld [vmem:[#allocation2 + $0x110] sm:$0xff]  ;;  %v566_v59 = vld [vmem:[#allocation2 + $0x118] sm:$0xff]  ;;  %v3919_v0 = vld [vmem:[%s5695_s0 + $0x80] sm:$0xff] }
  0x34   :  { %3901 = vmatpush.msk.msra.mxu2 %vm204_vm0, %v155_v28  ;;  %3909 = vmatpush.msk.msra.mxu3 %vm204_vm0, %v156_v29  ;;  %v140_v61 = vld [vmem:[%s5695_s0 + $0x30] sm:$0xff]  ;;  %v3918_v63 = vld [vmem:[%s5695_s0 + $0x78] sm:$0xff]  ;;  %v3920_v3 = vld [vmem:[%s5695_s0 + $0x88] sm:$0xff] }
  0x35   :  { %3924 = vmatpush.msk.msra.mxu0 %vm204_vm0, %v575_v42  ;;  %3932 = vmatpush.msk.msra.mxu1 %vm204_vm0, %v576_v43  ;;  %v3917_v62 = vld [vmem:[%s5695_s0 + $0x70] sm:$0xff]  ;;  %v3922_v13 = vld [vmem:[%s5695_s0 + $0x98] sm:$0xff] }
  0x36   :  { %491 = vmatpush.msra.mxu2 %v151_v31  ;;  %529 = vmatpush.msra.mxu3 %v152_v32  ;;  %v3921_v8 = vld [vmem:[%s5695_s0 + $0x90] sm:$0xff] }
  0x37   :  { %625 = vmatpush.msra.mxu0 %v571_v44  ;;  %663 = vmatpush.msra.mxu1 %v572_v45 }
  0x38   :  { %492 = vmatpush.msra.mxu2 %v147_v33  ;;  %530 = vmatpush.msra.mxu3 %v148_v34 }
  0x39   :  { %3856 = vmatmul.msk.f32.gmra.mxu0 %vm182_vm1, %v3848_v25  ;;  %3864 = vmatmul.msk.f32.gmra.mxu1 %vm182_vm1, %v3848_v25 }
  0x3a   :  { %3871 = vmatmul.msk.f32.gmra.mxu2 %vm182_vm1, %v3847_v18  ;;  %3879 = vmatmul.msk.f32.gmra.mxu3 %vm182_vm1, %v3847_v18  ;;  %v3923_v18 = vld [vmem:[%s5695_s0 + $0xa0] sm:$0xff] }
  0x3b   :  { %493 = vmatpush.msra.mxu2 %v143_v35  ;;  %531 = vmatpush.msra.mxu3 %v144_v36 }
  0x3c   :  { %626 = vmatpush.msra.mxu0 %v567_v46  ;;  %664 = vmatpush.msra.mxu1 %v568_v47 }
  0x3d   :  { %3940 = vmatpush.msk.msrb.mxu2 %vm204_vm0, %v577_v51  ;;  %3948 = vmatpush.msk.msrb.mxu3 %vm204_vm0, %v578_v52 }
  0x3e   :  { %627 = vmatpush.msra.mxu0 %v563_v49  ;;  %665 = vmatpush.msra.mxu1 %v564_v50 }
  0x3f   :  { %701 = vmatpush.msrb.mxu2 %v573_v54  ;;  %739 = vmatpush.msrb.mxu3 %v574_v55 }
  0x41   :  { %3857 = vmatmul.msk.f32.gmra.mxu0 %vm182_vm1, %v3849_v30  ;;  %3865 = vmatmul.msk.f32.gmra.mxu1 %vm182_vm1, %v3849_v30 }
  0x42   :  { %3872 = vmatmul.msk.f32.gmra.mxu2 %vm182_vm1, %v3848_v25  ;;  %3880 = vmatmul.msk.f32.gmra.mxu3 %vm182_vm1, %v3848_v25 }
  0x43   :  { %702 = vmatpush.msrb.mxu2 %v569_v56  ;;  %740 = vmatpush.msrb.mxu3 %v570_v57 }
  0x45   :  { %703 = vmatpush.msrb.mxu2 %v565_v58  ;;  %741 = vmatpush.msrb.mxu3 %v566_v59 }
  0x49   :  { %3858 = vmatmul.msk.f32.gmra.mxu0 %vm182_vm1, %v3850_v37  ;;  %3866 = vmatmul.msk.f32.gmra.mxu1 %vm182_vm1, %v3850_v37 }
  0x4a   :  { %3873 = vmatmul.msk.f32.gmra.mxu2 %vm182_vm1, %v3849_v30  ;;  %3881 = vmatmul.msk.f32.gmra.mxu3 %vm182_vm1, %v3849_v30 }
  0x51   :  { %3859 = vmatmul.msk.f32.gmra.mxu0 %vm182_vm1, %v3851_v38  ;;  %3867 = vmatmul.msk.f32.gmra.mxu1 %vm182_vm1, %v3851_v38 }
  0x52   :  { %3874 = vmatmul.msk.f32.gmra.mxu2 %vm182_vm1, %v3850_v37  ;;  %3882 = vmatmul.msk.f32.gmra.mxu3 %vm182_vm1, %v3850_v37 }
  0x59   :  { %3886 = vmatmul.msk.f32.vlgmr.msrb.gmra.mxu0 %vm182_vm1, %v134_v39  ;;  %3894 = vmatmul.msk.f32.vlgmr.msrb.gmra.mxu1 %vm182_vm1, %v134_v39 }
  0x5a   :  { %3875 = vmatmul.msk.f32.gmra.mxu2 %vm182_vm1, %v3851_v38  ;;  %3883 = vmatmul.msk.f32.gmra.mxu3 %vm182_vm1, %v3851_v38 }
  0x61   :  { %3887 = vmatmul.msk.f32.gmra.mxu0 %vm182_vm1, %v135_v40  ;;  %3895 = vmatmul.msk.f32.gmra.mxu1 %vm182_vm1, %v135_v40 }
  0x62   :  { %3876 = vmatmul.msk.f32.gmra.mxu2 %vm182_vm1, %v4354_v9  ;;  %3884 = vmatmul.msk.f32.gmra.mxu3 %vm182_vm1, %v4354_v9 }
  0x69   :  { %3888 = vmatmul.msk.f32.gmra.mxu0 %vm182_vm1, %v136_v41  ;;  %3896 = vmatmul.msk.f32.gmra.mxu1 %vm182_vm1, %v136_v41 }
  0x6a   :  { %3902 = vmatmul.msk.f32.vlgmr.msra.gmra.mxu2 %vm182_vm1, %v134_v39  ;;  %3910 = vmatmul.msk.f32.vlgmr.msra.gmra.mxu3 %vm182_vm1, %v134_v39 }
  0x71   :  { %3889 = vmatmul.msk.f32.gmra.mxu0 %vm182_vm1, %v137_v48  ;;  %3897 = vmatmul.msk.f32.gmra.mxu1 %vm182_vm1, %v137_v48 }
  0x72   :  { %3903 = vmatmul.msk.f32.gmra.mxu2 %vm182_vm1, %v135_v40  ;;  %3911 = vmatmul.msk.f32.gmra.mxu3 %vm182_vm1, %v135_v40 }
  0x79   :  { %3890 = vmatmul.msk.f32.gmra.mxu0 %vm182_vm1, %v138_v53  ;;  %3898 = vmatmul.msk.f32.gmra.mxu1 %vm182_vm1, %v138_v53 }
  0x7a   :  { %3904 = vmatmul.msk.f32.gmra.mxu2 %vm182_vm1, %v136_v41  ;;  %3912 = vmatmul.msk.f32.gmra.mxu3 %vm182_vm1, %v136_v41 }
  0x81   :  { %3891 = vmatmul.msk.f32.gmra.mxu0 %vm182_vm1, %v139_v60  ;;  %3899 = vmatmul.msk.f32.gmra.mxu1 %vm182_vm1, %v139_v60 }
  0x82   :  { %3905 = vmatmul.msk.f32.gmra.mxu2 %vm182_vm1, %v137_v48  ;;  %3913 = vmatmul.msk.f32.gmra.mxu3 %vm182_vm1, %v137_v48 }
  0x89   :  { %3892 = vmatmul.msk.f32.gmra.mxu0 %vm182_vm1, %v140_v61  ;;  %3900 = vmatmul.msk.f32.gmra.mxu1 %vm182_vm1, %v140_v61 }
  0x8a   :  { %3906 = vmatmul.msk.f32.gmra.mxu2 %vm182_vm1, %v138_v53  ;;  %3914 = vmatmul.msk.f32.gmra.mxu3 %vm182_vm1, %v138_v53 }
  0x91   :  { %3925 = vmatmul.msk.f32.vlgmr.msra.gmra.mxu0 %vm182_vm1, %v3917_v62  ;;  %3933 = vmatmul.msk.f32.vlgmr.msra.gmra.mxu1 %vm182_vm1, %v3917_v62 }
  0x92   :  { %3907 = vmatmul.msk.f32.gmra.mxu2 %vm182_vm1, %v139_v60  ;;  %3915 = vmatmul.msk.f32.gmra.mxu3 %vm182_vm1, %v139_v60 }
  0x99   :  { %3926 = vmatmul.msk.f32.gmra.mxu0 %vm182_vm1, %v3918_v63  ;;  %3934 = vmatmul.msk.f32.gmra.mxu1 %vm182_vm1, %v3918_v63 }
  0x9a   :  { %3908 = vmatmul.msk.f32.gmra.mxu2 %vm182_vm1, %v140_v61  ;;  %3916 = vmatmul.msk.f32.gmra.mxu3 %vm182_vm1, %v140_v61 }
  0xa1   :  { %3927 = vmatmul.msk.f32.gmra.mxu0 %vm182_vm1, %v3919_v0  ;;  %3935 = vmatmul.msk.f32.gmra.mxu1 %vm182_vm1, %v3919_v0 }
  0xa2   :  { %3941 = vmatmul.msk.f32.vlgmr.msrb.gmra.mxu2 %vm182_vm1, %v3917_v62  ;;  %3949 = vmatmul.msk.f32.vlgmr.msrb.gmra.mxu3 %vm182_vm1, %v3917_v62 }
  0xa5   :  { %v4479_v1 = vpop.f32.mrf.mxu0 }
  0xa6   :  { %v4481_v2 = vpop.f32.mrf.mxu1 }
  0xa9   :  { %3928 = vmatmul.msk.f32.gmra.mxu0 %vm182_vm1, %v3920_v3  ;;  %3936 = vmatmul.msk.f32.gmra.mxu1 %vm182_vm1, %v3920_v3 }
  0xaa   :  { %3942 = vmatmul.msk.f32.gmra.mxu2 %vm182_vm1, %v3918_v63  ;;  %3950 = vmatmul.msk.f32.gmra.mxu3 %vm182_vm1, %v3918_v63 }
  0xab   :  { %v4490_v4 = vpop.f32.mrf.mxu2 }
  0xac   :  { %v4492_v5 = vpop.f32.mrf.mxu3 }
  0xae   :  { %v4494_v6 = vpop.f32.mrf.mxu0  ;;  %v4496_v7 = vpop.f32.mrf.mxu1 }
  0xb1   :  { %3929 = vmatmul.msk.f32.gmra.mxu0 %vm182_vm1, %v3921_v8  ;;  %3937 = vmatmul.msk.f32.gmra.mxu1 %vm182_vm1, %v3921_v8 }
  0xb2   :  { %3943 = vmatmul.msk.f32.gmra.mxu2 %vm182_vm1, %v3919_v0  ;;  %3951 = vmatmul.msk.f32.gmra.mxu3 %vm182_vm1, %v3919_v0 }
  0xb5   :  { %v4505_v9 = vpop.f32.mrf.mxu2  ;;  %v4507_v10 = vpop.f32.mrf.mxu3 }
  0xb6   :  { %5714 = vst [vmem:[#allocation17_spill] sm:$0xff] %v4507_v10  ;;  %v4509_v11 = vpop.f32.mrf.mxu0  ;;  %v4511_v12 = vpop.f32.mrf.mxu1 }
  0xb9   :  { %3930 = vmatmul.msk.f32.gmra.mxu0 %vm182_vm1, %v3922_v13  ;;  %3938 = vmatmul.msk.f32.gmra.mxu1 %vm182_vm1, %v3922_v13 }
  0xba   :  { %3944 = vmatmul.msk.f32.gmra.mxu2 %vm182_vm1, %v3920_v3  ;;  %3952 = vmatmul.msk.f32.gmra.mxu3 %vm182_vm1, %v3920_v3 }
  0xbd   :  { %v4520_v14 = vpop.f32.mrf.mxu2  ;;  %v4522_v15 = vpop.f32.mrf.mxu3 }
  0xbe   :  { %5715 = vst [vmem:[#allocation18_spill] sm:$0xff] %v4522_v15  ;;  %v4524_v16 = vpop.f32.mrf.mxu0  ;;  %v4526_v17 = vpop.f32.mrf.mxu1 }
  0xc1   :  { %3931 = vmatmul.msk.f32.gmra.mxu0 %vm182_vm1, %v3923_v18  ;;  %3939 = vmatmul.msk.f32.gmra.mxu1 %vm182_vm1, %v3923_v18 }
  0xc2   :  { %3945 = vmatmul.msk.f32.gmra.mxu2 %vm182_vm1, %v3921_v8  ;;  %3953 = vmatmul.msk.f32.gmra.mxu3 %vm182_vm1, %v3921_v8 }
  0xc5   :  { %v4535_v19 = vpop.f32.mrf.mxu2  ;;  %v4537_v20 = vpop.f32.mrf.mxu3 }
  0xc6   :  { %5716 = vst [vmem:[#allocation19_spill] sm:$0xff] %v4537_v20  ;;  %v4539_v21 = vpop.f32.mrf.mxu0  ;;  %v4541_v22 = vpop.f32.mrf.mxu1 }
  0xca   :  { %3946 = vmatmul.msk.f32.gmra.mxu2 %vm182_vm1, %v3922_v13  ;;  %3954 = vmatmul.msk.f32.gmra.mxu3 %vm182_vm1, %v3922_v13 }
  0xcd   :  { %v4545_v23 = vpop.f32.mrf.mxu2  ;;  %v4547_v24 = vpop.f32.mrf.mxu3 }
  0xce   :  { %5717 = vst [vmem:[#allocation20_spill] sm:$0xff] %v4545_v23  ;;  %v249_v25 = vpop.f32.mrf.mxu0  ;;  %v287_v26 = vpop.f32.mrf.mxu1 }
  0xcf   :  { %5718 = vst [vmem:[#allocation21_spill] sm:$0xff] %v4547_v24 }
  0xd2   :  { %3947 = vmatmul.msk.f32.gmra.mxu2 %vm182_vm1, %v3923_v18  ;;  %3955 = vmatmul.msk.f32.gmra.mxu3 %vm182_vm1, %v3923_v18 }
  0xd5   :  { %v4551_v27 = vpop.f32.mrf.mxu2  ;;  %v4553_v28 = vpop.f32.mrf.mxu3 }
  0xd6   :  { %5719 = vst [vmem:[#allocation22_spill] sm:$0xff] %v4553_v28  ;;  %v4555_v29 = vpop.f32.mrf.mxu0  ;;  %v4557_v30 = vpop.f32.mrf.mxu1 }
  0xdd   :  { %v4559_v31 = vpop.f32.mrf.mxu2  ;;  %v4561_v32 = vpop.f32.mrf.mxu3 }
  0xde   :  { %v4563_v33 = vpop.f32.mrf.mxu0  ;;  %v4565_v34 = vpop.f32.mrf.mxu1 }
  0xe5   :  { %v4567_v35 = vpop.f32.mrf.mxu2  ;;  %v4569_v36 = vpop.f32.mrf.mxu3 }
  0xe6   :  { %5720 = vst [vmem:[#allocation23_spill] sm:$0xff] %v4567_v35  ;;  %v4571_v37 = vpop.f32.mrf.mxu0  ;;  %v4573_v38 = vpop.f32.mrf.mxu1 }
  0xe7   :  { %5721 = vst [vmem:[#allocation24_spill] sm:$0xff] %v4569_v36 }
  0xed   :  { %v4575_v39 = vpop.f32.mrf.mxu2  ;;  %v4577_v40 = vpop.f32.mrf.mxu3 }
  0xee   :  { %5722 = vst [vmem:[#allocation25_spill] sm:$0xff] %v4577_v40  ;;  %v428_v41 = vpop.f32.mrf.mxu0  ;;  %v466_v42 = vpop.f32.mrf.mxu1 }
  0xf5   :  { %v4579_v43 = vpop.f32.mrf.mxu2  ;;  %v4581_v44 = vpop.f32.mrf.mxu3 }
  0xf6   :  { %5723 = vst [vmem:[#allocation26_spill] sm:$0xff] %v4581_v44  ;;  %v431_v45 = vpop.f32.mrf.mxu0  ;;  %v469_v46 = vpop.f32.mrf.mxu1 }
  0xfd   :  { %v4583_v47 = vpop.f32.mrf.mxu2  ;;  %v4585_v48 = vpop.f32.mrf.mxu3 }
  0xfe   :  { %5724 = vst [vmem:[#allocation27_spill] sm:$0xff] %v4585_v48  ;;  %v434_v49 = vpop.f32.mrf.mxu0  ;;  %v472_v50 = vpop.f32.mrf.mxu1 }
  0xff   :  { %v473_v36 = vadd.f32 %v472_v50, %v287_v26 }
 0x105   :  { %v4587_v51 = vpop.f32.mrf.mxu2  ;;  %v4589_v52 = vpop.f32.mrf.mxu3 }
 0x106   :  { %5725 = vst [vmem:[#allocation28_spill] sm:$0xff] %v4587_v51  ;;  %v437_v53 = vpop.f32.mrf.mxu0  ;;  %v475_v54 = vpop.f32.mrf.mxu1 }
 0x107   :  { %5726 = vst [vmem:[#allocation29_spill] sm:$0xff] %v4589_v52 }
 0x10d   :  { %v4591_v55 = vpop.f32.mrf.mxu2  ;;  %v4593_v56 = vpop.f32.mrf.mxu3 }
 0x10e   :  { %5727 = vst [vmem:[#allocation30_spill] sm:$0xff] %v4593_v56  ;;  %v4595_v57 = vpop.f32.mrf.mxu0  ;;  %v4597_v58 = vpop.f32.mrf.mxu1 }
 0x115   :  { %v4599_v59 = vpop.f32.mrf.mxu2  ;;  %v4601_v60 = vpop.f32.mrf.mxu3 }
 0x116   :  { %v632_v61 = vpop.f32.mrf.mxu0  ;;  %v670_v62 = vpop.f32.mrf.mxu1 }
 0x11d   :  { %v4603_v63 = vpop.f32.mrf.mxu2  ;;  %v4605_v0 = vpop.f32.mrf.mxu3 }
 0x11e   :  { %5728 = vst [vmem:[#allocation31_spill] sm:$0xff] %v4603_v63  ;;  %v635_v3 = vpop.f32.mrf.mxu0  ;;  %v673_v8 = vpop.f32.mrf.mxu1  ;;  %v4619_v63 = vld [vmem:[#allocation6] sm:$0xf] }
 0x11f   :  { %5729 = vst [vmem:[#allocation32_spill] sm:$0xff] %v4605_v0  ;;  %v435_v0 = vadd.f32 %v434_v49, %v249_v25  ;;  %v467_v25 = vadd.f32 %v466_v42, %v4526_v17  ;;  %v794_v26 = vperm.slane %v4619_v63, 0 }
 0x125   :  { %v4607_v13 = vpop.f32.mrf.mxu2  ;;  %v4609_v18 = vpop.f32.mrf.mxu3 }
 0x126   :  { %5730 = vst [vmem:[#allocation33_spill] sm:$0xff] %v4607_v13  ;;  %v638_v40 = vpop.f32.mrf.mxu0  ;;  %v676_v10 = vpop.f32.mrf.mxu1  ;;  %v470_v13 = vadd.f32 %v469_v46, %v4541_v22 }
 0x127   :  { %5731 = vst [vmem:[#allocation34_spill] sm:$0xff] %v4609_v18  ;;  %v432_v18 = vadd.f32 %v431_v45, %v4539_v21  ;;  %v795_v21 = vperm.slane %v4619_v63, 1 }
 0x12d   :  { %v4611_v44 = vpop.f32.mrf.mxu2  ;;  %v4613_v15 = vpop.f32.mrf.mxu3 }
 0x12e   :  { %5732 = vst [vmem:[#allocation35_spill] sm:$0xff] %v4611_v44  ;;  %v641_v48 = vpop.f32.mrf.mxu0  ;;  %v679_v20 = vpop.f32.mrf.mxu1  ;;  %v438_v44 = vadd.f32 %v437_v53, %v4490_v4  ;;  %v423_v53 = vadd.f32 %v4563_v33, %v4494_v6 }
 0x12f   :  { %5733 = vst [vmem:[#allocation36_spill] sm:$0xff] %v4613_v15  ;;  %v476_v15 = vadd.f32 %v475_v54, %v4492_v5  ;;  %v780_v46 = vadd.f32 %v641_v48, %v432_v18  ;;  %v781_v4 = vadd.f32 %v679_v20, %v470_v13  ;;  %v461_v20 = vadd.f32 %v4565_v34, %v4496_v7 }
 0x131   :  { %v818_v48 = vadd.f32 %v794_v26, %v780_v46  ;;  %v819_v54 = vadd.f32 %v795_v21, %v781_v4  ;;  %v4691_v4 = vld [vmem:[#allocation9] sm:$0xff] }
 0x135   :  { %v4615_v52 = vpop.f32.mrf.mxu2  ;;  %v4617_v24 = vpop.f32.mrf.mxu3 }
 0x136   :  { %5734 = vst [vmem:[#allocation37_spill] sm:$0xff] %v4615_v52  ;;  %v644_v51 = vpop.f32.mrf.mxu0  ;;  %v682_v23 = vpop.f32.mrf.mxu1 }
 0x137   :  { %5735 = vst [vmem:[#allocation38_spill] sm:$0xff] %v4617_v24  ;;  %v784_v35 = vadd.f32 %v644_v51, %v435_v0  ;;  %v785_v56 = vadd.f32 %v682_v23, %v473_v36  ;;  %v429_v24 = vadd.f32 %v428_v41, %v4524_v16  ;;  %v426_v23 = vadd.f32 %v4571_v37, %v4509_v11 }
 0x138   :  { %v464_v36 = vadd.f32 %v4573_v38, %v4511_v12  ;;  %v777_v16 = vadd.f32 %v676_v10, %v467_v25  ;;  %v420_v10 = vadd.f32 %v4555_v29, %v4479_v1  ;;  %v458_v12 = vadd.f32 %v4557_v30, %v4481_v2 }
 0x139   :  { %v776_v50 = vadd.f32 %v638_v40, %v429_v24  ;;  %v822_v41 = vadd.f32 %v794_v26, %v784_v35  ;;  %v823_v17 = vadd.f32 %v795_v21, %v785_v56  ;;  %v768_v24 = vadd.f32 %v632_v61, %v423_v53  ;;  %v5744_v53 = vld [vmem:[#allocation21_spill] sm:$0xff] }
 0x13a   :  { %v769_v35 = vadd.f32 %v670_v62, %v461_v20  ;;  %v815_v33 = vadd.f32 %v795_v21, %v777_v16  ;;  %v764_v1 = vadd.f32 %v4595_v57, %v420_v10  ;;  %v765_v2 = vadd.f32 %v4597_v58, %v458_v12  ;;  %v5741_v16 = vld [vmem:[#allocation32_spill] sm:$0xff] }
 0x13b   :  { %v814_v6 = vadd.f32 %v794_v26, %v776_v50  ;;  %v4655_v34 = vmax.f32 %v822_v41, 0.0  ;;  %v4657_v40 = vmax.f32 %v823_v17, 0.0  ;;  %v4663_v56 = vmax.f32 %v818_v48, 0.0  ;;  %v5736_v50 = vld [vmem:[#allocation22_spill] sm:$0xff] }
 0x13c   :  { %v4665_v61 = vmax.f32 %v819_v54, 0.0  ;;  %v806_v62 = vadd.f32 %v794_v26, %v768_v24  ;;  %v807_v0 = vadd.f32 %v795_v21, %v769_v35  ;;  %v4671_v57 = vmax.f32 %v815_v33, 0.0  ;;  %v5746_v35 = vld [vmem:[#allocation19_spill] sm:$0xff] }
 0x13d   :  { %v4625_v28 = vpop.f32.mrf.mxu2  ;;  %v4627_v52 = vpop.f32.mrf.mxu3  ;;  %v802_v58 = vadd.f32 %v794_v26, %v764_v1  ;;  %v796_v20 = vperm.slane %v4619_v63, 2 }
 0x13e   :  { %v647_v45 = vpop.f32.mrf.mxu0  ;;  %v685_v22 = vpop.f32.mrf.mxu1  ;;  %v4683_v46 = vmax.f32 %v807_v0, 0.0  ;;  %v5749_v0 = vld [vmem:[#allocation26_spill] sm:$0xff] }
 0x13f   :  { %v788_v49 = vadd.f32 %v647_v45, %v438_v44  ;;  %v789_v5 = vadd.f32 %v685_v22, %v476_v15  ;;  %v772_v44 = vadd.f32 %v635_v3, %v426_v23  ;;  %v773_v15 = vadd.f32 %v673_v8, %v464_v36 }
 0x140   :  { %v4669_v3 = vmax.f32 %v814_v6, 0.0  ;;  %v803_v8 = vadd.f32 %v795_v21, %v765_v2  ;;  %v4681_v22 = vmax.f32 %v806_v62, 0.0  ;;  %v511_v23 = vadd.f32 %v4599_v59, %v4559_v31  ;;  %v5738_v31 = vld [vmem:[#allocation23_spill] sm:$0xff] }
 0x141   :  { %v826_v42 = vadd.f32 %v794_v26, %v788_v49  ;;  %v827_v51 = vadd.f32 %v795_v21, %v789_v5  ;;  %v810_v29 = vadd.f32 %v794_v26, %v772_v44  ;;  %v811_v30 = vadd.f32 %v795_v21, %v773_v15  ;;  %v5747_v6 = vld [vmem:[#allocation27_spill] sm:$0xff] }
 0x142   :  { %v4687_v26 = vmax.f32 %v802_v58, 0.0  ;;  %v4689_v21 = vmax.f32 %v803_v8, 0.0  ;;  %v496_v49 = vadd.f32 %v4575_v39, %v4505_v9  ;;  %v499_v5 = vadd.f32 %v4579_v43, %v4520_v14  ;;  %v5737_v14 = vld [vmem:[#allocation30_spill] sm:$0xff]  ;;  %v5750_v8 = vld [vmem:[#allocation37_spill] sm:$0xff] }
 0x143   :  { %v4641_v11 = vmax.f32 %v826_v42, 0.0  ;;  %v4643_v37 = vmax.f32 %v827_v51, 0.0  ;;  %v4675_v13 = vmax.f32 %v810_v29, 0.0  ;;  %v4677_v18 = vmax.f32 %v811_v30, 0.0  ;;  %v5742_v51 = vld [vmem:[#allocation20_spill] sm:$0xff] }
 0x144   :  { %v549_v36 = vadd.f32 %v4601_v60, %v4561_v32  ;;  %v502_v9 = vadd.f32 %v4583_v47, %v4535_v19  ;;  %v508_v39 = vadd.f32 %v4591_v55, %v4551_v27  ;;  %v546_v43 = vadd.f32 %v5737_v14, %v5736_v50  ;;  %v5739_v32 = vld [vmem:[#allocation31_spill] sm:$0xff]  ;;  %v5740_v60 = vld [vmem:[#allocation24_spill] sm:$0xff]  ;;  %v5745_v27 = vld [vmem:[#allocation29_spill] sm:$0xff] }
 0x145   :  { %v4649_v38 = vpop.f32.mrf.mxu2  ;;  %v4651_v7 = vpop.f32.mrf.mxu3  ;;  %884 = vmatpush.msrb.mxu0 %v4641_v11  ;;  %913 = vmatpush.msrb.mxu1 %v4643_v37  ;;  %v514_v59 = vadd.f32 %v5739_v32, %v5738_v31  ;;  %v552_v41 = vadd.f32 %v5741_v16, %v5740_v60  ;;  %v5743_v19 = vld [vmem:[#allocation28_spill] sm:$0xff]  ;;  %v543_v55 = vadd.f32 %v5745_v27, %v5744_v53  ;;  %v797_v44 = vperm.slane %v4619_v63, 3  ;;  %v5752_v50 = vld [vmem:[#allocation17_spill] sm:$0xff] }
 0x146   :  { %v505_v47 = vadd.f32 %v5743_v19, %v5742_v51  ;;  %v782_v54 = vadd.f32 %v4649_v38, %v508_v39  ;;  %v783_v10 = vadd.f32 %v4651_v7, %v546_v43  ;;  %v540_v33 = vadd.f32 %v5747_v6, %v5746_v35  ;;  %v4735_v63 = vld [vmem:[#allocation9 + $0x8] sm:$0xff]  ;;  %v5748_v7 = vld [vmem:[#allocation18_spill] sm:$0xff]  ;;  %v5754_v43 = vld [vmem:[#allocation35_spill] sm:$0xff] }
 0x147   :  { %885 = vmatpush.msrb.mxu0 %v4655_v34  ;;  %914 = vmatpush.msrb.mxu1 %v4657_v40  ;;  %v779_v2 = vadd.f32 %v4627_v52, %v543_v55  ;;  %v537_v58 = vadd.f32 %v5749_v0, %v5748_v7  ;;  %v770_v31 = vadd.f32 %v5754_v43, %v499_v5  ;;  %v5755_v32 = vld [vmem:[#allocation36_spill] sm:$0xff]  ;;  %v5757_v19 = vld [vmem:[#allocation34_spill] sm:$0xff] }
 0x148   :  { %v778_v1 = vadd.f32 %v4625_v28, %v505_v47  ;;  %v820_v28 = vadd.f32 %v796_v20, %v782_v54  ;;  %v821_v52 = vadd.f32 %v797_v44, %v783_v10  ;;  %v860_v10 = vld [vmem:[#allocation9 + $0x10] sm:$0xff]  ;;  %v1469_v7 = vld [vmem:[#allocation4 + $0xac0] sm:$0xff] }
 0x149   :  { %886 = vmatpush.msrb.mxu0 %v4663_v56  ;;  %915 = vmatpush.msrb.mxu1 %v4665_v61  ;;  %v817_v16 = vadd.f32 %v797_v44, %v779_v2  ;;  %v861_v2 = vld [vmem:[#allocation9 + $0x18] sm:$0xf] }
 0x14a   :  { %v816_v60 = vadd.f32 %v796_v20, %v778_v1  ;;  %v4769_v27 = vmax.f32 %v820_v28, 0.0  ;;  %v4771_v55 = vmax.f32 %v821_v52, 0.0  ;;  %v1401_v0 = vld [vmem:[#allocation4 + $0x8a0] sm:$0xff] }
 0x14b   :  { %887 = vmatpush.msrb.mxu0 %v4669_v3  ;;  %916 = vmatpush.msrb.mxu1 %v4671_v57  ;;  %v4779_v54 = vmax.f32 %v817_v16, 0.0  ;;  %v1219_v28 = vld [vmem:[#allocation9 + $0x38] sm:$0xf] }
 0x14c   :  { %5758 = vst [vmem:[#allocation22_spill] sm:$0xff] %v4769_v27  ;;  %v1389_v52 = vld [vmem:[#allocation4 + $0x840] sm:$0xff] }
 0x14d   :  { %v720_v25 = vpop.f32.mrf.mxu2  ;;  %v758_v45 = vpop.f32.mrf.mxu3  ;;  %888 = vmatpush.msrb.mxu0 %v4675_v13  ;;  %917 = vmatpush.msrb.mxu1 %v4677_v18  ;;  %5759 = vst [vmem:[#allocation30_spill] sm:$0xff] %v4771_v55  ;;  %v1381_v43 = vld [vmem:[#allocation4 + $0x800] sm:$0xff] }
 0x14e   :  { %v786_v17 = vadd.f32 %v720_v25, %v511_v23  ;;  %v787_v42 = vadd.f32 %v758_v45, %v549_v36  ;;  %v774_v25 = vadd.f32 %v5750_v8, %v502_v9  ;;  %v5751_v45 = vld [vmem:[#allocation38_spill] sm:$0xff]  ;;  %v5753_v9 = vld [vmem:[#allocation25_spill] sm:$0xff]  ;;  %5761 = vst [vmem:[#allocation31_spill] sm:$0xff] %v4779_v54 }
 0x14f   :  { %889 = vmatpush.msrb.mxu0 %v4681_v22  ;;  %918 = vmatpush.msrb.mxu1 %v4683_v46  ;;  %v775_v23 = vadd.f32 %v5751_v45, %v540_v33  ;;  %v534_v14 = vadd.f32 %v5753_v9, %v5752_v50  ;;  %v1397_v8 = vld [vmem:[#allocation4 + $0x880] sm:$0xff] }
 0x150   :  { %v824_v29 = vadd.f32 %v796_v20, %v786_v17  ;;  %v825_v30 = vadd.f32 %v797_v44, %v787_v42  ;;  %v5756_v42 = vld [vmem:[#allocation33_spill] sm:$0xff]  ;;  %v812_v47 = vadd.f32 %v796_v20, %v774_v25  ;;  %v1461_v25 = vld [vmem:[#allocation4 + $0xa80] sm:$0xff] }
 0x151   :  { %890 = vmatpush.msrb.mxu0 %v4687_v26  ;;  %919 = vmatpush.msrb.mxu1 %v4689_v21  ;;  %v766_v51 = vadd.f32 %v5756_v42, %v496_v49  ;;  %v767_v5 = vadd.f32 %v5757_v19, %v534_v14  ;;  %v813_v53 = vadd.f32 %v797_v44, %v775_v23  ;;  %v1393_v45 = vld [vmem:[#allocation4 + $0x860] sm:$0xff] }
 0x152   :  { %3956 = vmatmul.msk.f32.vlgmr.msrb.gmra.mxu0 %vm862_vm2, %v4691_v4  ;;  %3960 = vmatmul.msk.f32.vlgmr.msrb.gmra.mxu1 %vm862_vm2, %v4691_v4  ;;  %v4761_v17 = vmax.f32 %v825_v30, 0.0  ;;  %v808_v49 = vadd.f32 %v796_v20, %v770_v31  ;;  %v4783_v35 = vmax.f32 %v812_v47, 0.0  ;;  %v1409_v30 = vld [vmem:[#allocation4 + $0x8e0] sm:$0xff] }
 0x153   :  { %1241 = vmatpush.msra.mxu0 %v4641_v11  ;;  %1270 = vmatpush.msra.mxu1 %v4643_v37  ;;  %v4785_v6 = vmax.f32 %v813_v53, 0.0  ;;  %v1457_v23 = vld [vmem:[#allocation4 + $0xa60] sm:$0xff] }
 0x154   :  { %5762 = vst [vmem:[#allocation24_spill] sm:$0xff] %v4783_v35  ;;  %v4791_v33 = vmax.f32 %v808_v49, 0.0  ;;  %v1453_v50 = vld [vmem:[#allocation4 + $0xa40] sm:$0xff] }
 0x155   :  { %v723_v15 = vpop.f32.mrf.mxu2  ;;  %v761_v48 = vpop.f32.mrf.mxu3  ;;  %1242 = vmatpush.msra.mxu0 %v4655_v34  ;;  %1271 = vmatpush.msra.mxu1 %v4657_v40  ;;  %5763 = vst [vmem:[#allocation32_spill] sm:$0xff] %v4785_v6  ;;  %v1385_v9 = vld [vmem:[#allocation4 + $0x820] sm:$0xff] }
 0x156   :  { %v790_v12 = vadd.f32 %v723_v15, %v514_v59  ;;  %v791_v24 = vadd.f32 %v761_v48, %v552_v41  ;;  %v771_v59 = vadd.f32 %v5755_v32, %v537_v58  ;;  %v4759_v41 = vmax.f32 %v824_v29, 0.0  ;;  %5764 = vst [vmem:[#allocation20_spill] sm:$0xff] %v4791_v33  ;;  %v1217_v29 = vld [vmem:[#allocation9 + $0x28] sm:$0xff]  ;;  %v1465_v58 = vld [vmem:[#allocation4 + $0xaa0] sm:$0xff] }
 0x157   :  { %1243 = vmatpush.msra.mxu0 %v4663_v56  ;;  %1272 = vmatpush.msra.mxu1 %v4665_v61  ;;  %v4777_v48 = vmax.f32 %v816_v60, 0.0  ;;  %v1449_v14 = vld [vmem:[#allocation4 + $0xa20] sm:$0xff] }
 0x158   :  { %v828_v38 = vadd.f32 %v796_v20, %v790_v12  ;;  %v829_v62 = vadd.f32 %v797_v44, %v791_v24  ;;  %v809_v15 = vadd.f32 %v797_v44, %v771_v59  ;;  %v804_v12 = vadd.f32 %v796_v20, %v766_v51  ;;  %v1445_v31 = vld [vmem:[#allocation4 + $0xa00] sm:$0xff] }
 0x159   :  { %1244 = vmatpush.msra.mxu0 %v4669_v3  ;;  %1273 = vmatpush.msra.mxu1 %v4671_v57  ;;  %5760 = vst [vmem:[#allocation23_spill] sm:$0xff] %v4777_v48  ;;  %v805_v24 = vadd.f32 %v797_v44, %v767_v5  ;;  %v1377_v32 = vld [vmem:[#allocation4 + $0x7e0] sm:$0xff] }
 0x15a   :  { %v4743_v36 = vmax.f32 %v828_v38, 0.0  ;;  %v4745_v39 = vmax.f32 %v829_v62, 0.0  ;;  %3957 = vmatmul.msk.f32.gmra.mxu0 %vm862_vm2, %v4735_v63  ;;  %3961 = vmatmul.msk.f32.gmra.mxu1 %vm862_vm2, %v4735_v63  ;;  %v4793_v20 = vmax.f32 %v809_v15, 0.0  ;;  %v4797_v44 = vmax.f32 %v804_v12, 0.0  ;;  %v1473_v38 = vld [vmem:[#allocation4 + $0xae0] sm:$0xff] }
 0x15b   :  { %1245 = vmatpush.msra.mxu0 %v4675_v13  ;;  %1274 = vmatpush.msra.mxu1 %v4677_v18  ;;  %v4799_v1 = vmax.f32 %v805_v24, 0.0  ;;  %v1405_v62 = vld [vmem:[#allocation4 + $0x8c0] sm:$0xff] }
 0x15c   :  { %942 = vmatpush.msra.mxu2 %v4743_v36  ;;  %971 = vmatpush.msra.mxu3 %v4745_v39  ;;  %5765 = vst [vmem:[#allocation28_spill] sm:$0xff] %v4793_v20  ;;  %v1441_v59 = vld [vmem:[#allocation4 + $0x9e0] sm:$0xff] }
 0x15d   :  { %1246 = vmatpush.msra.mxu0 %v4681_v22  ;;  %1275 = vmatpush.msra.mxu1 %v4683_v46  ;;  %5766 = vst [vmem:[#allocation21_spill] sm:$0xff] %v4797_v44  ;;  %v1373_v60 = vld [vmem:[#allocation4 + $0x7c0] sm:$0xff] }
 0x15e   :  { %943 = vmatpush.msra.mxu2 %v4759_v41  ;;  %972 = vmatpush.msra.mxu3 %v4761_v17  ;;  %5767 = vst [vmem:[#allocation29_spill] sm:$0xff] %v4799_v1  ;;  %v1437_v16 = vld [vmem:[#allocation4 + $0x9c0] sm:$0xff] }
 0x15f   :  { %1247 = vmatpush.msra.mxu0 %v4687_v26  ;;  %1276 = vmatpush.msra.mxu1 %v4689_v21  ;;  %v1369_v42 = vld [vmem:[#allocation4 + $0x7a0] sm:$0xff] }
 0x160   :  { %944 = vmatpush.msra.mxu2 %v4769_v27  ;;  %973 = vmatpush.msra.mxu3 %v4771_v55  ;;  %v1433_v51 = vld [vmem:[#allocation4 + $0x9a0] sm:$0xff] }
 0x161   :  { %1586 = vmatpush.msrb.mxu0 %v1409_v30  ;;  %1615 = vmatpush.msrb.mxu1 %v1473_v38  ;;  %v1365_v19 = vld [vmem:[#allocation4 + $0x780] sm:$0xff]  ;;  %v1474_v30 = vld [vmem:[#allocation4 + $0xae8] sm:$0xff] }
 0x162   :  { %945 = vmatpush.msra.mxu2 %v4777_v48  ;;  %974 = vmatpush.msra.mxu3 %v4779_v54  ;;  %v1429_v5 = vld [vmem:[#allocation4 + $0x980] sm:$0xff] }
 0x163   :  { %3958 = vmatmul.msk.f32.gmra.mxu0 %vm862_vm2, %v860_v10  ;;  %3962 = vmatmul.msk.f32.gmra.mxu1 %vm862_vm2, %v860_v10  ;;  %v1361_v47 = vld [vmem:[#allocation4 + $0x760] sm:$0xff] }
 0x164   :  { %946 = vmatpush.msra.mxu2 %v4783_v35  ;;  %975 = vmatpush.msra.mxu3 %v4785_v6  ;;  %v1425_v53 = vld [vmem:[#allocation4 + $0x960] sm:$0xff] }
 0x165   :  { %1587 = vmatpush.msrb.mxu0 %v1405_v62  ;;  %1616 = vmatpush.msrb.mxu1 %v1469_v7  ;;  %v1357_v49 = vld [vmem:[#allocation4 + $0x740] sm:$0xff]  ;;  %v1406_v62 = vld [vmem:[#allocation4 + $0x8c8] sm:$0xff] }
 0x166   :  { %947 = vmatpush.msra.mxu2 %v4791_v33  ;;  %976 = vmatpush.msra.mxu3 %v4793_v20  ;;  %v1421_v15 = vld [vmem:[#allocation4 + $0x940] sm:$0xff]  ;;  %v1470_v7 = vld [vmem:[#allocation4 + $0xac8] sm:$0xff] }
 0x167   :  { %1588 = vmatpush.msrb.mxu0 %v1401_v0  ;;  %1617 = vmatpush.msrb.mxu1 %v1465_v58  ;;  %v1417_v12 = vld [vmem:[#allocation4 + $0x920] sm:$0xff]  ;;  %v1402_v58 = vld [vmem:[#allocation4 + $0x8a8] sm:$0xff] }
 0x168   :  { %948 = vmatpush.msra.mxu2 %v4797_v44  ;;  %977 = vmatpush.msra.mxu3 %v4799_v1  ;;  %v1537_v24 = vld [vmem:[#allocation4 + $0xce0] sm:$0xff] }
 0x169   :  { %3964 = vmatmul.msk.f32.vlgmr.msra.gmra.mxu2 %vm862_vm2, %v4691_v4  ;;  %3968 = vmatmul.msk.f32.vlgmr.msra.gmra.mxu3 %vm862_vm2, %v4691_v4  ;;  %v1216_v4 = vld [vmem:[#allocation9 + $0x20] sm:$0xff]  ;;  %v1529_v38 = vld [vmem:[#allocation4 + $0xca0] sm:$0xff] }
 0x16a   :  { %1299 = vmatpush.msrb.mxu2 %v4743_v36  ;;  %1328 = vmatpush.msrb.mxu3 %v4745_v39  ;;  %v1525_v0 = vld [vmem:[#allocation4 + $0xc80] sm:$0xff] }
 0x16b   :  { %3959 = vmatmul.msk.f32.gmra.mxu0 %vm862_vm2, %v861_v2  ;;  %3963 = vmatmul.msk.f32.gmra.mxu1 %vm862_vm2, %v861_v2 }
 0x16c   :  { %1300 = vmatpush.msrb.mxu2 %v4759_v41  ;;  %1329 = vmatpush.msrb.mxu3 %v4761_v17 }
 0x16d   :  { %1589 = vmatpush.msrb.mxu0 %v1397_v8  ;;  %1618 = vmatpush.msrb.mxu1 %v1461_v25  ;;  %v1466_v8 = vld [vmem:[#allocation4 + $0xaa8] sm:$0xff]  ;;  %v1521_v25 = vld [vmem:[#allocation4 + $0xc60] sm:$0xff] }
 0x16e   :  { %1301 = vmatpush.msrb.mxu2 %v4769_v27  ;;  %1330 = vmatpush.msrb.mxu3 %v4771_v55  ;;  %v1432_v55 = vld [vmem:[#allocation4 + $0x998] sm:$0xff]  ;;  %v1052_v27 = vld [vmem:[#allocation4 + $0x1e8] sm:$0xff] }
 0x16f   :  { %1590 = vmatpush.msrb.mxu0 %v1393_v45  ;;  %1619 = vmatpush.msrb.mxu1 %v1457_v23  ;;  %v1398_v45 = vld [vmem:[#allocation4 + $0x888] sm:$0xff] }
 0x170   :  { %1302 = vmatpush.msrb.mxu2 %v4777_v48  ;;  %1331 = vmatpush.msrb.mxu3 %v4779_v54  ;;  %v1462_v23 = vld [vmem:[#allocation4 + $0xa88] sm:$0xff]  ;;  %v1444_v54 = vld [vmem:[#allocation4 + $0x9f8] sm:$0xff] }
 0x171   :  { %3965 = vmatmul.msk.f32.gmra.mxu2 %vm862_vm2, %v4735_v63  ;;  %3969 = vmatmul.msk.f32.gmra.mxu3 %vm862_vm2, %v4735_v63  ;;  %v1218_v63 = vld [vmem:[#allocation9 + $0x30] sm:$0xff] }
 0x172   :  { %1303 = vmatpush.msrb.mxu2 %v4783_v35  ;;  %1332 = vmatpush.msrb.mxu3 %v4785_v6  ;;  %v1392_v6 = vld [vmem:[#allocation4 + $0x858] sm:$0xff] }
 0x173   :  { %3972 = vmatmul.msk.f32.vlgmr.msra.gmra.mxu0 %vm862_vm2, %v1216_v4  ;;  %3976 = vmatmul.msk.f32.vlgmr.msra.gmra.mxu1 %vm862_vm2, %v1216_v4  ;;  %v1380_v35 = vld [vmem:[#allocation4 + $0x7f8] sm:$0xff] }
 0x174   :  { %1304 = vmatpush.msrb.mxu2 %v4791_v33  ;;  %1333 = vmatpush.msrb.mxu3 %v4793_v20  ;;  %v1472_v20 = vld [vmem:[#allocation4 + $0xad8] sm:$0xff]  ;;  %v1515_v33 = vld [vmem:[#allocation4 + $0xc30] sm:$0xff] }
 0x175   :  { %1591 = vmatpush.msrb.mxu0 %v1389_v52  ;;  %1620 = vmatpush.msrb.mxu1 %v1453_v50  ;;  %v1394_v52 = vld [vmem:[#allocation4 + $0x868] sm:$0xff]  ;;  %v1368_v48 = vld [vmem:[#allocation4 + $0x798] sm:$0xff] }
 0x176   :  { %1305 = vmatpush.msrb.mxu2 %v4797_v44  ;;  %1334 = vmatpush.msrb.mxu3 %v4799_v1  ;;  %v1458_v50 = vld [vmem:[#allocation4 + $0xa68] sm:$0xff]  ;;  %v1415_v1 = vld [vmem:[#allocation4 + $0x910] sm:$0xff]  ;;  %v1408_v44 = vld [vmem:[#allocation4 + $0x8d8] sm:$0xff] }
 0x177   :  { %1592 = vmatpush.msrb.mxu0 %v1385_v9  ;;  %1621 = vmatpush.msrb.mxu1 %v1449_v14  ;;  %v1513_v9 = vld [vmem:[#allocation4 + $0xc20] sm:$0xff]  ;;  %v1390_v14 = vld [vmem:[#allocation4 + $0x848] sm:$0xff] }
 0x178   :  { %1644 = vmatpush.msra.mxu2 %v1537_v24  ;;  %v1489_v24 = vld [vmem:[#allocation4 + $0xb60] sm:$0xff] }
 0x179   :  { %3966 = vmatmul.msk.f32.gmra.mxu2 %vm862_vm2, %v860_v10  ;;  %3970 = vmatmul.msk.f32.gmra.mxu3 %vm862_vm2, %v860_v10  ;;  %v1353_v10 = vld [vmem:[#allocation4 + $0x720] sm:$0xff] }
 0x17a   :  { %1593 = vmatpush.msrb.mxu0 %v1381_v43  ;;  %1622 = vmatpush.msrb.mxu1 %v1445_v31  ;;  %v1454_v43 = vld [vmem:[#allocation4 + $0xa48] sm:$0xff]  ;;  %v1509_v31 = vld [vmem:[#allocation4 + $0xc00] sm:$0xff] }
 0x17b   :  { %3973 = vmatmul.msk.f32.gmra.mxu0 %vm862_vm2, %v1217_v29  ;;  %3977 = vmatmul.msk.f32.gmra.mxu1 %vm862_vm2, %v1217_v29 }
 0x17c   :  { %1594 = vmatpush.msrb.mxu0 %v1377_v32  ;;  %1623 = vmatpush.msrb.mxu1 %v1441_v59  ;;  %v1386_v32 = vld [vmem:[#allocation4 + $0x828] sm:$0xff] }
 0x17d   :  { %v1450_v59 = vld [vmem:[#allocation4 + $0xa28] sm:$0xff] }
 0x17e   :  { %1595 = vmatpush.msrb.mxu0 %v1373_v60  ;;  %1624 = vmatpush.msrb.mxu1 %v1437_v16  ;;  %v1505_v60 = vld [vmem:[#allocation4 + $0xbe0] sm:$0xff]  ;;  %v1382_v16 = vld [vmem:[#allocation4 + $0x808] sm:$0xff] }
 0x180   :  { %1596 = vmatpush.msrb.mxu0 %v1369_v42  ;;  %1625 = vmatpush.msrb.mxu1 %v1433_v51  ;;  %v1446_v42 = vld [vmem:[#allocation4 + $0xa08] sm:$0xff]  ;;  %v1501_v51 = vld [vmem:[#allocation4 + $0xbc0] sm:$0xff] }
 0x181   :  { %3967 = vmatmul.msk.f32.gmra.mxu2 %vm862_vm2, %v861_v2  ;;  %3971 = vmatmul.msk.f32.gmra.mxu3 %vm862_vm2, %v861_v2  ;;  %v1533_v2 = vld [vmem:[#allocation4 + $0xcc0] sm:$0xff] }
 0x182   :  { %1597 = vmatpush.msrb.mxu0 %v1365_v19  ;;  %1626 = vmatpush.msrb.mxu1 %v1429_v5  ;;  %v1378_v19 = vld [vmem:[#allocation4 + $0x7e8] sm:$0xff] }
 0x183   :  { %3974 = vmatmul.msk.f32.gmra.mxu0 %vm862_vm2, %v1218_v63  ;;  %3978 = vmatmul.msk.f32.gmra.mxu1 %vm862_vm2, %v1218_v63  ;;  %v1442_v5 = vld [vmem:[#allocation4 + $0x9e8] sm:$0xff] }
 0x184   :  { %1598 = vmatpush.msrb.mxu0 %v1361_v47  ;;  %1627 = vmatpush.msrb.mxu1 %v1425_v53  ;;  %v1497_v47 = vld [vmem:[#allocation4 + $0xba0] sm:$0xff]  ;;  %v1374_v53 = vld [vmem:[#allocation4 + $0x7c8] sm:$0xff] }
 0x185   :  { %1645 = vmatpush.msra.mxu2 %v1533_v2  ;;  %v1366_v2 = vld [vmem:[#allocation4 + $0x788] sm:$0xff] }
 0x186   :  { %1599 = vmatpush.msrb.mxu0 %v1357_v49  ;;  %1628 = vmatpush.msrb.mxu1 %v1421_v15  ;;  %v1438_v49 = vld [vmem:[#allocation4 + $0x9c8] sm:$0xff]  ;;  %v1493_v15 = vld [vmem:[#allocation4 + $0xb80] sm:$0xff] }
 0x187   :  { %1646 = vmatpush.msra.mxu2 %v1529_v38  ;;  %v1362_v38 = vld [vmem:[#allocation4 + $0x768] sm:$0xff] }
 0x188   :  { %1600 = vmatpush.msrb.mxu0 %v1353_v10  ;;  %1629 = vmatpush.msrb.mxu1 %v1417_v12  ;;  %v1370_v10 = vld [vmem:[#allocation4 + $0x7a8] sm:$0xff] }
 0x189   :  { %3980 = vmatmul.msk.f32.vlgmr.msrb.gmra.mxu2 %vm862_vm2, %v1216_v4  ;;  %3984 = vmatmul.msk.f32.vlgmr.msrb.gmra.mxu3 %vm862_vm2, %v1216_v4  ;;  %v1349_v4 = vld [vmem:[#allocation4 + $0x700] sm:$0xff]  ;;  %v1434_v12 = vld [vmem:[#allocation4 + $0x9a8] sm:$0xff] }
 0x18a   :  { %1601 = vmatpush.msrb.mxu0 %v1349_v4  ;;  %1647 = vmatpush.msra.mxu2 %v1525_v0  ;;  %v1430_v4 = vld [vmem:[#allocation4 + $0x988] sm:$0xff] }
 0x18b   :  { %3975 = vmatmul.msk.f32.gmra.mxu0 %vm862_vm2, %v1219_v28  ;;  %3979 = vmatmul.msk.f32.gmra.mxu1 %vm862_vm2, %v1219_v28  ;;  %v1358_v0 = vld [vmem:[#allocation4 + $0x748] sm:$0xff] }
 0x18c   :  { %1648 = vmatpush.msra.mxu2 %v1521_v25  ;;  %v1354_v25 = vld [vmem:[#allocation4 + $0x728] sm:$0xff] }
 0x191   :  { %3981 = vmatmul.msk.f32.gmra.mxu2 %vm862_vm2, %v1217_v29  ;;  %3985 = vmatmul.msk.f32.gmra.mxu3 %vm862_vm2, %v1217_v29  ;;  %v1413_v29 = vld [vmem:[#allocation4 + $0x900] sm:$0xff] }
 0x192   :  { %1630 = vmatpush.msrb.mxu1 %v1413_v29  ;;  %v1485_v29 = vld [vmem:[#allocation4 + $0xb40] sm:$0xff] }
 0x194   :  { %1731 = vmatpush.msra.mxu1 %v1474_v30 }
 0x196   :  { %1732 = vmatpush.msra.mxu1 %v1470_v7  ;;  %v1481_v7 = vld [vmem:[#allocation4 + $0xb20] sm:$0xff] }
 0x198   :  { %1733 = vmatpush.msra.mxu1 %v1466_v8  ;;  %v1477_v8 = vld [vmem:[#allocation4 + $0xb00] sm:$0xff] }
 0x199   :  { %3982 = vmatmul.msk.f32.gmra.mxu2 %vm862_vm2, %v1218_v63  ;;  %3986 = vmatmul.msk.f32.gmra.mxu3 %vm862_vm2, %v1218_v63  ;;  %v1410_v63 = vld [vmem:[#allocation4 + $0x8e8] sm:$0xff] }
 0x19a   :  { %1702 = vmatpush.msra.mxu0 %v1410_v63  ;;  %1734 = vmatpush.msra.mxu1 %v1462_v23  ;;  %v1538_v23 = vld [vmem:[#allocation4 + $0xce8] sm:$0xff] }
 0x19c   :  { %1703 = vmatpush.msra.mxu0 %v1406_v62  ;;  %1735 = vmatpush.msra.mxu1 %v1458_v50  ;;  %v1426_v62 = vld [vmem:[#allocation4 + $0x968] sm:$0xff] }
 0x19d   :  { %v1534_v50 = vld [vmem:[#allocation4 + $0xcc8] sm:$0xff] }
 0x19e   :  { %1704 = vmatpush.msra.mxu0 %v1402_v58  ;;  %1736 = vmatpush.msra.mxu1 %v1454_v43  ;;  %v1422_v58 = vld [vmem:[#allocation4 + $0x948] sm:$0xff] }
 0x19f   :  { %v1530_v43 = vld [vmem:[#allocation4 + $0xca8] sm:$0xff] }
 0x1a0   :  { %1705 = vmatpush.msra.mxu0 %v1398_v45  ;;  %1737 = vmatpush.msra.mxu1 %v1450_v59  ;;  %v1418_v45 = vld [vmem:[#allocation4 + $0x928] sm:$0xff]  ;;  %v1569_v59 = vld [vmem:[#allocation4 + $0xde0] sm:$0xff] }
 0x1a1   :  { %3983 = vmatmul.msk.f32.gmra.mxu2 %vm862_vm2, %v1219_v28  ;;  %3987 = vmatmul.msk.f32.gmra.mxu3 %vm862_vm2, %v1219_v28  ;;  %v1517_v28 = vld [vmem:[#allocation4 + $0xc40] sm:$0xff] }
 0x1a2   :  { %1649 = vmatpush.msra.mxu2 %v1517_v28  ;;  %1706 = vmatpush.msra.mxu0 %v1394_v52  ;;  %v1350_v28 = vld [vmem:[#allocation4 + $0x708] sm:$0xff] }
 0x1a3   :  { %1738 = vmatpush.msra.mxu1 %v1446_v42  ;;  %v1414_v52 = vld [vmem:[#allocation4 + $0x908] sm:$0xff]  ;;  %1681 = vmatpush.msra.mxu3 %v1569_v59  ;;  %v1467_v59 = vld [vmem:[#allocation4 + $0xab0] sm:$0xff] }
 0x1a4   :  { %1650 = vmatpush.msra.mxu2 %v1513_v9  ;;  %1707 = vmatpush.msra.mxu0 %v1390_v14 }
 0x1a5   :  { %1739 = vmatpush.msra.mxu1 %v1442_v5  ;;  %v1561_v5 = vld [vmem:[#allocation4 + $0xda0] sm:$0xff] }
 0x1a6   :  { %1651 = vmatpush.msra.mxu2 %v1509_v31  ;;  %1708 = vmatpush.msra.mxu0 %v1386_v32  ;;  %v1526_v31 = vld [vmem:[#allocation4 + $0xc88] sm:$0xff] }
 0x1a7   :  { %1740 = vmatpush.msra.mxu1 %v1438_v49  ;;  %v1522_v32 = vld [vmem:[#allocation4 + $0xc68] sm:$0xff] }
 0x1a8   :  { %1652 = vmatpush.msra.mxu2 %v1505_v60  ;;  %1709 = vmatpush.msra.mxu0 %v1382_v16  ;;  %v1518_v60 = vld [vmem:[#allocation4 + $0xc48] sm:$0xff] }
 0x1a9   :  { %1741 = vmatpush.msra.mxu1 %v1434_v12  ;;  %v1506_v49 = vld [vmem:[#allocation4 + $0xbe8] sm:$0xff] }
 0x1aa   :  { %1653 = vmatpush.msra.mxu2 %v1501_v51  ;;  %1710 = vmatpush.msra.mxu0 %v1378_v19  ;;  %v1565_v51 = vld [vmem:[#allocation4 + $0xdc0] sm:$0xff]  ;;  %v1514_v19 = vld [vmem:[#allocation4 + $0xc28] sm:$0xff] }
 0x1ab   :  { %1742 = vmatpush.msra.mxu1 %v1430_v4  ;;  %1682 = vmatpush.msra.mxu3 %v1565_v51  ;;  %v1498_v4 = vld [vmem:[#allocation4 + $0xba8] sm:$0xff] }
 0x1ac   :  { %1654 = vmatpush.msra.mxu2 %v1497_v47  ;;  %1711 = vmatpush.msra.mxu0 %v1374_v53  ;;  %v1510_v47 = vld [vmem:[#allocation4 + $0xc08] sm:$0xff]  ;;  %v1557_v53 = vld [vmem:[#allocation4 + $0xd80] sm:$0xff] }
 0x1ad   :  { %1743 = vmatpush.msra.mxu1 %v1426_v62  ;;  %1683 = vmatpush.msra.mxu3 %v1561_v5  ;;  %v1463_v5 = vld [vmem:[#allocation4 + $0xa90] sm:$0xff] }
 0x1ae   :  { %1655 = vmatpush.msra.mxu2 %v1493_v15  ;;  %1712 = vmatpush.msra.mxu0 %v1370_v10  ;;  %v1553_v15 = vld [vmem:[#allocation4 + $0xd60] sm:$0xff]  ;;  %v1502_v10 = vld [vmem:[#allocation4 + $0xbc8] sm:$0xff] }
 0x1af   :  { %1744 = vmatpush.msra.mxu1 %v1422_v58  ;;  %1684 = vmatpush.msra.mxu3 %v1557_v53  ;;  %v1490_v58 = vld [vmem:[#allocation4 + $0xb68] sm:$0xff]  ;;  %v1459_v53 = vld [vmem:[#allocation4 + $0xa70] sm:$0xff] }
 0x1b0   :  { %1656 = vmatpush.msra.mxu2 %v1489_v24  ;;  %1713 = vmatpush.msra.mxu0 %v1366_v2  ;;  %v1549_v2 = vld [vmem:[#allocation4 + $0xd40] sm:$0xff] }
 0x1b1   :  { %1745 = vmatpush.msra.mxu1 %v1418_v45  ;;  %1685 = vmatpush.msra.mxu3 %v1553_v15  ;;  %v1475_v45 = vld [vmem:[#allocation4 + $0xaf0] sm:$0xff] }
 0x1b2   :  { %1657 = vmatpush.msra.mxu2 %v1485_v29  ;;  %1714 = vmatpush.msra.mxu0 %v1362_v38  ;;  %v1545_v29 = vld [vmem:[#allocation4 + $0xd20] sm:$0xff]  ;;  %v1494_v38 = vld [vmem:[#allocation4 + $0xb88] sm:$0xff] }
 0x1b3   :  { %1746 = vmatpush.msra.mxu1 %v1414_v52  ;;  %1686 = vmatpush.msra.mxu3 %v1549_v2  ;;  %v1482_v52 = vld [vmem:[#allocation4 + $0xb28] sm:$0xff]  ;;  %v1455_v2 = vld [vmem:[#allocation4 + $0xa50] sm:$0xff] }
 0x1b4   :  { %1658 = vmatpush.msra.mxu2 %v1481_v7  ;;  %1715 = vmatpush.msra.mxu0 %v1358_v0  ;;  %v1541_v0 = vld [vmem:[#allocation4 + $0xd00] sm:$0xff] }
 0x1b5   :  { %1687 = vmatpush.msra.mxu3 %v1545_v29  ;;  %v1451_v29 = vld [vmem:[#allocation4 + $0xa30] sm:$0xff] }
 0x1b6   :  { %1659 = vmatpush.msra.mxu2 %v1477_v8  ;;  %1716 = vmatpush.msra.mxu0 %v1354_v25  ;;  %v1486_v8 = vld [vmem:[#allocation4 + $0xb48] sm:$0xff]  ;;  %v1411_v25 = vld [vmem:[#allocation4 + $0x8f0] sm:$0xff] }
 0x1b7   :  { %1688 = vmatpush.msra.mxu3 %v1541_v0 }
 0x1b8   :  { %1760 = vmatpush.msrb.mxu2 %v1538_v23  ;;  %1717 = vmatpush.msra.mxu0 %v1350_v28 }
 0x1ba   :  { %1761 = vmatpush.msrb.mxu2 %v1534_v50  ;;  %v1407_v50 = vld [vmem:[#allocation4 + $0x8d0] sm:$0xff] }
 0x1bc   :  { %1762 = vmatpush.msrb.mxu2 %v1530_v43  ;;  %v1471_v43 = vld [vmem:[#allocation4 + $0xad0] sm:$0xff] }
 0x1be   :  { %1763 = vmatpush.msrb.mxu2 %v1526_v31  ;;  %v1478_v31 = vld [vmem:[#allocation4 + $0xb08] sm:$0xff] }
 0x1c0   :  { %1764 = vmatpush.msrb.mxu2 %v1522_v32  ;;  %v1403_v32 = vld [vmem:[#allocation4 + $0x8b0] sm:$0xff] }
 0x1c2   :  { %1765 = vmatpush.msrb.mxu2 %v1518_v60 }
 0x1c4   :  { %1766 = vmatpush.msrb.mxu2 %v1514_v19  ;;  %v1399_v19 = vld [vmem:[#allocation4 + $0x890] sm:$0xff] }
 0x1c6   :  { %1767 = vmatpush.msrb.mxu2 %v1510_v47  ;;  %v1395_v47 = vld [vmem:[#allocation4 + $0x870] sm:$0xff] }
 0x1c8   :  { %1768 = vmatpush.msrb.mxu2 %v1506_v49 }
 0x1ca   :  { %1769 = vmatpush.msrb.mxu2 %v1502_v10  ;;  %v1391_v10 = vld [vmem:[#allocation4 + $0x850] sm:$0xff] }
 0x1cc   :  { %1770 = vmatpush.msrb.mxu2 %v1498_v4  ;;  %v1387_v4 = vld [vmem:[#allocation4 + $0x830] sm:$0xff] }
 0x1ce   :  { %1771 = vmatpush.msrb.mxu2 %v1494_v38 }
 0x1cf   :  { %v4847_v63 = vpop.f32.mrf.mxu0  ;;  %v4849_v30 = vpop.f32.mrf.mxu1 }
 0x1d0   :  { %1772 = vmatpush.msrb.mxu2 %v1490_v58  ;;  %v1383_v58 = vld [vmem:[#allocation4 + $0x810] sm:$0xff] }
 0x1d2   :  { %1773 = vmatpush.msrb.mxu2 %v1486_v8  ;;  %v1447_v8 = vld [vmem:[#allocation4 + $0xa10] sm:$0xff] }
 0x1d4   :  { %1774 = vmatpush.msrb.mxu2 %v1482_v52  ;;  %v1443_v52 = vld [vmem:[#allocation4 + $0x9f0] sm:$0xff] }
 0x1d6   :  { %1775 = vmatpush.msrb.mxu2 %v1478_v31  ;;  %v1566_v31 = vld [vmem:[#allocation4 + $0xdc8] sm:$0xff] }
 0x1d7   :  { %v4851_v9 = vpop.f32.mrf.mxu0  ;;  %v4853_v14 = vpop.f32.mrf.mxu1 }
 0x1e0   :  { %v4855_v16 = vpop.f32.mrf.mxu0  ;;  %v4857_v42 = vpop.f32.mrf.mxu1 }
 0x1e8   :  { %v4859_v12 = vpop.f32.mrf.mxu0  ;;  %v4861_v24 = vpop.f32.mrf.mxu1 }
 0x1ec   :  { %v4863_v62 = vpop.f32.mrf.mxu2  ;;  %v4865_v7 = vpop.f32.mrf.mxu3 }
 0x1f0   :  { %v4867_v23 = vpop.f32.mrf.mxu0  ;;  %v4869_v28 = vpop.f32.mrf.mxu1 }
 0x1f1   :  { %1602 = vmatmul.f32.vlgmr.msrb.gmra.mxu0 %v4867_v23  ;;  %1631 = vmatmul.f32.vlgmr.msrb.gmra.mxu1 %v4869_v28 }
 0x1f2   :  { %1818 = vmatpush.msrb.mxu0 %v1411_v25  ;;  %1847 = vmatpush.msrb.mxu1 %v1475_v45  ;;  %v1570_v25 = vld [vmem:[#allocation4 + $0xde8] sm:$0xff]  ;;  %v1379_v45 = vld [vmem:[#allocation4 + $0x7f0] sm:$0xff] }
 0x1f3   :  { %1797 = vmatpush.msrb.mxu3 %v1570_v25 }
 0x1f4   :  { %v4873_v60 = vpop.f32.mrf.mxu2  ;;  %v4875_v51 = vpop.f32.mrf.mxu3  ;;  %1819 = vmatpush.msrb.mxu0 %v1407_v50  ;;  %1848 = vmatpush.msrb.mxu1 %v1471_v43 }
 0x1f5   :  { %1798 = vmatpush.msrb.mxu3 %v1566_v31  ;;  %v1359_v31 = vld [vmem:[#allocation4 + $0x750] sm:$0xff] }
 0x1f6   :  { %1820 = vmatpush.msrb.mxu0 %v1403_v32  ;;  %1849 = vmatpush.msrb.mxu1 %v1467_v59  ;;  %v1375_v32 = vld [vmem:[#allocation4 + $0x7d0] sm:$0xff] }
 0x1f7   :  { %v1439_v59 = vld [vmem:[#allocation4 + $0x9d0] sm:$0xff] }
 0x1f8   :  { %v4877_v49 = vpop.f32.mrf.mxu0  ;;  %v4879_v15 = vpop.f32.mrf.mxu1  ;;  %1821 = vmatpush.msrb.mxu0 %v1399_v19  ;;  %1850 = vmatpush.msrb.mxu1 %v1463_v5  ;;  %v1562_v19 = vld [vmem:[#allocation4 + $0xda8] sm:$0xff]  ;;  %v1371_v5 = vld [vmem:[#allocation4 + $0x7b0] sm:$0xff] }
 0x1f9   :  { %1605 = vmatmul.f32.gmra.mxu0 %v4877_v49  ;;  %1634 = vmatmul.f32.gmra.mxu1 %v4879_v15 }
 0x1fa   :  { %1822 = vmatpush.msrb.mxu0 %v1395_v47  ;;  %1851 = vmatpush.msrb.mxu1 %v1459_v53  ;;  %v1435_v47 = vld [vmem:[#allocation4 + $0x9b0] sm:$0xff] }
 0x1fb   :  { %1799 = vmatpush.msrb.mxu3 %v1562_v19  ;;  %v1419_v19 = vld [vmem:[#allocation4 + $0x930] sm:$0xff] }
 0x1fc   :  { %v4883_v38 = vpop.f32.mrf.mxu2  ;;  %v4885_v0 = vpop.f32.mrf.mxu3  ;;  %1823 = vmatpush.msrb.mxu0 %v1391_v10  ;;  %1852 = vmatpush.msrb.mxu1 %v1455_v2  ;;  %v1558_v2 = vld [vmem:[#allocation4 + $0xd88] sm:$0xff] }
 0x1fd   :  { %1800 = vmatpush.msrb.mxu3 %v1558_v2  ;;  %v1539_v2 = vld [vmem:[#allocation4 + $0xcf0] sm:$0xff] }
 0x1fe   :  { %1824 = vmatpush.msrb.mxu0 %v1387_v4  ;;  %1853 = vmatpush.msrb.mxu1 %v1451_v29  ;;  %v1367_v4 = vld [vmem:[#allocation4 + $0x790] sm:$0xff] }
 0x1ff   :  { %v1431_v29 = vld [vmem:[#allocation4 + $0x990] sm:$0xff] }
 0x200   :  { %v4887_v50 = vpop.f32.mrf.mxu0  ;;  %v4889_v43 = vpop.f32.mrf.mxu1  ;;  %1825 = vmatpush.msrb.mxu0 %v1383_v58  ;;  %1854 = vmatpush.msrb.mxu1 %v1447_v8  ;;  %v1363_v58 = vld [vmem:[#allocation4 + $0x770] sm:$0xff] }
 0x201   :  { %1608 = vmatmul.f32.gmra.mxu0 %v4887_v50  ;;  %1637 = vmatmul.f32.gmra.mxu1 %v4889_v43  ;;  %v1427_v8 = vld [vmem:[#allocation4 + $0x970] sm:$0xff] }
 0x202   :  { %1826 = vmatpush.msrb.mxu0 %v1379_v45  ;;  %1855 = vmatpush.msrb.mxu1 %v1443_v52  ;;  %v1554_v52 = vld [vmem:[#allocation4 + $0xd68] sm:$0xff] }
 0x203   :  { %1801 = vmatpush.msrb.mxu3 %v1554_v52  ;;  %v1476_v52 = vld [vmem:[#allocation4 + $0xaf8] sm:$0xff] }
 0x204   :  { %v4893_v53 = vpop.f32.mrf.mxu2  ;;  %v4895_v10 = vpop.f32.mrf.mxu3  ;;  %1827 = vmatpush.msrb.mxu0 %v1375_v32  ;;  %1856 = vmatpush.msrb.mxu1 %v1439_v59  ;;  %v1423_v32 = vld [vmem:[#allocation4 + $0x950] sm:$0xff] }
 0x205   :  { %v1355_v59 = vld [vmem:[#allocation4 + $0x730] sm:$0xff] }
 0x206   :  { %1828 = vmatpush.msrb.mxu0 %v1371_v5  ;;  %1857 = vmatpush.msrb.mxu1 %v1435_v47 }
 0x208   :  { %v4897_v25 = vpop.f32.mrf.mxu0  ;;  %v4899_v45 = vpop.f32.mrf.mxu1  ;;  %1829 = vmatpush.msrb.mxu0 %v1367_v4  ;;  %1858 = vmatpush.msrb.mxu1 %v1431_v29  ;;  %v1550_v4 = vld [vmem:[#allocation4 + $0xd48] sm:$0xff]  ;;  %v1351_v29 = vld [vmem:[#allocation4 + $0x710] sm:$0xff] }
 0x209   :  { %1611 = vmatmul.f32.gmra.mxu0 %v4897_v25  ;;  %1640 = vmatmul.f32.gmra.mxu1 %v4899_v45 }
 0x20a   :  { %1830 = vmatpush.msrb.mxu0 %v1363_v58  ;;  %1859 = vmatpush.msrb.mxu1 %v1427_v8  ;;  %v1535_v58 = vld [vmem:[#allocation4 + $0xcd0] sm:$0xff]  ;;  %v1412_v8 = vld [vmem:[#allocation4 + $0x8f8] sm:$0xff] }
 0x20b   :  { %1802 = vmatpush.msrb.mxu3 %v1550_v4  ;;  %v1542_v4 = vld [vmem:[#allocation4 + $0xd08] sm:$0xff] }
 0x20c   :  { %v4903_v5 = vpop.f32.mrf.mxu2  ;;  %v4905_v47 = vpop.f32.mrf.mxu3  ;;  %1831 = vmatpush.msrb.mxu0 %v1359_v31  ;;  %1860 = vmatpush.msrb.mxu1 %v1423_v32  ;;  %v1546_v31 = vld [vmem:[#allocation4 + $0xd28] sm:$0xff]  ;;  %v1531_v32 = vld [vmem:[#allocation4 + $0xcb0] sm:$0xff] }
 0x20d   :  { %1660 = vmatmul.f32.vlgmr.msra.gmra.mxu2 %v4903_v5  ;;  %3988 = vmatmul.msk.f32.vlgmr.msra.gmra.mxu3 %vm1573_vm3, %v4905_v47 }
 0x20e   :  { %1832 = vmatpush.msrb.mxu0 %v1355_v59  ;;  %1861 = vmatpush.msrb.mxu1 %v1419_v19  ;;  %v1527_v59 = vld [vmem:[#allocation4 + $0xc90] sm:$0xff] }
 0x20f   :  { %1876 = vmatpush.msra.mxu2 %v1539_v2  ;;  %1803 = vmatpush.msrb.mxu3 %v1546_v31  ;;  %v1519_v31 = vld [vmem:[#allocation4 + $0xc50] sm:$0xff] }
 0x210   :  { %1833 = vmatpush.msrb.mxu0 %v1351_v29  ;;  %1862 = vmatpush.msrb.mxu1 %v1415_v1  ;;  %v1404_v1 = vld [vmem:[#allocation4 + $0x8b8] sm:$0xff] }
 0x211   :  { %1718 = vmatmul.f32.vlgmr.msra.gmra.mxu0 %v4867_v23  ;;  %1747 = vmatmul.f32.vlgmr.msra.gmra.mxu1 %v4869_v28  ;;  %v1468_v29 = vld [vmem:[#allocation4 + $0xab8] sm:$0xff] }
 0x212   :  { %1877 = vmatpush.msra.mxu2 %v1535_v58  ;;  %1934 = vmatpush.msra.mxu0 %v1412_v8  ;;  %v1523_v58 = vld [vmem:[#allocation4 + $0xc70] sm:$0xff]  ;;  %v1400_v8 = vld [vmem:[#allocation4 + $0x898] sm:$0xff] }
 0x213   :  { %1963 = vmatpush.msra.mxu1 %v1476_v52  ;;  %v1464_v52 = vld [vmem:[#allocation4 + $0xa98] sm:$0xff]  ;;  %1804 = vmatpush.msrb.mxu3 %v1542_v4  ;;  %v1511_v4 = vld [vmem:[#allocation4 + $0xc10] sm:$0xff] }
 0x214   :  { %v4912_v19 = vpop.f32.mrf.mxu2  ;;  %v4914_v2 = vpop.f32.mrf.mxu3  ;;  %1878 = vmatpush.msra.mxu2 %v1531_v32  ;;  %1935 = vmatpush.msra.mxu0 %v1408_v44  ;;  %v1396_v44 = vld [vmem:[#allocation4 + $0x878] sm:$0xff] }
 0x215   :  { %1663 = vmatmul.f32.gmra.mxu2 %v4912_v19  ;;  %3989 = vmatmul.msk.f32.gmra.mxu3 %vm1573_vm3, %v4914_v2  ;;  %v1460_v32 = vld [vmem:[#allocation4 + $0xa78] sm:$0xff] }
 0x216   :  { %1964 = vmatpush.msra.mxu1 %v1472_v20  ;;  %1879 = vmatpush.msra.mxu2 %v1527_v59 }
 0x217   :  { %1936 = vmatpush.msra.mxu0 %v1404_v1  ;;  %v1456_v1 = vld [vmem:[#allocation4 + $0xa58] sm:$0xff] }
 0x218   :  { %1965 = vmatpush.msra.mxu1 %v1468_v29  ;;  %1880 = vmatpush.msra.mxu2 %v1523_v58  ;;  %v1388_v29 = vld [vmem:[#allocation4 + $0x838] sm:$0xff] }
 0x219   :  { %1721 = vmatmul.f32.gmra.mxu0 %v4877_v49  ;;  %1750 = vmatmul.f32.gmra.mxu1 %v4879_v15  ;;  %v1452_v58 = vld [vmem:[#allocation4 + $0xa38] sm:$0xff] }
 0x21a   :  { %1937 = vmatpush.msra.mxu0 %v1400_v8  ;;  %1966 = vmatpush.msra.mxu1 %v1464_v52  ;;  %v1507_v8 = vld [vmem:[#allocation4 + $0xbf0] sm:$0xff]  ;;  %v1384_v52 = vld [vmem:[#allocation4 + $0x818] sm:$0xff] }
 0x21b   :  { %1881 = vmatpush.msra.mxu2 %v1519_v31  ;;  %v1448_v31 = vld [vmem:[#allocation4 + $0xa18] sm:$0xff] }
 0x21c   :  { %v4921_v20 = vpop.f32.mrf.mxu2  ;;  %v4923_v59 = vpop.f32.mrf.mxu3  ;;  %1938 = vmatpush.msra.mxu0 %v1396_v44  ;;  %1967 = vmatpush.msra.mxu1 %v1460_v32  ;;  %v1503_v44 = vld [vmem:[#allocation4 + $0xbd0] sm:$0xff] }
 0x21d   :  { %1666 = vmatmul.f32.gmra.mxu2 %v4921_v20  ;;  %3990 = vmatmul.msk.f32.gmra.mxu3 %vm1573_vm3, %v4923_v59  ;;  %v1571_v32 = vld [vmem:[#allocation4 + $0xdf0] sm:$0xff] }
 0x21e   :  { %1882 = vmatpush.msra.mxu2 %v1515_v33  ;;  %1939 = vmatpush.msra.mxu0 %v1392_v6 }
 0x21f   :  { %1968 = vmatpush.msra.mxu1 %v1456_v1  ;;  %1913 = vmatpush.msra.mxu3 %v1571_v32  ;;  %v1499_v1 = vld [vmem:[#allocation4 + $0xbb0] sm:$0xff]  ;;  %v1436_v32 = vld [vmem:[#allocation4 + $0x9b8] sm:$0xff] }
 0x220   :  { %1883 = vmatpush.msra.mxu2 %v1511_v4  ;;  %1940 = vmatpush.msra.mxu0 %v1388_v29  ;;  %v1567_v4 = vld [vmem:[#allocation4 + $0xdd0] sm:$0xff]  ;;  %v1376_v29 = vld [vmem:[#allocation4 + $0x7d8] sm:$0xff] }
 0x221   :  { %1724 = vmatmul.f32.gmra.mxu0 %v4887_v50  ;;  %1753 = vmatmul.f32.gmra.mxu1 %v4889_v43 }
 0x222   :  { %1969 = vmatpush.msra.mxu1 %v1452_v58  ;;  %1884 = vmatpush.msra.mxu2 %v1507_v8  ;;  %v1440_v58 = vld [vmem:[#allocation4 + $0x9d8] sm:$0xff]  ;;  %v1495_v8 = vld [vmem:[#allocation4 + $0xb90] sm:$0xff] }
 0x223   :  { %1941 = vmatpush.msra.mxu0 %v1384_v52  ;;  %v1372_v52 = vld [vmem:[#allocation4 + $0x7b8] sm:$0xff]  ;;  %1914 = vmatpush.msra.mxu3 %v1567_v4  ;;  %v1483_v4 = vld [vmem:[#allocation4 + $0xb30] sm:$0xff] }
 0x224   :  { %v4930_v6 = vpop.f32.mrf.mxu2  ;;  %v4932_v33 = vpop.f32.mrf.mxu3  ;;  %1970 = vmatpush.msra.mxu1 %v1448_v31  ;;  %1885 = vmatpush.msra.mxu2 %v1503_v44  ;;  %v1563_v31 = vld [vmem:[#allocation4 + $0xdb0] sm:$0xff] }
 0x225   :  { %1669 = vmatmul.f32.gmra.mxu2 %v4930_v6  ;;  %3991 = vmatmul.msk.f32.gmra.mxu3 %vm1573_vm3, %v4932_v33  ;;  %v1491_v44 = vld [vmem:[#allocation4 + $0xb70] sm:$0xff] }
 0x226   :  { %1942 = vmatpush.msra.mxu0 %v1380_v35  ;;  %1971 = vmatpush.msra.mxu1 %v1444_v54  ;;  %v1487_v35 = vld [vmem:[#allocation4 + $0xb50] sm:$0xff]  ;;  %v1364_v54 = vld [vmem:[#allocation4 + $0x778] sm:$0xff] }
 0x227   :  { %1886 = vmatpush.msra.mxu2 %v1499_v1  ;;  %1915 = vmatpush.msra.mxu3 %v1563_v31  ;;  %v1428_v1 = vld [vmem:[#allocation4 + $0x978] sm:$0xff] }
 0x228   :  { %1943 = vmatpush.msra.mxu0 %v1376_v29  ;;  %1972 = vmatpush.msra.mxu1 %v1440_v58  ;;  %v1559_v29 = vld [vmem:[#allocation4 + $0xd90] sm:$0xff]  ;;  %v1360_v58 = vld [vmem:[#allocation4 + $0x758] sm:$0xff] }
 0x229   :  { %1727 = vmatmul.f32.gmra.mxu0 %v4897_v25  ;;  %1756 = vmatmul.f32.gmra.mxu1 %v4899_v45  ;;  %v1352_v31 = vld [vmem:[#allocation4 + $0x718] sm:$0xff] }
 0x22a   :  { %1887 = vmatpush.msra.mxu2 %v1495_v8  ;;  %1944 = vmatpush.msra.mxu0 %v1372_v52  ;;  %v1424_v8 = vld [vmem:[#allocation4 + $0x958] sm:$0xff]  ;;  %v1479_v52 = vld [vmem:[#allocation4 + $0xb10] sm:$0xff] }
 0x22b   :  { %1973 = vmatpush.msra.mxu1 %v1436_v32  ;;  %v1356_v32 = vld [vmem:[#allocation4 + $0x738] sm:$0xff]  ;;  %1916 = vmatpush.msra.mxu3 %v1559_v29  ;;  %v1047_v29 = vld [vmem:[#allocation4 + $0x1c0] sm:$0xff] }
 0x22c   :  { %1888 = vmatpush.msra.mxu2 %v1491_v44  ;;  %1945 = vmatpush.msra.mxu0 %v1368_v48  ;;  %v1420_v48 = vld [vmem:[#allocation4 + $0x938] sm:$0xff] }
 0x22d   :  { %1974 = vmatpush.msra.mxu1 %v1432_v55  ;;  %1776 = vmatmul.f32.vlgmr.msrb.gmra.mxu2 %v4903_v5  ;;  %v1540_v55 = vld [vmem:[#allocation4 + $0xcf8] sm:$0xff] }
 0x22e   :  { %3992 = vmatmul.msk.f32.vlgmr.msrb.gmra.mxu3 %vm1573_vm3, %v4905_v47  ;;  %1889 = vmatpush.msra.mxu2 %v1487_v35  ;;  %v1416_v44 = vld [vmem:[#allocation4 + $0x918] sm:$0xff] }
 0x22f   :  { %1946 = vmatpush.msra.mxu0 %v1364_v54  ;;  %1975 = vmatpush.msra.mxu1 %v1428_v1  ;;  %v1536_v35 = vld [vmem:[#allocation4 + $0xcd8] sm:$0xff]  ;;  %v1051_v54 = vld [vmem:[#allocation4 + $0x1e0] sm:$0xff] }
 0x230   :  { %1890 = vmatpush.msra.mxu2 %v1483_v4  ;;  %v1115_v1 = vld [vmem:[#allocation4 + $0x3e0] sm:$0xff]  ;;  %v1532_v4 = vld [vmem:[#allocation4 + $0xcb8] sm:$0xff] }
 0x231   :  { %1947 = vmatpush.msra.mxu0 %v1360_v58  ;;  %1976 = vmatpush.msra.mxu1 %v1424_v8  ;;  %v1555_v58 = vld [vmem:[#allocation4 + $0xd70] sm:$0xff]  ;;  %v1111_v8 = vld [vmem:[#allocation4 + $0x3c0] sm:$0xff] }
 0x232   :  { %1834 = vmatmul.f32.vlgmr.msrb.gmra.mxu0 %v4867_v23  ;;  %1863 = vmatmul.f32.vlgmr.msrb.gmra.mxu1 %v4869_v28 }
 0x233   :  { %1891 = vmatpush.msra.mxu2 %v1479_v52  ;;  %1948 = vmatpush.msra.mxu0 %v1356_v32  ;;  %v1528_v52 = vld [vmem:[#allocation4 + $0xc98] sm:$0xff]  ;;  %v1043_v32 = vld [vmem:[#allocation4 + $0x1a0] sm:$0xff] }
 0x234   :  { %1977 = vmatpush.msra.mxu1 %v1420_v48  ;;  %v1107_v48 = vld [vmem:[#allocation4 + $0x3a0] sm:$0xff]  ;;  %1917 = vmatpush.msra.mxu3 %v1555_v58 }
 0x235   :  { %1992 = vmatpush.msrb.mxu2 %v1540_v55  ;;  %1949 = vmatpush.msra.mxu0 %v1352_v31  ;;  %v1524_v55 = vld [vmem:[#allocation4 + $0xc78] sm:$0xff]  ;;  %v1551_v31 = vld [vmem:[#allocation4 + $0xd50] sm:$0xff]  ;;  %v1031_v58 = vld [vmem:[#allocation4 + $0x140] sm:$0xff] }
 0x236   :  { %1779 = vmatmul.f32.gmra.mxu2 %v4912_v19  ;;  %1978 = vmatpush.msra.mxu1 %v1416_v44  ;;  %v1039_v44 = vld [vmem:[#allocation4 + $0x180] sm:$0xff] }
 0x237   :  { %1993 = vmatpush.msrb.mxu2 %v1536_v35  ;;  %3993 = vmatmul.msk.f32.gmra.mxu3 %vm1573_vm3, %v4914_v2  ;;  %v1103_v35 = vld [vmem:[#allocation4 + $0x380] sm:$0xff] }
 0x238   :  { %2062 = vmatpush.msrb.mxu0 %v1051_v54  ;;  %2091 = vmatpush.msrb.mxu1 %v1115_v1  ;;  %v1520_v54 = vld [vmem:[#allocation4 + $0xc58] sm:$0xff]  ;;  %v1035_v1 = vld [vmem:[#allocation4 + $0x160] sm:$0xff] }
 0x239   :  { %1994 = vmatpush.msrb.mxu2 %v1532_v4  ;;  %1918 = vmatpush.msra.mxu3 %v1551_v31  ;;  %v1099_v4 = vld [vmem:[#allocation4 + $0x360] sm:$0xff]  ;;  %v1508_v31 = vld [vmem:[#allocation4 + $0xbf8] sm:$0xff] }
 0x23a   :  { %2063 = vmatpush.msrb.mxu0 %v1047_v29  ;;  %2092 = vmatpush.msrb.mxu1 %v1111_v8  ;;  %v1516_v29 = vld [vmem:[#allocation4 + $0xc38] sm:$0xff]  ;;  %v1547_v8 = vld [vmem:[#allocation4 + $0xd30] sm:$0xff] }
 0x23b   :  { %1995 = vmatpush.msrb.mxu2 %v1528_v52  ;;  %1837 = vmatmul.f32.gmra.mxu0 %v4877_v49  ;;  %v1095_v52 = vld [vmem:[#allocation4 + $0x340] sm:$0xff] }
 0x23c   :  { %1866 = vmatmul.f32.gmra.mxu1 %v4879_v15  ;;  %2064 = vmatpush.msrb.mxu0 %v1043_v32  ;;  %v1512_v32 = vld [vmem:[#allocation4 + $0xc18] sm:$0xff] }
 0x23d   :  { %2093 = vmatpush.msrb.mxu1 %v1107_v48  ;;  %1996 = vmatpush.msrb.mxu2 %v1524_v55  ;;  %v1027_v48 = vld [vmem:[#allocation4 + $0x120] sm:$0xff] }
 0x23e   :  { %2065 = vmatpush.msrb.mxu0 %v1039_v44  ;;  %1782 = vmatmul.f32.gmra.mxu2 %v4921_v20  ;;  %v1091_v55 = vld [vmem:[#allocation4 + $0x320] sm:$0xff]  ;;  %v1543_v44 = vld [vmem:[#allocation4 + $0xd10] sm:$0xff] }
 0x23f   :  { %2094 = vmatpush.msrb.mxu1 %v1103_v35  ;;  %1997 = vmatpush.msrb.mxu2 %v1520_v54  ;;  %v1023_v35 = vld [vmem:[#allocation4 + $0x100] sm:$0xff] }
 0x240   :  { %3994 = vmatmul.msk.f32.gmra.mxu3 %vm1573_vm3, %v4923_v59  ;;  %2066 = vmatpush.msrb.mxu0 %v1035_v1  ;;  %v1087_v54 = vld [vmem:[#allocation4 + $0x300] sm:$0xff]  ;;  %v1504_v1 = vld [vmem:[#allocation4 + $0xbd8] sm:$0xff] }
 0x241   :  { %2095 = vmatpush.msrb.mxu1 %v1099_v4  ;;  %1998 = vmatpush.msrb.mxu2 %v1516_v29  ;;  %v1019_v4 = vld [vmem:[#allocation4 + $0xe0] sm:$0xff] }
 0x242   :  { %2067 = vmatpush.msrb.mxu0 %v1031_v58  ;;  %1919 = vmatpush.msra.mxu3 %v1547_v8  ;;  %v1083_v29 = vld [vmem:[#allocation4 + $0x2e0] sm:$0xff]  ;;  %v1500_v58 = vld [vmem:[#allocation4 + $0xbb8] sm:$0xff] }
 0x243   :  { %2096 = vmatpush.msrb.mxu1 %v1095_v52  ;;  %1999 = vmatpush.msrb.mxu2 %v1512_v32  ;;  %v1015_v8 = vld [vmem:[#allocation4 + $0xc0] sm:$0xff]  ;;  %v1572_v52 = vld [vmem:[#allocation4 + $0xdf8] sm:$0xff] }
 0x244   :  { %1840 = vmatmul.f32.gmra.mxu0 %v4887_v50  ;;  %1869 = vmatmul.f32.gmra.mxu1 %v4889_v43  ;;  %v1079_v32 = vld [vmem:[#allocation4 + $0x2c0] sm:$0xff] }
 0x245   :  { %2068 = vmatpush.msrb.mxu0 %v1027_v48  ;;  %2097 = vmatpush.msrb.mxu1 %v1091_v55  ;;  %v1496_v48 = vld [vmem:[#allocation4 + $0xb98] sm:$0xff]  ;;  %v1011_v55 = vld [vmem:[#allocation4 + $0xa0] sm:$0xff] }
 0x246   :  { %2000 = vmatpush.msrb.mxu2 %v1508_v31  ;;  %1920 = vmatpush.msra.mxu3 %v1543_v44  ;;  %v1075_v31 = vld [vmem:[#allocation4 + $0x2a0] sm:$0xff]  ;;  %v1492_v44 = vld [vmem:[#allocation4 + $0xb78] sm:$0xff] }
 0x247   :  { %2069 = vmatpush.msrb.mxu0 %v1023_v35  ;;  %2098 = vmatpush.msrb.mxu1 %v1087_v54  ;;  %v1568_v35 = vld [vmem:[#allocation4 + $0xdd8] sm:$0xff]  ;;  %v1007_v54 = vld [vmem:[#allocation4 + $0x80] sm:$0xff] }
 0x248   :  { %2001 = vmatpush.msrb.mxu2 %v1504_v1  ;;  %3995 = vmatmul.msk.f32.gmra.mxu3 %vm1573_vm3, %v4932_v33  ;;  %v1071_v1 = vld [vmem:[#allocation4 + $0x280] sm:$0xff] }
 0x249   :  { %1785 = vmatmul.f32.gmra.mxu2 %v4930_v6  ;;  %2070 = vmatpush.msrb.mxu0 %v1019_v4  ;;  %v1488_v4 = vld [vmem:[#allocation4 + $0xb58] sm:$0xff] }
 0x24a   :  { %2099 = vmatpush.msrb.mxu1 %v1083_v29  ;;  %2002 = vmatpush.msrb.mxu2 %v1500_v58  ;;  %v1003_v29 = vld [vmem:[#allocation4 + $0x60] sm:$0xff] }
 0x24b   :  { %2071 = vmatpush.msrb.mxu0 %v1015_v8  ;;  %2029 = vmatpush.msrb.mxu3 %v1572_v52  ;;  %v1067_v58 = vld [vmem:[#allocation4 + $0x260] sm:$0xff]  ;;  %v1484_v8 = vld [vmem:[#allocation4 + $0xb38] sm:$0xff] }
 0x24c   :  { %2100 = vmatpush.msrb.mxu1 %v1079_v32  ;;  %2003 = vmatpush.msrb.mxu2 %v1496_v48  ;;  %v999_v52 = vld [vmem:[#allocation4 + $0x40] sm:$0xff]  ;;  %v1564_v32 = vld [vmem:[#allocation4 + $0xdb8] sm:$0xff] }
 0x24d   :  { %1843 = vmatmul.f32.gmra.mxu0 %v4897_v25  ;;  %1872 = vmatmul.f32.gmra.mxu1 %v4899_v45  ;;  %v1063_v48 = vld [vmem:[#allocation4 + $0x240] sm:$0xff] }
 0x24e   :  { %2072 = vmatpush.msrb.mxu0 %v1011_v55  ;;  %2101 = vmatpush.msrb.mxu1 %v1075_v31  ;;  %v1480_v55 = vld [vmem:[#allocation4 + $0xb18] sm:$0xff]  ;;  %v995_v31 = vld [vmem:[#allocation4 + $0x20] sm:$0xff] }
 0x24f   :  { %2004 = vmatpush.msrb.mxu2 %v1492_v44  ;;  %2030 = vmatpush.msrb.mxu3 %v1568_v35  ;;  %v1059_v44 = vld [vmem:[#allocation4 + $0x220] sm:$0xff] }
 0x250   :  { %2073 = vmatpush.msrb.mxu0 %v1007_v54  ;;  %2102 = vmatpush.msrb.mxu1 %v1071_v1  ;;  %v1179_v35 = vld [vmem:[#allocation4 + $0x5e0] sm:$0xff]  ;;  %v1560_v54 = vld [vmem:[#allocation4 + $0xd98] sm:$0xff] }
 0x251   :  { %2005 = vmatpush.msrb.mxu2 %v1488_v4  ;;  %3996 = vmatmul.msk.f32.vlgmr.msra.gmra.mxu3 %vm1573_vm3, %v4905_v47  ;;  %v991_v1 = vld [vmem:[#allocation4] sm:$0xff] }
 0x252   :  { %1892 = vmatmul.f32.vlgmr.msra.gmra.mxu2 %v4903_v5  ;;  %2074 = vmatpush.msrb.mxu0 %v1003_v29  ;;  %v1055_v4 = vld [vmem:[#allocation4 + $0x200] sm:$0xff] }
 0x253   :  { %2103 = vmatpush.msrb.mxu1 %v1067_v58  ;;  %2006 = vmatpush.msrb.mxu2 %v1484_v8  ;;  %v1175_v29 = vld [vmem:[#allocation4 + $0x5c0] sm:$0xff]  ;;  %v1116_v58 = vld [vmem:[#allocation4 + $0x3e8] sm:$0xff] }
 0x254   :  { %2075 = vmatpush.msrb.mxu0 %v999_v52  ;;  %2031 = vmatpush.msrb.mxu3 %v1564_v32  ;;  %v1171_v8 = vld [vmem:[#allocation4 + $0x5a0] sm:$0xff]  ;;  %v1048_v52 = vld [vmem:[#allocation4 + $0x1c8] sm:$0xff] }
 0x255   :  { %2104 = vmatpush.msrb.mxu1 %v1063_v48  ;;  %2007 = vmatpush.msrb.mxu2 %v1480_v55  ;;  %v1112_v32 = vld [vmem:[#allocation4 + $0x3c8] sm:$0xff]  ;;  %v1163_v55 = vld [vmem:[#allocation4 + $0x560] sm:$0xff] }
 0x256   :  { %1950 = vmatmul.f32.vlgmr.msra.gmra.mxu0 %v4867_v23  ;;  %1979 = vmatmul.f32.vlgmr.msra.gmra.mxu1 %v4869_v28  ;;  %v1167_v23 = vld [vmem:[#allocation4 + $0x580] sm:$0xff]  ;;  %v1044_v28 = vld [vmem:[#allocation4 + $0x1a8] sm:$0xff] }
 0x257   :  { %2076 = vmatpush.msrb.mxu0 %v995_v31  ;;  %2105 = vmatpush.msrb.mxu1 %v1059_v44  ;;  %v1108_v48 = vld [vmem:[#allocation4 + $0x3a8] sm:$0xff]  ;;  %v1159_v44 = vld [vmem:[#allocation4 + $0x540] sm:$0xff] }
 0x258   :  { %2120 = vmatpush.msra.mxu2 %v1179_v35  ;;  %2032 = vmatpush.msrb.mxu3 %v1560_v54  ;;  %v1040_v31 = vld [vmem:[#allocation4 + $0x188] sm:$0xff]  ;;  %v1556_v35 = vld [vmem:[#allocation4 + $0xd78] sm:$0xff] }
 0x259   :  { %2077 = vmatpush.msrb.mxu0 %v991_v1  ;;  %2106 = vmatpush.msrb.mxu1 %v1055_v4  ;;  %v1036_v54 = vld [vmem:[#allocation4 + $0x168] sm:$0xff]  ;;  %v1155_v4 = vld [vmem:[#allocation4 + $0x520] sm:$0xff] }
 0x25a   :  { %2121 = vmatpush.msra.mxu2 %v1175_v29  ;;  %3997 = vmatmul.msk.f32.gmra.mxu3 %vm1573_vm3, %v4914_v2  ;;  %v1100_v1 = vld [vmem:[#allocation4 + $0x368] sm:$0xff] }
 0x25b   :  { %2178 = vmatpush.msra.mxu0 %v1052_v27  ;;  %2207 = vmatpush.msra.mxu1 %v1116_v58  ;;  %v1104_v27 = vld [vmem:[#allocation4 + $0x388] sm:$0xff]  ;;  %v1151_v58 = vld [vmem:[#allocation4 + $0x500] sm:$0xff] }
 0x25c   :  { %1895 = vmatmul.f32.gmra.mxu2 %v4912_v19  ;;  %v1032_v29 = vld [vmem:[#allocation4 + $0x148] sm:$0xff]  ;;  %2033 = vmatpush.msrb.mxu3 %v1556_v35 }
 0x25d   :  { %2122 = vmatpush.msra.mxu2 %v1171_v8  ;;  %2179 = vmatpush.msra.mxu0 %v1048_v52  ;;  %v1028_v8 = vld [vmem:[#allocation4 + $0x128] sm:$0xff]  ;;  %v1552_v52 = vld [vmem:[#allocation4 + $0xd58] sm:$0xff] }
 0x25e   :  { %2208 = vmatpush.msra.mxu1 %v1112_v32  ;;  %1953 = vmatmul.f32.gmra.mxu0 %v4877_v49  ;;  %v1096_v49 = vld [vmem:[#allocation4 + $0x348] sm:$0xff]  ;;  %v1147_v32 = vld [vmem:[#allocation4 + $0x4e0] sm:$0xff] }
 0x25f   :  { %2123 = vmatpush.msra.mxu2 %v1167_v23  ;;  %2180 = vmatpush.msra.mxu0 %v1044_v28  ;;  %v1024_v23 = vld [vmem:[#allocation4 + $0x108] sm:$0xff] }
 0x260   :  { %2209 = vmatpush.msra.mxu1 %v1108_v48  ;;  %v1088_v28 = vld [vmem:[#allocation4 + $0x308] sm:$0xff]  ;;  %v1143_v48 = vld [vmem:[#allocation4 + $0x4c0] sm:$0xff]  ;;  %2034 = vmatpush.msrb.mxu3 %v1552_v52 }
 0x261   :  { %1982 = vmatmul.f32.gmra.mxu1 %v4879_v15  ;;  %2124 = vmatpush.msra.mxu2 %v1163_v55  ;;  %v1092_v15 = vld [vmem:[#allocation4 + $0x328] sm:$0xff]  ;;  %v1548_v55 = vld [vmem:[#allocation4 + $0xd38] sm:$0xff]  ;;  %v1127_v52 = vld [vmem:[#allocation4 + $0x440] sm:$0xff] }
 0x262   :  { %2181 = vmatpush.msra.mxu0 %v1040_v31  ;;  %2210 = vmatpush.msra.mxu1 %v1104_v27  ;;  %v1020_v31 = vld [vmem:[#allocation4 + $0xe8] sm:$0xff] }
 0x263   :  { %2125 = vmatpush.msra.mxu2 %v1159_v44  ;;  %3998 = vmatmul.msk.f32.gmra.mxu3 %vm1573_vm3, %v4923_v59  ;;  %v1084_v27 = vld [vmem:[#allocation4 + $0x2e8] sm:$0xff]  ;;  %v1139_v44 = vld [vmem:[#allocation4 + $0x4a0] sm:$0xff] }
 0x264   :  { %2182 = vmatpush.msra.mxu0 %v1036_v54  ;;  %2211 = vmatpush.msra.mxu1 %v1100_v1  ;;  %v1016_v35 = vld [vmem:[#allocation4 + $0xc8] sm:$0xff]  ;;  %v1135_v54 = vld [vmem:[#allocation4 + $0x480] sm:$0xff] }
 0x265   :  { %1898 = vmatmul.f32.gmra.mxu2 %v4921_v20  ;;  %2035 = vmatpush.msrb.mxu3 %v1548_v55  ;;  %v1012_v1 = vld [vmem:[#allocation4 + $0xa8] sm:$0xff] }
 0x266   :  { %2126 = vmatpush.msra.mxu2 %v1155_v4  ;;  %2183 = vmatpush.msra.mxu0 %v1032_v29  ;;  %v1544_v4 = vld [vmem:[#allocation4 + $0xd18] sm:$0xff]  ;;  %v1000_v55 = vld [vmem:[#allocation4 + $0x48] sm:$0xff] }
 0x267   :  { %2212 = vmatpush.msra.mxu1 %v1096_v49  ;;  %1956 = vmatmul.f32.gmra.mxu0 %v4887_v50  ;;  %v1080_v50 = vld [vmem:[#allocation4 + $0x2c8] sm:$0xff] }
 0x268   :  { %2127 = vmatpush.msra.mxu2 %v1151_v58  ;;  %2184 = vmatpush.msra.mxu0 %v1028_v8  ;;  %v1131_v58 = vld [vmem:[#allocation4 + $0x460] sm:$0xff]  ;;  %v1008_v8 = vld [vmem:[#allocation4 + $0x88] sm:$0xff] }
 0x269   :  { %2213 = vmatpush.msra.mxu1 %v1092_v15  ;;  %v1072_v15 = vld [vmem:[#allocation4 + $0x288] sm:$0xff]  ;;  %2036 = vmatpush.msrb.mxu3 %v1544_v4 }
 0x26a   :  { %1985 = vmatmul.f32.gmra.mxu1 %v4889_v43  ;;  %2128 = vmatpush.msra.mxu2 %v1147_v32  ;;  %v1076_v43 = vld [vmem:[#allocation4 + $0x2a8] sm:$0xff]  ;;  %v1211_v32 = vld [vmem:[#allocation4 + $0x6e0] sm:$0xff] }
 0x26b   :  { %2185 = vmatpush.msra.mxu0 %v1024_v23  ;;  %2214 = vmatpush.msra.mxu1 %v1088_v28  ;;  %v1004_v23 = vld [vmem:[#allocation4 + $0x68] sm:$0xff] }
 0x26c   :  { %2129 = vmatpush.msra.mxu2 %v1143_v48  ;;  %3999 = vmatmul.msk.f32.gmra.mxu3 %vm1573_vm3, %v4932_v33  ;;  %v1068_v28 = vld [vmem:[#allocation4 + $0x268] sm:$0xff]  ;;  %v1123_v48 = vld [vmem:[#allocation4 + $0x420] sm:$0xff] }
 0x26d   :  { %2186 = vmatpush.msra.mxu0 %v1020_v31  ;;  %2215 = vmatpush.msra.mxu1 %v1084_v27  ;;  %v1119_v31 = vld [vmem:[#allocation4 + $0x400] sm:$0xff]  ;;  %v996_v27 = vld [vmem:[#allocation4 + $0x28] sm:$0xff] }
 0x26e   :  { %1901 = vmatmul.f32.gmra.mxu2 %v4930_v6  ;;  %v4977_v29 = vpop.f32.mrf.mxu0  ;;  %v4979_v49 = vpop.f32.mrf.mxu1  ;;  %2157 = vmatpush.msra.mxu3 %v1211_v32  ;;  %v1172_v4 = vld [vmem:[#allocation4 + $0x5a8] sm:$0xff] }
 0x26f   :  { %2130 = vmatpush.msra.mxu2 %v1139_v44  ;;  %2187 = vmatpush.msra.mxu0 %v1016_v35  ;;  %v1060_v35 = vld [vmem:[#allocation4 + $0x228] sm:$0xff] }
 0x270   :  { %2216 = vmatpush.msra.mxu1 %v1080_v50  ;;  %1959 = vmatmul.f32.gmra.mxu0 %v4897_v25  ;;  %v1064_v25 = vld [vmem:[#allocation4 + $0x248] sm:$0xff] }
 0x271   :  { %2131 = vmatpush.msra.mxu2 %v1135_v54  ;;  %2188 = vmatpush.msra.mxu0 %v1012_v1  ;;  %v1180_v50 = vld [vmem:[#allocation4 + $0x5e8] sm:$0xff] }
 0x272   :  { %2217 = vmatpush.msra.mxu1 %v1076_v43  ;;  %v992_v54 = vld [vmem:[#allocation4 + $0x8] sm:$0xff]  ;;  %v1117_v43 = vld [vmem:[#allocation4 + $0x3f0] sm:$0xff] }
 0x273   :  { %1988 = vmatmul.f32.gmra.mxu1 %v4899_v45  ;;  %2132 = vmatpush.msra.mxu2 %v1131_v58  ;;  %v1176_v1 = vld [vmem:[#allocation4 + $0x5c8] sm:$0xff]  ;;  %v1049_v58 = vld [vmem:[#allocation4 + $0x1d0] sm:$0xff] }
 0x274   :  { %2189 = vmatpush.msra.mxu0 %v1008_v8  ;;  %2218 = vmatpush.msra.mxu1 %v1072_v15  ;;  %v1113_v8 = vld [vmem:[#allocation4 + $0x3d0] sm:$0xff]  ;;  %v1168_v15 = vld [vmem:[#allocation4 + $0x588] sm:$0xff] }
 0x275   :  { %2133 = vmatpush.msra.mxu2 %v1127_v52  ;;  %4000 = vmatmul.msk.f32.vlgmr.msrb.gmra.mxu3 %vm1573_vm3, %v4905_v47  ;;  %v1053_v47 = vld [vmem:[#allocation4 + $0x1f0] sm:$0xff] }
 0x276   :  { %2190 = vmatpush.msra.mxu0 %v1004_v23  ;;  %2219 = vmatpush.msra.mxu1 %v1068_v28  ;;  %v4986_v45 = vpop.f32.mrf.mxu0  ;;  %v4988_v44 = vpop.f32.mrf.mxu1  ;;  %v1045_v52 = vld [vmem:[#allocation4 + $0x1b0] sm:$0xff]  ;;  %v1207_v28 = vld [vmem:[#allocation4 + $0x6c0] sm:$0xff] }
 0x277   :  { %2008 = vmatmul.f32.vlgmr.msrb.gmra.mxu2 %v4903_v5  ;;  %v1056_v5 = vld [vmem:[#allocation4 + $0x208] sm:$0xff]  ;;  %2158 = vmatpush.msra.mxu3 %v1207_v28  ;;  %v1089_v28 = vld [vmem:[#allocation4 + $0x310] sm:$0xff] }
 0x278   :  { %2134 = vmatpush.msra.mxu2 %v1123_v48  ;;  %2191 = vmatpush.msra.mxu0 %v1000_v55  ;;  %v1109_v48 = vld [vmem:[#allocation4 + $0x3b0] sm:$0xff]  ;;  %v1164_v55 = vld [vmem:[#allocation4 + $0x568] sm:$0xff] }
 0x279   :  { %2220 = vmatpush.msra.mxu1 %v1064_v25  ;;  %2078 = vmatmul.f32.vlgmr.msrb.gmra.mxu0 %v4847_v63  ;;  %v1041_v25 = vld [vmem:[#allocation4 + $0x190] sm:$0xff] }
 0x27a   :  { %2135 = vmatpush.msra.mxu2 %v1119_v31  ;;  %2192 = vmatpush.msra.mxu0 %v996_v27  ;;  %v1105_v31 = vld [vmem:[#allocation4 + $0x390] sm:$0xff]  ;;  %v1203_v27 = vld [vmem:[#allocation4 + $0x6a0] sm:$0xff] }
 0x27b   :  { %2221 = vmatpush.msra.mxu1 %v1060_v35  ;;  %v1037_v35 = vld [vmem:[#allocation4 + $0x170] sm:$0xff]  ;;  %2159 = vmatpush.msra.mxu3 %v1203_v27 }
 0x27c   :  { %2236 = vmatpush.msrb.mxu2 %v1180_v50  ;;  %2107 = vmatmul.f32.vlgmr.msrb.gmra.mxu1 %v4849_v30  ;;  %v1101_v50 = vld [vmem:[#allocation4 + $0x370] sm:$0xff] }
 0x27d   :  { %2193 = vmatpush.msra.mxu0 %v992_v54  ;;  %2222 = vmatpush.msra.mxu1 %v1056_v5  ;;  %v1033_v54 = vld [vmem:[#allocation4 + $0x150] sm:$0xff] }
 0x27e   :  { %2237 = vmatpush.msrb.mxu2 %v1176_v1  ;;  %4001 = vmatmul.msk.f32.gmra.mxu3 %vm1573_vm3, %v4914_v2  ;;  %v4994_v32 = vpop.f32.mrf.mxu0  ;;  %v4996_v23 = vpop.f32.mrf.mxu1  ;;  %v1160_v2 = vld [vmem:[#allocation4 + $0x548] sm:$0xff]  ;;  %v1097_v5 = vld [vmem:[#allocation4 + $0x350] sm:$0xff] }
 0x27f   :  { %2294 = vmatpush.msrb.mxu0 %v1053_v47  ;;  %2323 = vmatpush.msrb.mxu1 %v1117_v43  ;;  %v1152_v1 = vld [vmem:[#allocation4 + $0x508] sm:$0xff] }
 0x280   :  { %2238 = vmatpush.msrb.mxu2 %v1172_v4  ;;  %v1029_v4 = vld [vmem:[#allocation4 + $0x130] sm:$0xff] }
 0x281   :  { %2011 = vmatmul.f32.gmra.mxu2 %v4912_v19  ;;  %2295 = vmatpush.msrb.mxu0 %v1049_v58  ;;  %v1156_v19 = vld [vmem:[#allocation4 + $0x528] sm:$0xff]  ;;  %v1199_v58 = vld [vmem:[#allocation4 + $0x680] sm:$0xff] }
 0x282   :  { %2324 = vmatpush.msrb.mxu1 %v1113_v8  ;;  %2239 = vmatpush.msrb.mxu2 %v1168_v15  ;;  %v1093_v8 = vld [vmem:[#allocation4 + $0x330] sm:$0xff]  ;;  %v1148_v15 = vld [vmem:[#allocation4 + $0x4e8] sm:$0xff] }
 0x283   :  { %2296 = vmatpush.msrb.mxu0 %v1045_v52  ;;  %v1025_v52 = vld [vmem:[#allocation4 + $0x110] sm:$0xff]  ;;  %2160 = vmatpush.msra.mxu3 %v1199_v58  ;;  %v1132_v58 = vld [vmem:[#allocation4 + $0x468] sm:$0xff] }
 0x284   :  { %2325 = vmatpush.msrb.mxu1 %v1109_v48  ;;  %2240 = vmatpush.msrb.mxu2 %v1164_v55  ;;  %v1144_v48 = vld [vmem:[#allocation4 + $0x4c8] sm:$0xff]  ;;  %v1195_v55 = vld [vmem:[#allocation4 + $0x660] sm:$0xff] }
 0x285   :  { %2081 = vmatmul.f32.gmra.mxu0 %v4851_v9  ;;  %2110 = vmatmul.f32.gmra.mxu1 %v4853_v14 }
 0x286   :  { %2297 = vmatpush.msrb.mxu0 %v1041_v25  ;;  %2326 = vmatpush.msrb.mxu1 %v1105_v31  ;;  %v5001_v47 = vpop.f32.mrf.mxu0  ;;  %v5003_v43 = vpop.f32.mrf.mxu1  ;;  %v1085_v25 = vld [vmem:[#allocation4 + $0x2f0] sm:$0xff] }
 0x287   :  { %2241 = vmatpush.msrb.mxu2 %v1160_v2  ;;  %4002 = vmatmul.msk.f32.gmra.mxu3 %vm1573_vm3, %v4923_v59  ;;  %v1021_v59 = vld [vmem:[#allocation4 + $0xf0] sm:$0xff] }
 0x288   :  { %2298 = vmatpush.msrb.mxu0 %v1037_v35  ;;  %2327 = vmatpush.msrb.mxu1 %v1101_v50  ;;  %v1017_v31 = vld [vmem:[#allocation4 + $0xd0] sm:$0xff]  ;;  %v1136_v50 = vld [vmem:[#allocation4 + $0x488] sm:$0xff] }
 0x289   :  { %2242 = vmatpush.msrb.mxu2 %v1156_v19  ;;  %2161 = vmatpush.msra.mxu3 %v1195_v55  ;;  %v1081_v35 = vld [vmem:[#allocation4 + $0x2d0] sm:$0xff]  ;;  %v1124_v55 = vld [vmem:[#allocation4 + $0x428] sm:$0xff] }
 0x28a   :  { %2014 = vmatmul.f32.gmra.mxu2 %v4921_v20  ;;  %2299 = vmatpush.msrb.mxu0 %v1033_v54  ;;  %v1140_v20 = vld [vmem:[#allocation4 + $0x4a8] sm:$0xff]  ;;  %v1013_v19 = vld [vmem:[#allocation4 + $0xb0] sm:$0xff]  ;;  %v1191_v54 = vld [vmem:[#allocation4 + $0x640] sm:$0xff] }
 0x28b   :  { %2328 = vmatpush.msrb.mxu1 %v1097_v5  ;;  %2243 = vmatpush.msrb.mxu2 %v1152_v1 }
 0x28c   :  { %2300 = vmatpush.msrb.mxu0 %v1029_v4  ;;  %v1077_v4 = vld [vmem:[#allocation4 + $0x2b0] sm:$0xff]  ;;  %2162 = vmatpush.msra.mxu3 %v1191_v54  ;;  %v1212_v54 = vld [vmem:[#allocation4 + $0x6e8] sm:$0xff] }
 0x28d   :  { %2329 = vmatpush.msrb.mxu1 %v1093_v8  ;;  %2244 = vmatpush.msrb.mxu2 %v1148_v15  ;;  %v1009_v8 = vld [vmem:[#allocation4 + $0x90] sm:$0xff] }
 0x28e   :  { %2084 = vmatmul.f32.gmra.mxu0 %v4855_v16  ;;  %2113 = vmatmul.f32.gmra.mxu1 %v4857_v42  ;;  %v5010_v2 = vpop.f32.mrf.mxu0  ;;  %v5012_v27 = vpop.f32.mrf.mxu1  ;;  %v1073_v15 = vld [vmem:[#allocation4 + $0x290] sm:$0xff] }
 0x28f   :  { %2301 = vmatpush.msrb.mxu0 %v1025_v52  ;;  %2330 = vmatpush.msrb.mxu1 %v1089_v28  ;;  %5768 = vst [vmem:[#allocation19_spill] sm:$0xff] %v5010_v2  ;;  %v1128_v52 = vld [vmem:[#allocation4 + $0x448] sm:$0xff]  ;;  %v1005_v28 = vld [vmem:[#allocation4 + $0x70] sm:$0xff]  ;;  %v1106_v2 = vld [vmem:[#allocation4 + $0x398] sm:$0xff] }
 0x290   :  { %2245 = vmatpush.msrb.mxu2 %v1144_v48  ;;  %5769 = vst [vmem:[#allocation27_spill] sm:$0xff] %v5012_v27  ;;  %4003 = vmatmul.msk.f32.gmra.mxu3 %vm1573_vm3, %v4932_v33  ;;  %v5016_v5 = vpop.f32.mrf.mxu2  ;;  %v5018_v1 = vpop.f32.mrf.mxu3  ;;  %v1187_v33 = vld [vmem:[#allocation4 + $0x620] sm:$0xff]  ;;  %v1069_v48 = vld [vmem:[#allocation4 + $0x270] sm:$0xff]  ;;  %v1046_v27 = vld [vmem:[#allocation4 + $0x1b8] sm:$0xff] }
 0x291   :  { %2302 = vmatpush.msrb.mxu0 %v1021_v59  ;;  %2331 = vmatpush.msrb.mxu1 %v1085_v25  ;;  %5770 = vst [vmem:[#allocation18_spill] sm:$0xff] %v5018_v1  ;;  %v1066_v1 = vld [vmem:[#allocation4 + $0x258] sm:$0xff] }
 0x292   :  { %2246 = vmatpush.msrb.mxu2 %v1140_v20  ;;  %2163 = vmatpush.msra.mxu3 %v1187_v33  ;;  %v1001_v20 = vld [vmem:[#allocation4 + $0x50] sm:$0xff] }
 0x293   :  { %2017 = vmatmul.f32.gmra.mxu2 %v4930_v6  ;;  %2303 = vmatpush.msrb.mxu0 %v1017_v31  ;;  %v1183_v6 = vld [vmem:[#allocation4 + $0x600] sm:$0xff]  ;;  %v1065_v31 = vld [vmem:[#allocation4 + $0x250] sm:$0xff] }
 0x294   :  { %2332 = vmatpush.msrb.mxu1 %v1081_v35  ;;  %2247 = vmatpush.msrb.mxu2 %v1136_v50  ;;  %v1057_v33 = vld [vmem:[#allocation4 + $0x210] sm:$0xff] }
 0x295   :  { %2304 = vmatpush.msrb.mxu0 %v1013_v19  ;;  %2164 = vmatpush.msra.mxu3 %v1183_v6  ;;  %v1120_v19 = vld [vmem:[#allocation4 + $0x408] sm:$0xff] }
 0x296   :  { %2333 = vmatpush.msrb.mxu1 %v1077_v4  ;;  %2248 = vmatpush.msrb.mxu2 %v1132_v58  ;;  %v5023_v59 = vpop.f32.mrf.mxu0  ;;  %v5025_v25 = vpop.f32.mrf.mxu1  ;;  %v997_v4 = vld [vmem:[#allocation4 + $0x30] sm:$0xff] }
 0x297   :  { %2087 = vmatmul.f32.gmra.mxu0 %v4859_v12  ;;  %2116 = vmatmul.f32.gmra.mxu1 %v4861_v24  ;;  %5771 = vst [vmem:[#allocation26_spill] sm:$0xff] %v5023_v59  ;;  %v1061_v58 = vld [vmem:[#allocation4 + $0x230] sm:$0xff] }
 0x298   :  { %2305 = vmatpush.msrb.mxu0 %v1009_v8  ;;  %2334 = vmatpush.msrb.mxu1 %v1073_v15  ;;  %5772 = vst [vmem:[#allocation37_spill] sm:$0xff] %v5025_v25  ;;  %v5027_v35 = vpop.f32.mrf.mxu2  ;;  %v5029_v50 = vpop.f32.mrf.mxu3  ;;  %v1181_v8 = vld [vmem:[#allocation4 + $0x5f0] sm:$0xff] }
 0x299   :  { %2249 = vmatpush.msrb.mxu2 %v1128_v52  ;;  %4004 = vmatmul.msk.f32.vlgmr.msra.gmra.mxu3 %vm1573_vm3, %v4865_v7  ;;  %v993_v15 = vld [vmem:[#allocation4 + $0x10] sm:$0xff] }
 0x29a   :  { %2306 = vmatpush.msrb.mxu0 %v1005_v28  ;;  %2335 = vmatpush.msrb.mxu1 %v1069_v48  ;;  %v1177_v52 = vld [vmem:[#allocation4 + $0x5d0] sm:$0xff]  ;;  %v1054_v28 = vld [vmem:[#allocation4 + $0x1f8] sm:$0xff] }
 0x29b   :  { %2250 = vmatpush.msrb.mxu2 %v1124_v55  ;;  %2273 = vmatpush.msrb.mxu3 %v1212_v54  ;;  %v1118_v48 = vld [vmem:[#allocation4 + $0x3f8] sm:$0xff]  ;;  %v1157_v59 = vld [vmem:[#allocation4 + $0x530] sm:$0xff] }
 0x29c   :  { %2136 = vmatmul.f32.vlgmr.msra.gmra.mxu2 %v4863_v62  ;;  %2307 = vmatpush.msrb.mxu0 %v1001_v20  ;;  %v1173_v20 = vld [vmem:[#allocation4 + $0x5b0] sm:$0xff] }
 0x29d   :  { %2336 = vmatpush.msrb.mxu1 %v1065_v31  ;;  %2251 = vmatpush.msrb.mxu2 %v1120_v19  ;;  %v1050_v31 = vld [vmem:[#allocation4 + $0x1d8] sm:$0xff] }
 0x29e   :  { %2308 = vmatpush.msrb.mxu0 %v997_v4  ;;  %v5035_v6 = vpop.f32.mrf.mxu0  ;;  %v5037_v55 = vpop.f32.mrf.mxu1  ;;  %v1114_v19 = vld [vmem:[#allocation4 + $0x3d8] sm:$0xff] }
 0x29f   :  { %2337 = vmatpush.msrb.mxu1 %v1061_v58  ;;  %2352 = vmatpush.msra.mxu2 %v1181_v8  ;;  %5773 = vst [vmem:[#allocation38_spill] sm:$0xff] %v5035_v6  ;;  %v1208_v58 = vld [vmem:[#allocation4 + $0x6c8] sm:$0xff]  ;;  %v1169_v8 = vld [vmem:[#allocation4 + $0x590] sm:$0xff] }
 0x2a0   :  { %2194 = vmatmul.f32.vlgmr.msra.gmra.mxu0 %v4847_v63  ;;  %5774 = vst [vmem:[#allocation17_spill] sm:$0xff] %v5037_v55  ;;  %2223 = vmatmul.f32.vlgmr.msra.gmra.mxu1 %v4849_v30  ;;  %v5040_v54 = vpop.f32.mrf.mxu2  ;;  %v5042_v4 = vpop.f32.mrf.mxu3 }
 0x2a1   :  { %2309 = vmatpush.msrb.mxu0 %v993_v15  ;;  %2338 = vmatpush.msrb.mxu1 %v1057_v33  ;;  %v1110_v15 = vld [vmem:[#allocation4 + $0x3b8] sm:$0xff]  ;;  %v1165_v33 = vld [vmem:[#allocation4 + $0x570] sm:$0xff] }
 0x2a2   :  { %2353 = vmatpush.msra.mxu2 %v1177_v52  ;;  %4005 = vmatmul.msk.f32.gmra.mxu3 %vm1573_vm3, %v4875_v51  ;;  %v1042_v52 = vld [vmem:[#allocation4 + $0x198] sm:$0xff] }
 0x2a3   :  { %2410 = vmatpush.msra.mxu0 %v1054_v28  ;;  %2439 = vmatpush.msra.mxu1 %v1118_v48  ;;  %v1204_v28 = vld [vmem:[#allocation4 + $0x6a8] sm:$0xff]  ;;  %v1161_v48 = vld [vmem:[#allocation4 + $0x550] sm:$0xff] }
 0x2a4   :  { %2354 = vmatpush.msra.mxu2 %v1173_v20  ;;  %2274 = vmatpush.msrb.mxu3 %v1208_v58 }
 0x2a5   :  { %2411 = vmatpush.msra.mxu0 %v1050_v31  ;;  %2440 = vmatpush.msra.mxu1 %v1114_v19  ;;  %v1038_v31 = vld [vmem:[#allocation4 + $0x178] sm:$0xff] }
 0x2a6   :  { %2139 = vmatmul.f32.gmra.mxu2 %v4873_v60  ;;  %v5048_v20 = vpop.f32.mrf.mxu0  ;;  %v5050_v25 = vpop.f32.mrf.mxu1  ;;  %v1102_v19 = vld [vmem:[#allocation4 + $0x378] sm:$0xff]  ;;  %2275 = vmatpush.msrb.mxu3 %v1204_v28  ;;  %v1149_v28 = vld [vmem:[#allocation4 + $0x4f0] sm:$0xff] }
 0x2a7   :  { %2355 = vmatpush.msra.mxu2 %v1169_v8  ;;  %2412 = vmatpush.msra.mxu0 %v1046_v27  ;;  %5775 = vst [vmem:[#allocation25_spill] sm:$0xff] %v5048_v20  ;;  %v1034_v8 = vld [vmem:[#allocation4 + $0x158] sm:$0xff]  ;;  %v1200_v20 = vld [vmem:[#allocation4 + $0x688] sm:$0xff] }
 0x2a8   :  { %2441 = vmatpush.msra.mxu1 %v1110_v15  ;;  %2197 = vmatmul.f32.gmra.mxu0 %v4851_v9  ;;  %5776 = vst [vmem:[#allocation35_spill] sm:$0xff] %v5050_v25  ;;  %v5052_v58 = vpop.f32.mrf.mxu2  ;;  %v5054_v27 = vpop.f32.mrf.mxu3  ;;  %v1098_v15 = vld [vmem:[#allocation4 + $0x358] sm:$0xff] }
 0x2a9   :  { %2356 = vmatpush.msra.mxu2 %v1165_v33  ;;  %2413 = vmatpush.msra.mxu0 %v1042_v52  ;;  %v1153_v33 = vld [vmem:[#allocation4 + $0x510] sm:$0xff]  ;;  %v1094_v52 = vld [vmem:[#allocation4 + $0x338] sm:$0xff] }
 0x2aa   :  { %2442 = vmatpush.msra.mxu1 %v1106_v2  ;;  %4006 = vmatmul.msk.f32.gmra.mxu3 %vm1573_vm3, %v4885_v0  ;;  %v1030_v2 = vld [vmem:[#allocation4 + $0x138] sm:$0xff] }
 0x2ab   :  { %2226 = vmatmul.f32.gmra.mxu1 %v4853_v14  ;;  %2357 = vmatpush.msra.mxu2 %v1161_v48  ;;  %v1026_v25 = vld [vmem:[#allocation4 + $0x118] sm:$0xff] }
 0x2ac   :  { %2414 = vmatpush.msra.mxu0 %v1038_v31  ;;  %2443 = vmatpush.msra.mxu1 %v1102_v19  ;;  %v1090_v48 = vld [vmem:[#allocation4 + $0x318] sm:$0xff]  ;;  %v1196_v31 = vld [vmem:[#allocation4 + $0x668] sm:$0xff] }
 0x2ad   :  { %2358 = vmatpush.msra.mxu2 %v1157_v59  ;;  %2276 = vmatpush.msrb.mxu3 %v1200_v20  ;;  %v1145_v59 = vld [vmem:[#allocation4 + $0x4d0] sm:$0xff] }
 0x2ae   :  { %2415 = vmatpush.msra.mxu0 %v1034_v8  ;;  %2444 = vmatpush.msra.mxu1 %v1098_v15  ;;  %v1022_v8 = vld [vmem:[#allocation4 + $0xf8] sm:$0xff]  ;;  %v1141_v20 = vld [vmem:[#allocation4 + $0x4b0] sm:$0xff] }
 0x2af   :  { %2142 = vmatmul.f32.gmra.mxu2 %v4883_v38  ;;  %v5061_v19 = vpop.f32.mrf.mxu0  ;;  %v5063_v55 = vpop.f32.mrf.mxu1  ;;  %v1086_v15 = vld [vmem:[#allocation4 + $0x2f8] sm:$0xff]  ;;  %2277 = vmatpush.msrb.mxu3 %v1196_v31  ;;  %v1133_v31 = vld [vmem:[#allocation4 + $0x470] sm:$0xff] }
 0x2b0   :  { %2359 = vmatpush.msra.mxu2 %v1153_v33  ;;  %2416 = vmatpush.msra.mxu0 %v1030_v2  ;;  %5777 = vst [vmem:[#allocation36_spill] sm:$0xff] %v5061_v19  ;;  %v5065_v6 = vpop.f32.mrf.mxu2  ;;  %v1018_v2 = vld [vmem:[#allocation4 + $0xd8] sm:$0xff]  ;;  %v1192_v19 = vld [vmem:[#allocation4 + $0x648] sm:$0xff] }
 0x2b1   :  { %2445 = vmatpush.msra.mxu1 %v1094_v52  ;;  %2200 = vmatmul.f32.gmra.mxu0 %v4855_v16  ;;  %5778 = vst [vmem:[#allocation33_spill] sm:$0xff] %v5063_v55  ;;  %v5067_v33 = vpop.f32.mrf.mxu3  ;;  %v1082_v52 = vld [vmem:[#allocation4 + $0x2d8] sm:$0xff] }
 0x2b2   :  { %2360 = vmatpush.msra.mxu2 %v1149_v28  ;;  %2417 = vmatpush.msra.mxu0 %v1026_v25  ;;  %5779 = vst [vmem:[#allocation34_spill] sm:$0xff] %v5065_v6  ;;  %v1137_v25 = vld [vmem:[#allocation4 + $0x490] sm:$0xff]  ;;  %v1014_v28 = vld [vmem:[#allocation4 + $0xb8] sm:$0xff] }
 0x2b3   :  { %2446 = vmatpush.msra.mxu1 %v1090_v48  ;;  %5780 = vst [vmem:[#allocation39_spill] sm:$0xff] %v5067_v33  ;;  %4007 = vmatmul.msk.f32.gmra.mxu3 %vm1573_vm3, %v4895_v10  ;;  %v1078_v48 = vld [vmem:[#allocation4 + $0x2b8] sm:$0xff] }
 0x2b4   :  { %2229 = vmatmul.f32.gmra.mxu1 %v4857_v42  ;;  %2361 = vmatpush.msra.mxu2 %v1145_v59  ;;  %v1010_v55 = vld [vmem:[#allocation4 + $0x98] sm:$0xff] }
 0x2b5   :  { %2418 = vmatpush.msra.mxu0 %v1022_v8  ;;  %2447 = vmatpush.msra.mxu1 %v1086_v15  ;;  %v1074_v59 = vld [vmem:[#allocation4 + $0x298] sm:$0xff]  ;;  %v1188_v8 = vld [vmem:[#allocation4 + $0x628] sm:$0xff]  ;;  %v1129_v15 = vld [vmem:[#allocation4 + $0x450] sm:$0xff] }
 0x2b6   :  { %2362 = vmatpush.msra.mxu2 %v1141_v20  ;;  %2278 = vmatpush.msrb.mxu3 %v1192_v19  ;;  %v1125_v19 = vld [vmem:[#allocation4 + $0x430] sm:$0xff] }
 0x2b7   :  { %2419 = vmatpush.msra.mxu0 %v1018_v2  ;;  %2448 = vmatpush.msra.mxu1 %v1082_v52  ;;  %v1006_v2 = vld [vmem:[#allocation4 + $0x78] sm:$0xff] }
 0x2b8   :  { %2145 = vmatmul.f32.gmra.mxu2 %v4893_v53  ;;  %v5074_v20 = vpop.f32.mrf.mxu0  ;;  %v1070_v52 = vld [vmem:[#allocation4 + $0x278] sm:$0xff]  ;;  %2279 = vmatpush.msrb.mxu3 %v1188_v8  ;;  %v1213_v8 = vld [vmem:[#allocation4 + $0x6f0] sm:$0xff] }
 0x2b9   :  { %2363 = vmatpush.msra.mxu2 %v1137_v25  ;;  %2420 = vmatpush.msra.mxu0 %v1014_v28  ;;  %5781 = vst [vmem:[#allocation40_spill] sm:$0xff] %v5074_v20  ;;  %v5076_v33 = vpop.f32.mrf.mxu1  ;;  %v5078_v6 = vpop.f32.mrf.mxu2  ;;  %v1184_v25 = vld [vmem:[#allocation4 + $0x608] sm:$0xff]  ;;  %v994_v20 = vld [vmem:[#allocation4 + $0x18] sm:$0xff] }
 0x2ba   :  { %2449 = vmatpush.msra.mxu1 %v1078_v48  ;;  %2203 = vmatmul.f32.gmra.mxu0 %v4859_v12  ;;  %5782 = vst [vmem:[#allocation41_spill] sm:$0xff] %v5076_v33  ;;  %v5080_v28 = vpop.f32.mrf.mxu3  ;;  %v1002_v48 = vld [vmem:[#allocation4 + $0x58] sm:$0xff] }
 0x2bb   :  { %2364 = vmatpush.msra.mxu2 %v1133_v31  ;;  %2421 = vmatpush.msra.mxu0 %v1010_v55  ;;  %5783 = vst [vmem:[#allocation42_spill] sm:$0xff] %v5080_v28  ;;  %v1121_v55 = vld [vmem:[#allocation4 + $0x410] sm:$0xff]  ;;  %v998_v31 = vld [vmem:[#allocation4 + $0x38] sm:$0xff] }
 0x2bc   :  { %2450 = vmatpush.msra.mxu1 %v1074_v59  ;;  %2280 = vmatpush.msrb.mxu3 %v1184_v25  ;;  %v1062_v33 = vld [vmem:[#allocation4 + $0x238] sm:$0xff] }
 0x2bd   :  { %2232 = vmatmul.f32.gmra.mxu1 %v4861_v24  ;;  %2365 = vmatpush.msra.mxu2 %v1129_v15  ;;  %v1182_v59 = vld [vmem:[#allocation4 + $0x5f8] sm:$0xff] }
 0x2be   :  { %2422 = vmatpush.msra.mxu0 %v1006_v2  ;;  %2451 = vmatpush.msra.mxu1 %v1070_v52  ;;  %v1058_v15 = vld [vmem:[#allocation4 + $0x218] sm:$0xff] }
 0x2bf   :  { %2366 = vmatpush.msra.mxu2 %v1125_v19  ;;  %4008 = vmatmul.msk.f32.vlgmr.msrb.gmra.mxu3 %vm1573_vm3, %v4865_v7  ;;  %v1178_v2 = vld [vmem:[#allocation4 + $0x5d8] sm:$0xff] }
 0x2c0   :  { %2423 = vmatpush.msra.mxu0 %v1002_v48  ;;  %2452 = vmatpush.msra.mxu1 %v1066_v1  ;;  %v1209_v1 = vld [vmem:[#allocation4 + $0x6d0] sm:$0xff]  ;;  %v1174_v48 = vld [vmem:[#allocation4 + $0x5b8] sm:$0xff] }
 0x2c1   :  { %2252 = vmatmul.f32.vlgmr.msrb.gmra.mxu2 %v4863_v62  ;;  %v5086_v52 = vpop.f32.mrf.mxu0  ;;  %v5088_v19 = vpop.f32.mrf.mxu1  ;;  %2389 = vmatpush.msra.mxu3 %v1213_v8 }
 0x2c2   :  { %2367 = vmatpush.msra.mxu2 %v1121_v55  ;;  %2424 = vmatpush.msra.mxu0 %v998_v31  ;;  %5784 = vst [vmem:[#allocation43_spill] sm:$0xff] %v5086_v52  ;;  %v5092_v28 = vpop.f32.mrf.mxu2  ;;  %v1170_v55 = vld [vmem:[#allocation4 + $0x598] sm:$0xff]  ;;  %v2785_v52 = vld [vmem:[#allocation4 + $0x11e8] sm:$0xff] }
 0x2c3   :  { %2453 = vmatpush.msra.mxu1 %v1062_v33  ;;  %5785 = vst [vmem:[#allocation44_spill] sm:$0xff] %v5088_v19  ;;  %v5090_v25 = vpop.f32.mrf.mxu3  ;;  %2310 = vmatmul.f32.vlgmr.msrb.gmra.mxu0 %v4847_v63  ;;  %v1205_v33 = vld [vmem:[#allocation4 + $0x6b0] sm:$0xff]  ;;  %v1166_v31 = vld [vmem:[#allocation4 + $0x578] sm:$0xff] }
 0x2c4   :  { %2468 = vmatpush.msrb.mxu2 %v1182_v59  ;;  %2425 = vmatpush.msra.mxu0 %v994_v20  ;;  %v1201_v20 = vld [vmem:[#allocation4 + $0x690] sm:$0xff] }
 0x2c5   :  { %2454 = vmatpush.msra.mxu1 %v1058_v15  ;;  %2390 = vmatpush.msra.mxu3 %v1209_v1  ;;  %v1197_v59 = vld [vmem:[#allocation4 + $0x670] sm:$0xff]  ;;  %v1214_v1 = vld [vmem:[#allocation4 + $0x6f8] sm:$0xff] }
 0x2c6   :  { %2469 = vmatpush.msrb.mxu2 %v1178_v2  ;;  %2339 = vmatmul.f32.vlgmr.msrb.gmra.mxu1 %v4849_v30  ;;  %v1189_v2 = vld [vmem:[#allocation4 + $0x630] sm:$0xff] }
 0x2c7   :  { %2552 = vmatpush.msrb.mxu0 %v4641_v11  ;;  %2581 = vmatpush.msrb.mxu1 %v4643_v37  ;;  %v1162_v11 = vld [vmem:[#allocation4 + $0x558] sm:$0xff] }
 0x2c8   :  { %2470 = vmatpush.msrb.mxu2 %v1174_v48  ;;  %2391 = vmatpush.msra.mxu3 %v1205_v33 }
 0x2c9   :  { %2553 = vmatpush.msrb.mxu0 %v4655_v34  ;;  %2582 = vmatpush.msrb.mxu1 %v4657_v40  ;;  %v1193_v40 = vld [vmem:[#allocation4 + $0x650] sm:$0xff] }
 0x2ca   :  { %2471 = vmatpush.msrb.mxu2 %v1170_v55  ;;  %4009 = vmatmul.msk.f32.gmra.mxu3 %vm1573_vm3, %v4875_v51  ;;  %v5104_v37 = vpop.f32.mrf.mxu0  ;;  %v5106_v8 = vpop.f32.mrf.mxu1  ;;  %v1142_v55 = vld [vmem:[#allocation4 + $0x4b8] sm:$0xff] }
 0x2cb   :  { %2255 = vmatmul.f32.gmra.mxu2 %v4873_v60  ;;  %2392 = vmatpush.msra.mxu3 %v1201_v20  ;;  %5786 = vst [vmem:[#allocation45_spill] sm:$0xff] %v5104_v37  ;;  %v5109_v34 = vpop.f32.mrf.mxu3  ;;  %v1206_v20 = vld [vmem:[#allocation4 + $0x6b8] sm:$0xff]  ;;  %v2740_v37 = vld [vmem:[#allocation4 + $0x1080] sm:$0xff] }
 0x2cc   :  { %2554 = vmatpush.msrb.mxu0 %v4663_v56  ;;  %5787 = vst [vmem:[#allocation46_spill] sm:$0xff] %v5106_v8  ;;  %2583 = vmatpush.msrb.mxu1 %v4665_v61  ;;  %v5112_v15 = vpop.f32.mrf.mxu2  ;;  %v1158_v56 = vld [vmem:[#allocation4 + $0x538] sm:$0xff]  ;;  %v2676_v8 = vld [vmem:[#allocation4 + $0xe80] sm:$0xff] }
 0x2cd   :  { %2472 = vmatpush.msrb.mxu2 %v1166_v31  ;;  %5788 = vst [vmem:[#allocation47_spill] sm:$0xff] %v5109_v34  ;;  %2393 = vmatpush.msra.mxu3 %v1197_v59  ;;  %v1154_v61 = vld [vmem:[#allocation4 + $0x518] sm:$0xff] }
 0x2ce   :  { %2555 = vmatpush.msrb.mxu0 %v4669_v3  ;;  %2584 = vmatpush.msrb.mxu1 %v4671_v57  ;;  %v1185_v3 = vld [vmem:[#allocation4 + $0x610] sm:$0xff]  ;;  %v1150_v57 = vld [vmem:[#allocation4 + $0x4f8] sm:$0xff] }
 0x2cf   :  { %2473 = vmatpush.msrb.mxu2 %v1162_v11  ;;  %2313 = vmatmul.f32.gmra.mxu0 %v4851_v9  ;;  %v1138_v31 = vld [vmem:[#allocation4 + $0x498] sm:$0xff] }
 0x2d0   :  { %2342 = vmatmul.f32.gmra.mxu1 %v4853_v14  ;;  %2394 = vmatpush.msra.mxu3 %v1193_v40  ;;  %v1198_v59 = vld [vmem:[#allocation4 + $0x678] sm:$0xff] }
 0x2d1   :  { %2556 = vmatpush.msrb.mxu0 %v4675_v13  ;;  %2585 = vmatpush.msrb.mxu1 %v4677_v18  ;;  %v1146_v18 = vld [vmem:[#allocation4 + $0x4d8] sm:$0xff] }
 0x2d2   :  { %2474 = vmatpush.msrb.mxu2 %v1158_v56  ;;  %2395 = vmatpush.msra.mxu3 %v1189_v2  ;;  %v1130_v40 = vld [vmem:[#allocation4 + $0x458] sm:$0xff] }
 0x2d3   :  { %2557 = vmatpush.msrb.mxu0 %v4681_v22  ;;  %2586 = vmatpush.msrb.mxu1 %v4683_v46  ;;  %v5124_v48 = vpop.f32.mrf.mxu0  ;;  %v5126_v13 = vpop.f32.mrf.mxu1  ;;  %v1210_v22 = vld [vmem:[#allocation4 + $0x6d8] sm:$0xff] }
 0x2d4   :  { %2475 = vmatpush.msrb.mxu2 %v1154_v61  ;;  %4010 = vmatmul.msk.f32.gmra.mxu3 %vm1573_vm3, %v4885_v0  ;;  %5789 = vst [vmem:[#allocation48_spill] sm:$0xff] %v5124_v48  ;;  %v5132_v33 = vpop.f32.mrf.mxu3  ;;  %v1194_v56 = vld [vmem:[#allocation4 + $0x658] sm:$0xff] }
 0x2d5   :  { %2258 = vmatmul.f32.gmra.mxu2 %v4883_v38  ;;  %5790 = vst [vmem:[#allocation49_spill] sm:$0xff] %v5126_v13  ;;  %2396 = vmatpush.msra.mxu3 %v1185_v3  ;;  %v5130_v46 = vpop.f32.mrf.mxu2  ;;  %v1126_v61 = vld [vmem:[#allocation4 + $0x438] sm:$0xff] }
 0x2d6   :  { %2558 = vmatpush.msrb.mxu0 %v4687_v26  ;;  %2587 = vmatpush.msrb.mxu1 %v4689_v21  ;;  %5791 = vst [vmem:[#allocation50_spill] sm:$0xff] %v5130_v46  ;;  %v1202_v26 = vld [vmem:[#allocation4 + $0x698] sm:$0xff]  ;;  %v2708_v46 = vld [vmem:[#allocation4 + $0xf80] sm:$0xff] }
 0x2d7   :  { %2476 = vmatpush.msrb.mxu2 %v1150_v57  ;;  %5792 = vst [vmem:[#allocation51_spill] sm:$0xff] %v5132_v33  ;;  %2505 = vmatpush.msrb.mxu3 %v1214_v1  ;;  %v1134_v21 = vld [vmem:[#allocation4 + $0x478] sm:$0xff]  ;;  %v2780_v33 = vld [vmem:[#allocation4 + $0x11c0] sm:$0xff] }
 0x2d8   :  { %2316 = vmatmul.f32.gmra.mxu0 %v4855_v16  ;;  %2345 = vmatmul.f32.gmra.mxu1 %v4857_v42  ;;  %v1190_v57 = vld [vmem:[#allocation4 + $0x638] sm:$0xff] }
 0x2d9   :  { %2477 = vmatpush.msrb.mxu2 %v1146_v18  ;;  %2506 = vmatpush.msrb.mxu3 %v1210_v22  ;;  %v1122_v18 = vld [vmem:[#allocation4 + $0x418] sm:$0xff] }
 0x2da   :  { %v1186_v22 = vld [vmem:[#allocation4 + $0x618] sm:$0xff] }
 0x2db   :  { %2478 = vmatpush.msrb.mxu2 %v1142_v55  ;;  %2507 = vmatpush.msrb.mxu3 %v1206_v20  ;;  %v5138_v11 = vpop.f32.mrf.mxu0  ;;  %v2739_v34 = vld [vmem:[#allocation4 + $0x1078] sm:$0xff] }
 0x2dc   :  { %4011 = vmatmul.msk.f32.gmra.mxu3 %vm1573_vm3, %v4895_v10  ;;  %5793 = vst [vmem:[#allocation52_spill] sm:$0xff] %v5138_v11 }
 0x2dd   :  { %2479 = vmatpush.msrb.mxu2 %v1138_v31  ;;  %2508 = vmatpush.msrb.mxu3 %v1202_v26  ;;  %v5147_v1 = vpop.f32.mrf.mxu3 }
 0x2de   :  { %2261 = vmatmul.f32.gmra.mxu2 %v4893_v53  ;;  %v5141_v2 = vpop.f32.mrf.mxu1  ;;  %5796 = vst [vmem:[#allocation55_spill] sm:$0xff] %v5147_v1  ;;  %v2776_v1 = vld [vmem:[#allocation4 + $0x11a0] sm:$0xff] }
 0x2df   :  { %2480 = vmatpush.msrb.mxu2 %v1134_v21  ;;  %5794 = vst [vmem:[#allocation53_spill] sm:$0xff] %v5141_v2  ;;  %2509 = vmatpush.msrb.mxu3 %v1198_v59  ;;  %v5144_v3 = vpop.f32.mrf.mxu2  ;;  %v5801_v21 = vld [vmem:[#allocation22_spill] sm:$0xff] }
 0x2e0   :  { %2319 = vmatmul.f32.gmra.mxu0 %v4859_v12  ;;  %5795 = vst [vmem:[#allocation54_spill] sm:$0xff] %v5144_v3  ;;  %2348 = vmatmul.f32.gmra.mxu1 %v4861_v24  ;;  %v5802_v59 = vld [vmem:[#allocation30_spill] sm:$0xff] }
 0x2e1   :  { %2481 = vmatpush.msrb.mxu2 %v1130_v40  ;;  %2510 = vmatpush.msrb.mxu3 %v1194_v56  ;;  %v5809_v40 = vld [vmem:[#allocation28_spill] sm:$0xff] }
 0x2e3   :  { %2482 = vmatpush.msrb.mxu2 %v1126_v61  ;;  %2511 = vmatpush.msrb.mxu3 %v1190_v57 }
 0x2e4   :  { %4012 = vmatmul.msk.f32.vlgmr.msra.gmra.mxu3 %vm1573_vm3, %v4865_v7  ;;  %v5151_v55 = vpop.f32.mrf.mxu0 }
 0x2e5   :  { %2483 = vmatpush.msrb.mxu2 %v1122_v18  ;;  %5797 = vst [vmem:[#allocation56_spill] sm:$0xff] %v5151_v55  ;;  %2512 = vmatpush.msrb.mxu3 %v1186_v22  ;;  %v5813_v18 = vld [vmem:[#allocation21_spill] sm:$0xff]  ;;  %v2716_v55 = vld [vmem:[#allocation4 + $0xfc0] sm:$0xff] }
 0x2e6   :  { %2368 = vmatmul.f32.vlgmr.msra.gmra.mxu2 %v4863_v62  ;;  %v5163_v26 = vpop.f32.mrf.mxu3  ;;  %v5814_v22 = vld [vmem:[#allocation29_spill] sm:$0xff] }
 0x2e7   :  { %2610 = vmatpush.msra.mxu2 %v4743_v36  ;;  %2639 = vmatpush.msra.mxu3 %v4745_v39  ;;  %v5157_v20 = vpop.f32.mrf.mxu1  ;;  %5800 = vst [vmem:[#allocation59_spill] sm:$0xff] %v5163_v26  ;;  %v5803_v36 = vld [vmem:[#allocation23_spill] sm:$0xff] }
 0x2e8   :  { %2426 = vmatmul.f32.vlgmr.msra.gmra.mxu0 %v4847_v63  ;;  %5798 = vst [vmem:[#allocation57_spill] sm:$0xff] %v5157_v20  ;;  %v5161_v31 = vpop.f32.mrf.mxu2  ;;  %2455 = vmatmul.f32.vlgmr.msra.gmra.mxu1 %v4849_v30  ;;  %v5804_v39 = vld [vmem:[#allocation31_spill] sm:$0xff]  ;;  %v5807_v63 = vld [vmem:[#allocation32_spill] sm:$0xff]  ;;  %v2784_v20 = vld [vmem:[#allocation4 + $0x11e0] sm:$0xff] }
 0x2e9   :  { %2611 = vmatpush.msra.mxu2 %v4759_v41  ;;  %2640 = vmatpush.msra.mxu3 %v4761_v17  ;;  %5799 = vst [vmem:[#allocation58_spill] sm:$0xff] %v5161_v31  ;;  %v5806_v17 = vld [vmem:[#allocation24_spill] sm:$0xff] }
 0x2ea   :  { %v5808_v30 = vld [vmem:[#allocation20_spill] sm:$0xff]  ;;  %2925 = vmatpush.msra.mxu1 %v2784_v20  ;;  %v2704_v20 = vld [vmem:[#allocation4 + $0xf60] sm:$0xff] }
 0x2eb   :  { %2612 = vmatpush.msra.mxu2 %v5801_v21  ;;  %2641 = vmatpush.msra.mxu3 %v5802_v59 }
 0x2ec   :  { %4013 = vmatmul.msk.f32.gmra.mxu3 %vm1573_vm3, %v4875_v51  ;;  %2926 = vmatpush.msra.mxu1 %v2780_v33  ;;  %v2700_v33 = vld [vmem:[#allocation4 + $0xf40] sm:$0xff] }
 0x2ed   :  { %2613 = vmatpush.msra.mxu2 %v5803_v36  ;;  %2642 = vmatpush.msra.mxu3 %v5804_v39  ;;  %v5173_v41 = vpop.f32.mrf.mxu0 }
 0x2ee   :  { %2371 = vmatmul.f32.gmra.mxu2 %v4873_v60  ;;  %5805 = vst [vmem:[#allocation22_spill] sm:$0xff] %v5173_v41  ;;  %2927 = vmatpush.msra.mxu1 %v2776_v1  ;;  %v2692_v1 = vld [vmem:[#allocation4 + $0xf00] sm:$0xff] }
 0x2ef   :  { %2614 = vmatpush.msra.mxu2 %v5806_v17  ;;  %2643 = vmatpush.msra.mxu3 %v5807_v63  ;;  %v5185_v57 = vpop.f32.mrf.mxu3  ;;  %v2527_v17 = vld [vmem:[#allocation9 + $0x40] sm:$0xff] }
 0x2f0   :  { %2429 = vmatmul.f32.gmra.mxu0 %v4851_v9  ;;  %v5180_v56 = vpop.f32.mrf.mxu1  ;;  %2458 = vmatmul.f32.gmra.mxu1 %v4853_v14  ;;  %5812 = vst [vmem:[#allocation31_spill] sm:$0xff] %v5185_v57  ;;  %v2712_v57 = vld [vmem:[#allocation4 + $0xfa0] sm:$0xff] }
 0x2f1   :  { %2615 = vmatpush.msra.mxu2 %v5808_v30  ;;  %2644 = vmatpush.msra.mxu3 %v5809_v40  ;;  %5810 = vst [vmem:[#allocation30_spill] sm:$0xff] %v5180_v56  ;;  %v5183_v61 = vpop.f32.mrf.mxu2  ;;  %v2528_v30 = vld [vmem:[#allocation9 + $0x48] sm:$0xff] }
 0x2f2   :  { %5811 = vst [vmem:[#allocation23_spill] sm:$0xff] %v5183_v61  ;;  %v2772_v61 = vld [vmem:[#allocation4 + $0x1180] sm:$0xff] }
 0x2f3   :  { %2616 = vmatpush.msra.mxu2 %v5813_v18  ;;  %2645 = vmatpush.msra.mxu3 %v5814_v22  ;;  %v2529_v18 = vld [vmem:[#allocation9 + $0x50] sm:$0xff] }
 0x2f4   :  { %4014 = vmatmul.msk.f32.gmra.mxu3 %vm1573_vm3, %v4885_v0  ;;  %2928 = vmatpush.msra.mxu1 %v2772_v61 }
 0x2f6   :  { %2374 = vmatmul.f32.gmra.mxu2 %v4883_v38  ;;  %v5193_v9 = vpop.f32.mrf.mxu0 }
 0x2f8   :  { %2432 = vmatmul.f32.gmra.mxu0 %v4855_v16  ;;  %2461 = vmatmul.f32.gmra.mxu1 %v4857_v42  ;;  %v5200_v59 = vpop.f32.mrf.mxu3 }
 0x2f9   :  { %v5196_v14 = vpop.f32.mrf.mxu1  ;;  %5816 = vst [vmem:[#allocation32_spill] sm:$0xff] %v5200_v59 }
 0x2fa   :  { %v5198_v21 = vpop.f32.mrf.mxu2 }
 0x2fb   :  { %5815 = vst [vmem:[#allocation24_spill] sm:$0xff] %v5198_v21 }
 0x2fc   :  { %4015 = vmatmul.msk.f32.gmra.mxu3 %vm1573_vm3, %v4895_v10 }
 0x2fe   :  { %2377 = vmatmul.f32.gmra.mxu2 %v4893_v53 }
 0x300   :  { %2435 = vmatmul.f32.gmra.mxu0 %v4859_v12  ;;  %2464 = vmatmul.f32.gmra.mxu1 %v4861_v24 }
 0x301   :  { %v5211_v42 = vpop.f32.mrf.mxu3 }
 0x302   :  { %v5207_v16 = vpop.f32.mrf.mxu0  ;;  %v5209_v36 = vpop.f32.mrf.mxu1  ;;  %5817 = vst [vmem:[#allocation20_spill] sm:$0xff] %v5211_v42 }
 0x304   :  { %v5213_v39 = vpop.f32.mrf.mxu2  ;;  %4016 = vmatmul.msk.f32.vlgmr.msrb.gmra.mxu3 %vm1573_vm3, %v4865_v7 }
 0x305   :  { %5818 = vst [vmem:[#allocation28_spill] sm:$0xff] %v5213_v39 }
 0x306   :  { %2484 = vmatmul.f32.vlgmr.msrb.gmra.mxu2 %v4863_v62 }
 0x308   :  { %4020 = vmatmul.msk.f32.vlgmr.msrb.gmra.mxu0 %vm862_vm2, %v2527_v17  ;;  %4024 = vmatmul.msk.f32.vlgmr.msrb.gmra.mxu1 %vm862_vm2, %v2527_v17 }
 0x30a   :  { %v5224_v63 = vpop.f32.mrf.mxu3 }
 0x30b   :  { %v5220_v12 = vpop.f32.mrf.mxu0  ;;  %v5222_v24 = vpop.f32.mrf.mxu1  ;;  %5819 = vst [vmem:[#allocation21_spill] sm:$0xff] %v5224_v63 }
 0x30c   :  { %4017 = vmatmul.msk.f32.gmra.mxu3 %vm1573_vm3, %v4875_v51  ;;  %v2530_v51 = vld [vmem:[#allocation9 + $0x58] sm:$0xf] }
 0x30d   :  { %v5226_v40 = vpop.f32.mrf.mxu2 }
 0x30e   :  { %5820 = vst [vmem:[#allocation29_spill] sm:$0xff] %v5226_v40  ;;  %2487 = vmatmul.f32.gmra.mxu2 %v4873_v60 }
 0x310   :  { %4021 = vmatmul.msk.f32.gmra.mxu0 %vm862_vm2, %v2528_v30  ;;  %4025 = vmatmul.msk.f32.gmra.mxu1 %vm862_vm2, %v2528_v30 }
 0x313   :  { %v5237_v22 = vpop.f32.mrf.mxu3 }
 0x314   :  { %v5233_v62 = vpop.f32.mrf.mxu0  ;;  %v5235_v7 = vpop.f32.mrf.mxu1  ;;  %5821 = vst [vmem:[#allocation60_spill] sm:$0xff] %v5237_v22  ;;  %4018 = vmatmul.msk.f32.gmra.mxu3 %vm1573_vm3, %v4885_v0 }
 0x316   :  { %2490 = vmatmul.f32.gmra.mxu2 %v4883_v38  ;;  %v5242_v60 = vpop.f32.mrf.mxu2 }
 0x317   :  { %5822 = vst [vmem:[#allocation61_spill] sm:$0xff] %v5242_v60 }
 0x318   :  { %4022 = vmatmul.msk.f32.gmra.mxu0 %vm862_vm2, %v2529_v18  ;;  %4026 = vmatmul.msk.f32.gmra.mxu1 %vm862_vm2, %v2529_v18 }
 0x31c   :  { %4019 = vmatmul.msk.f32.gmra.mxu3 %vm1573_vm3, %v4895_v10  ;;  %v5255_v42 = vpop.f32.mrf.mxu3 }
 0x31d   :  { %v5246_v59 = vpop.f32.mrf.mxu0  ;;  %v5251_v22 = vpop.f32.mrf.mxu1 }
 0x31e   :  { %5823 = vst [vmem:[#allocation62_spill] sm:$0xff] %v5246_v59  ;;  %2493 = vmatmul.f32.gmra.mxu2 %v4893_v53  ;;  %v2695_v59 = vld [vmem:[#allocation4 + $0xf18] sm:$0xff] }
 0x31f   :  { %5824 = vst [vmem:[#allocation63_spill] sm:$0xff] %v5251_v22  ;;  %v5253_v38 = vpop.f32.mrf.mxu2  ;;  %v2881_v22 = vld [vmem:[#allocation4 + $0x14e8] sm:$0xff] }
 0x320   :  { %4023 = vmatmul.msk.f32.gmra.mxu0 %vm862_vm2, %v2530_v51  ;;  %4027 = vmatmul.msk.f32.gmra.mxu1 %vm862_vm2, %v2530_v51 }
 0x324   :  { %4032 = vmatmul.msk.f32.vlgmr.msra.gmra.mxu3 %vm862_vm2, %v2527_v17 }
 0x325   :  { %v5259_v0 = vpop.f32.mrf.mxu0  ;;  %v5263_v53 = vpop.f32.mrf.mxu3 }
 0x326   :  { %5825 = vst [vmem:[#allocation64_spill] sm:$0xff] %v5259_v0  ;;  %4028 = vmatmul.msk.f32.vlgmr.msra.gmra.mxu2 %vm862_vm2, %v2527_v17  ;;  %v2691_v0 = vld [vmem:[#allocation4 + $0xef8] sm:$0xff] }
 0x328   :  { %v5265_v63 = vpop.f32.mrf.mxu1 }
 0x329   :  { %5826 = vst [vmem:[#allocation65_spill] sm:$0xff] %v5265_v63  ;;  %v5267_v10 = vpop.f32.mrf.mxu2  ;;  %v2865_v63 = vld [vmem:[#allocation4 + $0x1468] sm:$0xff] }
 0x32c   :  { %4033 = vmatmul.msk.f32.gmra.mxu3 %vm862_vm2, %v2528_v30 }
 0x32d   :  { %v5273_v60 = vpop.f32.mrf.mxu3 }
 0x32e   :  { %4029 = vmatmul.msk.f32.gmra.mxu2 %vm862_vm2, %v2528_v30  ;;  %v5271_v21 = vpop.f32.mrf.mxu0 }
 0x32f   :  { %5827 = vst [vmem:[#allocation66_spill] sm:$0xff] %v5271_v21  ;;  %v2743_v21 = vld [vmem:[#allocation4 + $0x1098] sm:$0xff] }
 0x331   :  { %v5275_v39 = vpop.f32.mrf.mxu1 }
 0x332   :  { %5828 = vst [vmem:[#allocation67_spill] sm:$0xff] %v5275_v39  ;;  %v5277_v13 = vpop.f32.mrf.mxu2  ;;  %v2834_v39 = vld [vmem:[#allocation4 + $0x1370] sm:$0xff] }
 0x334   :  { %4034 = vmatmul.msk.f32.gmra.mxu3 %vm862_vm2, %v2529_v18 }
 0x336   :  { %4030 = vmatmul.msk.f32.gmra.mxu2 %vm862_vm2, %v2529_v18  ;;  %v5285_v40 = vpop.f32.mrf.mxu3  ;;  %v2720_v18 = vld [vmem:[#allocation4 + $0xfe0] sm:$0xff] }
 0x337   :  { %v5281_v17 = vpop.f32.mrf.mxu0  ;;  %2896 = vmatpush.msra.mxu0 %v2720_v18  ;;  %v2768_v18 = vld [vmem:[#allocation4 + $0x1160] sm:$0xff] }
 0x338   :  { %5829 = vst [vmem:[#allocation68_spill] sm:$0xff] %v5281_v17  ;;  %2929 = vmatpush.msra.mxu1 %v2768_v18  ;;  %v2752_v18 = vld [vmem:[#allocation4 + $0x10e0] sm:$0xff]  ;;  %v2822_v17 = vld [vmem:[#allocation4 + $0x1310] sm:$0xff] }
 0x339   :  { %2897 = vmatpush.msra.mxu0 %v2716_v55  ;;  %v2764_v55 = vld [vmem:[#allocation4 + $0x1140] sm:$0xff] }
 0x33a   :  { %v5283_v48 = vpop.f32.mrf.mxu1  ;;  %2930 = vmatpush.msra.mxu1 %v2764_v55  ;;  %v2748_v55 = vld [vmem:[#allocation4 + $0x10c0] sm:$0xff] }
 0x33b   :  { %5830 = vst [vmem:[#allocation69_spill] sm:$0xff] %v5283_v48  ;;  %v5287_v56 = vpop.f32.mrf.mxu2  ;;  %2898 = vmatpush.msra.mxu0 %v2712_v57  ;;  %v2756_v57 = vld [vmem:[#allocation4 + $0x1100] sm:$0xff]  ;;  %v2869_v48 = vld [vmem:[#allocation4 + $0x1488] sm:$0xff] }
 0x33c   :  { %4035 = vmatmul.msk.f32.gmra.mxu3 %vm862_vm2, %v2530_v51 }
 0x33d   :  { %2899 = vmatpush.msra.mxu0 %v2708_v46 }
 0x33e   :  { %4031 = vmatmul.msk.f32.gmra.mxu2 %vm862_vm2, %v2530_v51 }
 0x33f   :  { %2900 = vmatpush.msra.mxu0 %v2704_v20  ;;  %v2688_v20 = vld [vmem:[#allocation4 + $0xee0] sm:$0xff] }
 0x340   :  { %v5291_v30 = vpop.f32.mrf.mxu0 }
 0x341   :  { %5831 = vst [vmem:[#allocation70_spill] sm:$0xff] %v5291_v30  ;;  %2901 = vmatpush.msra.mxu0 %v2700_v33  ;;  %v2684_v33 = vld [vmem:[#allocation4 + $0xec0] sm:$0xff] }
 0x342   :  { %v5297_v11 = vpop.f32.mrf.mxu3 }
 0x343   :  { %v5293_v41 = vpop.f32.mrf.mxu1  ;;  %5834 = vst [vmem:[#allocation73_spill] sm:$0xff] %v5297_v11  ;;  %v2781_v11 = vld [vmem:[#allocation4 + $0x11c8] sm:$0xff] }
 0x344   :  { %5832 = vst [vmem:[#allocation71_spill] sm:$0xff] %v5293_v41  ;;  %v5295_v2 = vpop.f32.mrf.mxu2 }
 0x345   :  { %5833 = vst [vmem:[#allocation72_spill] sm:$0xff] %v5295_v2 }
 0x34c   :  { %v5299_v26 = vpop.f32.mrf.mxu0 }
 0x34d   :  { %5835 = vst [vmem:[#allocation74_spill] sm:$0xff] %v5299_v26  ;;  %v5301_v51 = vpop.f32.mrf.mxu1  ;;  %v5305_v41 = vpop.f32.mrf.mxu3  ;;  %v2696_v26 = vld [vmem:[#allocation4 + $0xf20] sm:$0xff] }
 0x34e   :  { %5836 = vst [vmem:[#allocation75_spill] sm:$0xff] %v5301_v51  ;;  %v5303_v30 = vpop.f32.mrf.mxu2  ;;  %v2760_v51 = vld [vmem:[#allocation4 + $0x1120] sm:$0xff]  ;;  %2902 = vmatpush.msra.mxu0 %v2696_v26 }
 0x34f   :  { %5837 = vst [vmem:[#allocation76_spill] sm:$0xff] %v5303_v30  ;;  %2931 = vmatpush.msra.mxu1 %v2760_v51  ;;  %v2829_v30 = vld [vmem:[#allocation4 + $0x1348] sm:$0xff] }
 0x350   :  { %5838 = vst [vmem:[#allocation77_spill] sm:$0xff] %v5305_v41  ;;  %2903 = vmatpush.msra.mxu0 %v2692_v1  ;;  %v2786_v41 = vld [vmem:[#allocation4 + $0x11f0] sm:$0xff] }
 0x351   :  { %2932 = vmatpush.msra.mxu1 %v2756_v57 }
 0x352   :  { %2904 = vmatpush.msra.mxu0 %v2688_v20  ;;  %v2672_v20 = vld [vmem:[#allocation4 + $0xe60] sm:$0xff] }
 0x353   :  { %2933 = vmatpush.msra.mxu1 %v2752_v18  ;;  %v2736_v18 = vld [vmem:[#allocation4 + $0x1060] sm:$0xff] }
 0x354   :  { %2905 = vmatpush.msra.mxu0 %v2684_v33  ;;  %v2668_v33 = vld [vmem:[#allocation4 + $0xe40] sm:$0xff] }
 0x355   :  { %v5307_v3 = vpop.f32.mrf.mxu0  ;;  %v5309_v31 = vpop.f32.mrf.mxu1  ;;  %2934 = vmatpush.msra.mxu1 %v2748_v55  ;;  %v2732_v55 = vld [vmem:[#allocation4 + $0x1040] sm:$0xff] }
 0x356   :  { %5839 = vst [vmem:[#allocation78_spill] sm:$0xff] %v5307_v3  ;;  %v2680_v3 = vld [vmem:[#allocation4 + $0xea0] sm:$0xff] }
 0x357   :  { %5840 = vst [vmem:[#allocation79_spill] sm:$0xff] %v5309_v31  ;;  %v5313_v61 = vpop.f32.mrf.mxu3  ;;  %v2744_v31 = vld [vmem:[#allocation4 + $0x10a0] sm:$0xff]  ;;  %2906 = vmatpush.msra.mxu0 %v2680_v3 }
 0x358   :  { %v5311_v46 = vpop.f32.mrf.mxu2  ;;  %5842 = vst [vmem:[#allocation81_spill] sm:$0xff] %v5313_v61  ;;  %2935 = vmatpush.msra.mxu1 %v2744_v31  ;;  %v2849_v61 = vld [vmem:[#allocation4 + $0x13e8] sm:$0xff] }
 0x359   :  { %5841 = vst [vmem:[#allocation80_spill] sm:$0xff] %v5311_v46  ;;  %2907 = vmatpush.msra.mxu0 %v2676_v8  ;;  %v2660_v8 = vld [vmem:[#allocation4 + $0xe00] sm:$0xff] }
 0x35a   :  { %2936 = vmatpush.msra.mxu1 %v2740_v37  ;;  %v2724_v37 = vld [vmem:[#allocation4 + $0x1000] sm:$0xff] }
 0x35b   :  { %2908 = vmatpush.msra.mxu0 %v2672_v20 }
 0x35c   :  { %2937 = vmatpush.msra.mxu1 %v2736_v18  ;;  %v2721_v18 = vld [vmem:[#allocation4 + $0xfe8] sm:$0xff] }
 0x35d   :  { %v5315_v26 = vpop.f32.mrf.mxu0  ;;  %v5317_v51 = vpop.f32.mrf.mxu1  ;;  %2909 = vmatpush.msra.mxu0 %v2668_v33  ;;  %v2848_v33 = vld [vmem:[#allocation4 + $0x13e0] sm:$0xff] }
 0x35e   :  { %5843 = vst [vmem:[#allocation82_spill] sm:$0xff] %v5315_v26  ;;  %2938 = vmatpush.msra.mxu1 %v2732_v55  ;;  %v2664_v26 = vld [vmem:[#allocation4 + $0xe20] sm:$0xff]  ;;  %v2717_v55 = vld [vmem:[#allocation4 + $0xfc8] sm:$0xff]  ;;  %2954 = vmatpush.msrb.mxu2 %v2848_v33 }
 0x35f   :  { %5844 = vst [vmem:[#allocation83_spill] sm:$0xff] %v5317_v51  ;;  %v5319_v1 = vpop.f32.mrf.mxu3  ;;  %v2728_v51 = vld [vmem:[#allocation4 + $0x1020] sm:$0xff]  ;;  %2910 = vmatpush.msra.mxu0 %v2664_v26 }
 0x360   :  { %5845 = vst [vmem:[#allocation84_spill] sm:$0xff] %v5319_v1  ;;  %2939 = vmatpush.msra.mxu1 %v2728_v51  ;;  %v2844_v26 = vld [vmem:[#allocation4 + $0x13c0] sm:$0xff]  ;;  %v2713_v51 = vld [vmem:[#allocation4 + $0xfa8] sm:$0xff] }
 0x361   :  { %v5321_v57 = vpop.f32.mrf.mxu2  ;;  %2911 = vmatpush.msra.mxu0 %v2660_v8  ;;  %2955 = vmatpush.msrb.mxu2 %v2844_v26  ;;  %v2769_v1 = vld [vmem:[#allocation4 + $0x1168] sm:$0xff] }
 0x362   :  { %5846 = vst [vmem:[#allocation85_spill] sm:$0xff] %v5321_v57  ;;  %2940 = vmatpush.msra.mxu1 %v2724_v37  ;;  %v2840_v37 = vld [vmem:[#allocation4 + $0x13a0] sm:$0xff]  ;;  %v2701_v26 = vld [vmem:[#allocation4 + $0xf48] sm:$0xff] }
 0x363   :  { %3012 = vmatpush.msrb.mxu0 %v2721_v18  ;;  %v2773_v18 = vld [vmem:[#allocation4 + $0x1188] sm:$0xff]  ;;  %2956 = vmatpush.msrb.mxu2 %v2840_v37 }
 0x364   :  { %3041 = vmatpush.msrb.mxu1 %v2785_v52  ;;  %v2761_v37 = vld [vmem:[#allocation4 + $0x1128] sm:$0xff] }
 0x365   :  { %v5323_v3 = vpop.f32.mrf.mxu0  ;;  %v5325_v31 = vpop.f32.mrf.mxu1  ;;  %3013 = vmatpush.msrb.mxu0 %v2717_v55  ;;  %v2836_v55 = vld [vmem:[#allocation4 + $0x1380] sm:$0xff] }
 0x366   :  { %5847 = vst [vmem:[#allocation86_spill] sm:$0xff] %v5323_v3  ;;  %3042 = vmatpush.msrb.mxu1 %v2781_v11  ;;  %2957 = vmatpush.msrb.mxu2 %v2836_v55  ;;  %v2832_v11 = vld [vmem:[#allocation4 + $0x1360] sm:$0xff]  ;;  %v2693_v55 = vld [vmem:[#allocation4 + $0xf08] sm:$0xff] }
 0x367   :  { %5848 = vst [vmem:[#allocation87_spill] sm:$0xff] %v5325_v31  ;;  %v5327_v19 = vpop.f32.mrf.mxu3  ;;  %v2777_v31 = vld [vmem:[#allocation4 + $0x11a8] sm:$0xff]  ;;  %3014 = vmatpush.msrb.mxu0 %v2713_v51 }
 0x368   :  { %5849 = vst [vmem:[#allocation88_spill] sm:$0xff] %v5327_v19  ;;  %3043 = vmatpush.msrb.mxu1 %v2777_v31  ;;  %v2709_v19 = vld [vmem:[#allocation4 + $0xf88] sm:$0xff]  ;;  %2958 = vmatpush.msrb.mxu2 %v2832_v11  ;;  %v2828_v31 = vld [vmem:[#allocation4 + $0x1340] sm:$0xff] }
 0x369   :  { %v5329_v20 = vpop.f32.mrf.mxu2  ;;  %3015 = vmatpush.msrb.mxu0 %v2709_v19  ;;  %v2765_v51 = vld [vmem:[#allocation4 + $0x1148] sm:$0xff] }
 0x36a   :  { %5850 = vst [vmem:[#allocation89_spill] sm:$0xff] %v5329_v20  ;;  %3044 = vmatpush.msrb.mxu1 %v2773_v18  ;;  %v2705_v20 = vld [vmem:[#allocation4 + $0xf68] sm:$0xff]  ;;  %2959 = vmatpush.msrb.mxu2 %v2828_v31 }
 0x36b   :  { %3016 = vmatpush.msrb.mxu0 %v2705_v20  ;;  %v2757_v20 = vld [vmem:[#allocation4 + $0x1108] sm:$0xff] }
 0x36c   :  { %3045 = vmatpush.msrb.mxu1 %v2769_v1  ;;  %v2685_v31 = vld [vmem:[#allocation4 + $0xec8] sm:$0xff] }
 0x36d   :  { %v5331_v3 = vpop.f32.mrf.mxu0  ;;  %v5333_v8 = vpop.f32.mrf.mxu1  ;;  %3017 = vmatpush.msrb.mxu0 %v2701_v26  ;;  %v2820_v26 = vld [vmem:[#allocation4 + $0x1300] sm:$0xff] }
 0x36e   :  { %5851 = vst [vmem:[#allocation90_spill] sm:$0xff] %v5331_v3  ;;  %3046 = vmatpush.msrb.mxu1 %v2765_v51  ;;  %v2824_v3 = vld [vmem:[#allocation4 + $0x1320] sm:$0xff] }
 0x36f   :  { %5852 = vst [vmem:[#allocation91_spill] sm:$0xff] %v5333_v8  ;;  %v5337_v33 = vpop.f32.mrf.mxu3  ;;  %v2697_v8 = vld [vmem:[#allocation4 + $0xf28] sm:$0xff]  ;;  %2960 = vmatpush.msrb.mxu2 %v2824_v3  ;;  %v2880_v51 = vld [vmem:[#allocation4 + $0x14e0] sm:$0xff] }
 0x370   :  { %5854 = vst [vmem:[#allocation93_spill] sm:$0xff] %v5337_v33  ;;  %3018 = vmatpush.msrb.mxu0 %v2697_v8  ;;  %3047 = vmatpush.msrb.mxu1 %v2761_v37  ;;  %v2689_v33 = vld [vmem:[#allocation4 + $0xee8] sm:$0xff]  ;;  %v2816_v8 = vld [vmem:[#allocation4 + $0x12e0] sm:$0xff] }
 0x371   :  { %v5335_v52 = vpop.f32.mrf.mxu2  ;;  %2961 = vmatpush.msrb.mxu2 %v2820_v26  ;;  %2991 = vmatpush.msrb.mxu3 %v2880_v51  ;;  %v2749_v37 = vld [vmem:[#allocation4 + $0x10c8] sm:$0xff]  ;;  %v2876_v3 = vld [vmem:[#allocation4 + $0x14c0] sm:$0xff] }
 0x372   :  { %5853 = vst [vmem:[#allocation92_spill] sm:$0xff] %v5335_v52  ;;  %3019 = vmatpush.msrb.mxu0 %v2693_v55  ;;  %3048 = vmatpush.msrb.mxu1 %v2757_v20  ;;  %v2753_v52 = vld [vmem:[#allocation4 + $0x10e8] sm:$0xff] }
 0x373   :  { %2962 = vmatpush.msrb.mxu2 %v2816_v8  ;;  %v2745_v20 = vld [vmem:[#allocation4 + $0x10a8] sm:$0xff]  ;;  %2992 = vmatpush.msrb.mxu3 %v2876_v3 }
 0x374   :  { %3020 = vmatpush.msrb.mxu0 %v2689_v33  ;;  %3049 = vmatpush.msrb.mxu1 %v2753_v52  ;;  %v2808_v52 = vld [vmem:[#allocation4 + $0x12a0] sm:$0xff]  ;;  %v2677_v26 = vld [vmem:[#allocation4 + $0xe88] sm:$0xff] }
 0x375   :  { %v5339_v19 = vpop.f32.mrf.mxu0  ;;  %v5341_v18 = vpop.f32.mrf.mxu1  ;;  %v2872_v33 = vld [vmem:[#allocation4 + $0x14a0] sm:$0xff]  ;;  %v2741_v8 = vld [vmem:[#allocation4 + $0x1088] sm:$0xff] }
 0x376   :  { %5855 = vst [vmem:[#allocation94_spill] sm:$0xff] %v5339_v19  ;;  %3021 = vmatpush.msrb.mxu0 %v2685_v31  ;;  %3050 = vmatpush.msrb.mxu1 %v2749_v37  ;;  %v2681_v19 = vld [vmem:[#allocation4 + $0xea8] sm:$0xff]  ;;  %v2804_v31 = vld [vmem:[#allocation4 + $0x1280] sm:$0xff] }
 0x377   :  { %5856 = vst [vmem:[#allocation95_spill] sm:$0xff] %v5341_v18  ;;  %v5345_v11 = vpop.f32.mrf.mxu3  ;;  %v2812_v18 = vld [vmem:[#allocation4 + $0x12c0] sm:$0xff]  ;;  %2993 = vmatpush.msrb.mxu3 %v2872_v33  ;;  %v2737_v3 = vld [vmem:[#allocation4 + $0x1068] sm:$0xff] }
 0x378   :  { %5858 = vst [vmem:[#allocation97_spill] sm:$0xff] %v5345_v11  ;;  %2963 = vmatpush.msrb.mxu2 %v2812_v18  ;;  %3022 = vmatpush.msrb.mxu0 %v2681_v19  ;;  %v2868_v37 = vld [vmem:[#allocation4 + $0x1480] sm:$0xff]  ;;  %v2673_v18 = vld [vmem:[#allocation4 + $0xe68] sm:$0xff] }
 0x379   :  { %v5343_v1 = vpop.f32.mrf.mxu2  ;;  %3051 = vmatpush.msrb.mxu1 %v2745_v20  ;;  %2994 = vmatpush.msrb.mxu3 %v2868_v37  ;;  %v2800_v19 = vld [vmem:[#allocation4 + $0x1260] sm:$0xff] }
 0x37a   :  { %5857 = vst [vmem:[#allocation96_spill] sm:$0xff] %v5343_v1  ;;  %2964 = vmatpush.msrb.mxu2 %v2808_v52  ;;  %3023 = vmatpush.msrb.mxu0 %v2677_v26  ;;  %v2864_v20 = vld [vmem:[#allocation4 + $0x1460] sm:$0xff]  ;;  %v2733_v52 = vld [vmem:[#allocation4 + $0x1048] sm:$0xff] }
 0x37b   :  { %3052 = vmatpush.msrb.mxu1 %v2741_v8  ;;  %2995 = vmatpush.msrb.mxu3 %v2864_v20  ;;  %v2796_v33 = vld [vmem:[#allocation4 + $0x1240] sm:$0xff]  ;;  %v2665_v26 = vld [vmem:[#allocation4 + $0xe28] sm:$0xff] }
 0x37c   :  { %2965 = vmatpush.msrb.mxu2 %v2804_v31  ;;  %3024 = vmatpush.msrb.mxu0 %v2673_v18  ;;  %v2792_v8 = vld [vmem:[#allocation4 + $0x1220] sm:$0xff]  ;;  %v2729_v31 = vld [vmem:[#allocation4 + $0x1028] sm:$0xff] }
 0x37d   :  { %v5347_v55 = vpop.f32.mrf.mxu0  ;;  %v5349_v11 = vpop.f32.mrf.mxu1  ;;  %3053 = vmatpush.msrb.mxu1 %v2737_v3  ;;  %v2856_v37 = vld [vmem:[#allocation4 + $0x1420] sm:$0xff]  ;;  %v2661_v3 = vld [vmem:[#allocation4 + $0xe08] sm:$0xff] }
 0x37e   :  { %5859 = vst [vmem:[#allocation98_spill] sm:$0xff] %v5347_v55  ;;  %2966 = vmatpush.msrb.mxu2 %v2800_v19  ;;  %v2860_v55 = vld [vmem:[#allocation4 + $0x1440] sm:$0xff]  ;;  %v2725_v19 = vld [vmem:[#allocation4 + $0x1008] sm:$0xff] }
 0x37f   :  { %5860 = vst [vmem:[#allocation99_spill] sm:$0xff] %v5349_v11  ;;  %v5353_v1 = vpop.f32.mrf.mxu3  ;;  %v2669_v11 = vld [vmem:[#allocation4 + $0xe48] sm:$0xff]  ;;  %3054 = vmatpush.msrb.mxu1 %v2733_v52  ;;  %2996 = vmatpush.msrb.mxu3 %v2860_v55  ;;  %v2788_v52 = vld [vmem:[#allocation4 + $0x1200] sm:$0xff]  ;;  %v2782_v55 = vld [vmem:[#allocation4 + $0x11d0] sm:$0xff] }
 0x380   :  { %5862 = vst [vmem:[#allocation101_spill] sm:$0xff] %v5353_v1  ;;  %3025 = vmatpush.msrb.mxu0 %v2669_v11  ;;  %2967 = vmatpush.msrb.mxu2 %v2796_v33  ;;  %v2852_v1 = vld [vmem:[#allocation4 + $0x1400] sm:$0xff]  ;;  %v2722_v33 = vld [vmem:[#allocation4 + $0xff0] sm:$0xff] }
 0x381   :  { %v5351_v51 = vpop.f32.mrf.mxu2  ;;  %3055 = vmatpush.msrb.mxu1 %v2729_v31  ;;  %2997 = vmatpush.msrb.mxu3 %v2856_v37  ;;  %v2714_v31 = vld [vmem:[#allocation4 + $0xfb0] sm:$0xff] }
 0x382   :  { %5861 = vst [vmem:[#allocation100_spill] sm:$0xff] %v5351_v51  ;;  %3026 = vmatpush.msrb.mxu0 %v2665_v26  ;;  %2968 = vmatpush.msrb.mxu2 %v2792_v8  ;;  %v2718_v26 = vld [vmem:[#allocation4 + $0xfd0] sm:$0xff]  ;;  %v2845_v8 = vld [vmem:[#allocation4 + $0x13c8] sm:$0xff] }
 0x383   :  { %3056 = vmatpush.msrb.mxu1 %v2725_v19  ;;  %2998 = vmatpush.msrb.mxu3 %v2852_v1  ;;  %v2778_v37 = vld [vmem:[#allocation4 + $0x11b0] sm:$0xff] }
 0x384   :  { %3027 = vmatpush.msrb.mxu0 %v2661_v3  ;;  %2969 = vmatpush.msrb.mxu2 %v2788_v52  ;;  %v2841_v3 = vld [vmem:[#allocation4 + $0x13a8] sm:$0xff]  ;;  %v2710_v1 = vld [vmem:[#allocation4 + $0xf90] sm:$0xff] }
 0x385   :  { %v5355_v51 = vpop.f32.mrf.mxu0  ;;  %v5358_v18 = vpop.f32.mrf.mxu1  ;;  %v2774_v19 = vld [vmem:[#allocation4 + $0x1190] sm:$0xff]  ;;  %3107 = vmatpush.msra.mxu3 %v2881_v22  ;;  %v2873_v22 = vld [vmem:[#allocation4 + $0x14a8] sm:$0xff] }
 0x386   :  { %2912 = vmatmul.f32.vlgmr.msra.gmra.mxu0 %v5355_v51  ;;  %2941 = vmatmul.f32.vlgmr.msra.gmra.mxu1 %v5358_v18 }
 0x387   :  { %v5363_v11 = vpop.f32.mrf.mxu3  ;;  %3128 = vmatpush.msra.mxu0 %v2722_v33  ;;  %3157 = vmatpush.msra.mxu1 %v2786_v41  ;;  %v2706_v33 = vld [vmem:[#allocation4 + $0xf70] sm:$0xff] }
 0x388   :  { %5864 = vst [vmem:[#allocation103_spill] sm:$0xff] %v5363_v11  ;;  %3070 = vmatpush.msra.mxu2 %v2849_v61  ;;  %v2837_v61 = vld [vmem:[#allocation4 + $0x1388] sm:$0xff] }
 0x389   :  { %v5361_v20 = vpop.f32.mrf.mxu2  ;;  %3158 = vmatpush.msra.mxu1 %v2782_v55  ;;  %3129 = vmatpush.msra.mxu0 %v2718_v26  ;;  %v2770_v55 = vld [vmem:[#allocation4 + $0x1170] sm:$0xff] }
 0x38a   :  { %5863 = vst [vmem:[#allocation102_spill] sm:$0xff] %v5361_v20  ;;  %3071 = vmatpush.msra.mxu2 %v2845_v8  ;;  %v2833_v20 = vld [vmem:[#allocation4 + $0x1368] sm:$0xff]  ;;  %v2702_v26 = vld [vmem:[#allocation4 + $0xf50] sm:$0xff] }
 0x38b   :  { %3130 = vmatpush.msra.mxu0 %v2714_v31  ;;  %3159 = vmatpush.msra.mxu1 %v2778_v37  ;;  %v2766_v8 = vld [vmem:[#allocation4 + $0x1150] sm:$0xff] }
 0x38c   :  { %3072 = vmatpush.msra.mxu2 %v2841_v3  ;;  %v2698_v31 = vld [vmem:[#allocation4 + $0xf30] sm:$0xff]  ;;  %v2825_v3 = vld [vmem:[#allocation4 + $0x1328] sm:$0xff] }
 0x38d   :  { %v5365_v2 = vpop.f32.mrf.mxu0  ;;  %v5368_v11 = vpop.f32.mrf.mxu1  ;;  %3131 = vmatpush.msra.mxu0 %v2710_v1  ;;  %3160 = vmatpush.msra.mxu1 %v2774_v19  ;;  %v2762_v37 = vld [vmem:[#allocation4 + $0x1130] sm:$0xff] }
 0x38e   :  { %2915 = vmatmul.f32.gmra.mxu0 %v5365_v2  ;;  %2944 = vmatmul.f32.gmra.mxu1 %v5368_v11  ;;  %v2694_v1 = vld [vmem:[#allocation4 + $0xf10] sm:$0xff] }
 0x38f   :  { %v5373_v52 = vpop.f32.mrf.mxu3  ;;  %3073 = vmatpush.msra.mxu2 %v2837_v61  ;;  %3132 = vmatpush.msra.mxu0 %v2706_v33  ;;  %v2758_v19 = vld [vmem:[#allocation4 + $0x1110] sm:$0xff] }
 0x390   :  { %5866 = vst [vmem:[#allocation105_spill] sm:$0xff] %v5373_v52  ;;  %3161 = vmatpush.msra.mxu1 %v2770_v55  ;;  %v2821_v55 = vld [vmem:[#allocation4 + $0x1308] sm:$0xff] }
 0x391   :  { %v5371_v41 = vpop.f32.mrf.mxu2  ;;  %3074 = vmatpush.msra.mxu2 %v2833_v20  ;;  %3133 = vmatpush.msra.mxu0 %v2702_v26  ;;  %v2690_v20 = vld [vmem:[#allocation4 + $0xef0] sm:$0xff]  ;;  %v2817_v26 = vld [vmem:[#allocation4 + $0x12e8] sm:$0xff] }
 0x392   :  { %5865 = vst [vmem:[#allocation104_spill] sm:$0xff] %v5371_v41  ;;  %3162 = vmatpush.msra.mxu1 %v2766_v8  ;;  %v2754_v41 = vld [vmem:[#allocation4 + $0x10f0] sm:$0xff] }
 0x393   :  { %3075 = vmatpush.msra.mxu2 %v2829_v30  ;;  %3134 = vmatpush.msra.mxu0 %v2698_v31  ;;  %v2686_v8 = vld [vmem:[#allocation4 + $0xed0] sm:$0xff]  ;;  %v2877_v31 = vld [vmem:[#allocation4 + $0x14c8] sm:$0xff] }
 0x394   :  { %3163 = vmatpush.msra.mxu1 %v2762_v37  ;;  %v2750_v30 = vld [vmem:[#allocation4 + $0x10d0] sm:$0xff]  ;;  %3108 = vmatpush.msra.mxu3 %v2877_v31 }
 0x395   :  { %v5375_v57 = vpop.f32.mrf.mxu0  ;;  %v5378_v52 = vpop.f32.mrf.mxu1  ;;  %3076 = vmatpush.msra.mxu2 %v2825_v3  ;;  %3135 = vmatpush.msra.mxu0 %v2694_v1  ;;  %v2682_v37 = vld [vmem:[#allocation4 + $0xeb0] sm:$0xff] }
 0x396   :  { %2918 = vmatmul.f32.gmra.mxu0 %v5375_v57  ;;  %2947 = vmatmul.f32.gmra.mxu1 %v5378_v52  ;;  %v2746_v1 = vld [vmem:[#allocation4 + $0x10b0] sm:$0xff] }
 0x397   :  { %v5383_v33 = vpop.f32.mrf.mxu3  ;;  %3164 = vmatpush.msra.mxu1 %v2758_v19  ;;  %3077 = vmatpush.msra.mxu2 %v2821_v55  ;;  %v2809_v19 = vld [vmem:[#allocation4 + $0x12a8] sm:$0xff]  ;;  %v2678_v55 = vld [vmem:[#allocation4 + $0xe90] sm:$0xff] }
 0x398   :  { %5868 = vst [vmem:[#allocation107_spill] sm:$0xff] %v5383_v33  ;;  %3136 = vmatpush.msra.mxu0 %v2690_v20  ;;  %v2742_v20 = vld [vmem:[#allocation4 + $0x1090] sm:$0xff]  ;;  %3109 = vmatpush.msra.mxu3 %v2873_v22 }
 0x399   :  { %v5381_v61 = vpop.f32.mrf.mxu2  ;;  %3165 = vmatpush.msra.mxu1 %v2754_v41  ;;  %3078 = vmatpush.msra.mxu2 %v2817_v26  ;;  %v2805_v26 = vld [vmem:[#allocation4 + $0x1288] sm:$0xff]  ;;  %v2734_v31 = vld [vmem:[#allocation4 + $0x1050] sm:$0xff] }
 0x39a   :  { %5867 = vst [vmem:[#allocation106_spill] sm:$0xff] %v5381_v61  ;;  %v2813_v61 = vld [vmem:[#allocation4 + $0x12c8] sm:$0xff]  ;;  %3137 = vmatpush.msra.mxu0 %v2686_v8  ;;  %v2674_v8 = vld [vmem:[#allocation4 + $0xe70] sm:$0xff]  ;;  %3110 = vmatpush.msra.mxu3 %v2869_v48 }
 0x39b   :  { %3166 = vmatpush.msra.mxu1 %v2750_v30  ;;  %3079 = vmatpush.msra.mxu2 %v2813_v61  ;;  %v2738_v30 = vld [vmem:[#allocation4 + $0x1070] sm:$0xff]  ;;  %v2801_v61 = vld [vmem:[#allocation4 + $0x1268] sm:$0xff] }
 0x39c   :  { %3138 = vmatpush.msra.mxu0 %v2682_v37  ;;  %v2797_v37 = vld [vmem:[#allocation4 + $0x1248] sm:$0xff]  ;;  %3111 = vmatpush.msra.mxu3 %v2865_v63  ;;  %v2730_v48 = vld [vmem:[#allocation4 + $0x1030] sm:$0xff] }
 0x39d   :  { %v5385_v46 = vpop.f32.mrf.mxu0  ;;  %v5388_v3 = vpop.f32.mrf.mxu1  ;;  %3167 = vmatpush.msra.mxu1 %v2746_v1  ;;  %3080 = vmatpush.msra.mxu2 %v2809_v19  ;;  %v2861_v1 = vld [vmem:[#allocation4 + $0x1448] sm:$0xff]  ;;  %v2666_v19 = vld [vmem:[#allocation4 + $0xe30] sm:$0xff] }
 0x39e   :  { %2921 = vmatmul.f32.gmra.mxu0 %v5385_v46  ;;  %2950 = vmatmul.f32.gmra.mxu1 %v5388_v3  ;;  %v2662_v63 = vld [vmem:[#allocation4 + $0xe10] sm:$0xff] }
 0x39f   :  { %v5393_v41 = vpop.f32.mrf.mxu3  ;;  %3139 = vmatpush.msra.mxu0 %v2678_v55  ;;  %3168 = vmatpush.msra.mxu1 %v2742_v20  ;;  %v2793_v20 = vld [vmem:[#allocation4 + $0x1228] sm:$0xff] }
 0x3a0   :  { %5870 = vst [vmem:[#allocation109_spill] sm:$0xff] %v5393_v41  ;;  %3081 = vmatpush.msra.mxu2 %v2805_v26  ;;  %v2857_v26 = vld [vmem:[#allocation4 + $0x1428] sm:$0xff]  ;;  %3112 = vmatpush.msra.mxu3 %v2861_v1  ;;  %v2719_v1 = vld [vmem:[#allocation4 + $0xfd8] sm:$0xff] }
 0x3a1   :  { %v5391_v33 = vpop.f32.mrf.mxu2  ;;  %3140 = vmatpush.msra.mxu0 %v2674_v8  ;;  %3169 = vmatpush.msra.mxu1 %v2738_v30  ;;  %v2789_v8 = vld [vmem:[#allocation4 + $0x1208] sm:$0xff] }
 0x3a2   :  { %5869 = vst [vmem:[#allocation108_spill] sm:$0xff] %v5391_v33  ;;  %v2670_v33 = vld [vmem:[#allocation4 + $0xe50] sm:$0xff]  ;;  %3082 = vmatpush.msra.mxu2 %v2801_v61  ;;  %v2853_v30 = vld [vmem:[#allocation4 + $0x1408] sm:$0xff]  ;;  %3113 = vmatpush.msra.mxu3 %v2857_v26  ;;  %v2723_v61 = vld [vmem:[#allocation4 + $0xff8] sm:$0xff] }
 0x3a3   :  { %3141 = vmatpush.msra.mxu0 %v2670_v33  ;;  %3170 = vmatpush.msra.mxu1 %v2734_v31  ;;  %v2726_v33 = vld [vmem:[#allocation4 + $0x1010] sm:$0xff]  ;;  %v2787_v31 = vld [vmem:[#allocation4 + $0x11f8] sm:$0xff] }
 0x3a4   :  { %3083 = vmatpush.msra.mxu2 %v2797_v37  ;;  %v2850_v37 = vld [vmem:[#allocation4 + $0x13f0] sm:$0xff]  ;;  %3114 = vmatpush.msra.mxu3 %v2853_v30  ;;  %v2715_v26 = vld [vmem:[#allocation4 + $0xfb8] sm:$0xff] }
 0x3a5   :  { %3142 = vmatpush.msra.mxu0 %v2666_v19  ;;  %3171 = vmatpush.msra.mxu1 %v2730_v48  ;;  %v2783_v19 = vld [vmem:[#allocation4 + $0x11d8] sm:$0xff] }
 0x3a6   :  { %3028 = vmatmul.f32.vlgmr.msrb.gmra.mxu0 %v5355_v51  ;;  %3057 = vmatmul.f32.vlgmr.msrb.gmra.mxu1 %v5358_v18  ;;  %v2775_v30 = vld [vmem:[#allocation4 + $0x1198] sm:$0xff] }
 0x3a7   :  { %v5399_v55 = vpop.f32.mrf.mxu3  ;;  %3084 = vmatpush.msra.mxu2 %v2793_v20  ;;  %3143 = vmatpush.msra.mxu0 %v2662_v63  ;;  %v2846_v20 = vld [vmem:[#allocation4 + $0x13d0] sm:$0xff]  ;;  %v2779_v63 = vld [vmem:[#allocation4 + $0x11b8] sm:$0xff] }
 0x3a8   :  { %4036 = vmatmul.msk.f32.vlgmr.msrb.gmra.mxu3 %vm1573_vm3, %v5399_v55  ;;  %3172 = vmatpush.msra.mxu1 %v2726_v33  ;;  %v2842_v33 = vld [vmem:[#allocation4 + $0x13b0] sm:$0xff] }
 0x3a9   :  { %v5397_v22 = vpop.f32.mrf.mxu2  ;;  %3085 = vmatpush.msra.mxu2 %v2789_v8  ;;  %3244 = vmatpush.msrb.mxu0 %v2723_v61  ;;  %v2711_v8 = vld [vmem:[#allocation4 + $0xf98] sm:$0xff]  ;;  %v2838_v61 = vld [vmem:[#allocation4 + $0x1390] sm:$0xff] }
 0x3aa   :  { %2970 = vmatmul.f32.vlgmr.msrb.gmra.mxu2 %v5397_v22  ;;  %3273 = vmatpush.msrb.mxu1 %v2787_v31  ;;  %v2707_v31 = vld [vmem:[#allocation4 + $0xf78] sm:$0xff] }
 0x3ab   :  { %3186 = vmatpush.msrb.mxu2 %v2850_v37  ;;  %3245 = vmatpush.msrb.mxu0 %v2719_v1  ;;  %v2771_v37 = vld [vmem:[#allocation4 + $0x1178] sm:$0xff] }
 0x3ac   :  { %3274 = vmatpush.msrb.mxu1 %v2783_v19  ;;  %v2703_v1 = vld [vmem:[#allocation4 + $0xf58] sm:$0xff] }
 0x3ad   :  { %3187 = vmatpush.msrb.mxu2 %v2846_v20  ;;  %3246 = vmatpush.msrb.mxu0 %v2715_v26  ;;  %v2767_v26 = vld [vmem:[#allocation4 + $0x1158] sm:$0xff] }
 0x3ae   :  { %3031 = vmatmul.f32.gmra.mxu0 %v5365_v2  ;;  %3060 = vmatmul.f32.gmra.mxu1 %v5368_v11 }
 0x3af   :  { %v5408_v48 = vpop.f32.mrf.mxu3  ;;  %3275 = vmatpush.msrb.mxu1 %v2779_v63  ;;  %3188 = vmatpush.msrb.mxu2 %v2842_v33  ;;  %v2830_v63 = vld [vmem:[#allocation4 + $0x1350] sm:$0xff]  ;;  %v2699_v33 = vld [vmem:[#allocation4 + $0xf38] sm:$0xff] }
 0x3b0   :  { %4037 = vmatmul.msk.f32.gmra.mxu3 %vm1573_vm3, %v5408_v48  ;;  %3247 = vmatpush.msrb.mxu0 %v2711_v8  ;;  %v2882_v8 = vld [vmem:[#allocation4 + $0x14f0] sm:$0xff] }
 0x3b1   :  { %v5406_v41 = vpop.f32.mrf.mxu2  ;;  %3276 = vmatpush.msrb.mxu1 %v2775_v30  ;;  %3189 = vmatpush.msrb.mxu2 %v2838_v61  ;;  %v2763_v30 = vld [vmem:[#allocation4 + $0x1138] sm:$0xff]  ;;  %v2826_v61 = vld [vmem:[#allocation4 + $0x1330] sm:$0xff] }
 0x3b2   :  { %2973 = vmatmul.f32.gmra.mxu2 %v5406_v41  ;;  %3248 = vmatpush.msrb.mxu0 %v2707_v31  ;;  %v2878_v31 = vld [vmem:[#allocation4 + $0x14d0] sm:$0xff] }
 0x3b3   :  { %3277 = vmatpush.msrb.mxu1 %v2771_v37  ;;  %3190 = vmatpush.msrb.mxu2 %v2834_v39  ;;  %v2759_v37 = vld [vmem:[#allocation4 + $0x1118] sm:$0xff] }
 0x3b4   :  { %3249 = vmatpush.msrb.mxu0 %v2703_v1  ;;  %3223 = vmatpush.msrb.mxu3 %v2882_v8  ;;  %v2755_v39 = vld [vmem:[#allocation4 + $0x10f8] sm:$0xff] }
 0x3b5   :  { %3278 = vmatpush.msrb.mxu1 %v2767_v26  ;;  %3191 = vmatpush.msrb.mxu2 %v2830_v63  ;;  %v2818_v63 = vld [vmem:[#allocation4 + $0x12f0] sm:$0xff]  ;;  %v2687_v8 = vld [vmem:[#allocation4 + $0xed8] sm:$0xff] }
 0x3b6   :  { %3034 = vmatmul.f32.gmra.mxu0 %v5375_v57  ;;  %3063 = vmatmul.f32.gmra.mxu1 %v5378_v52 }
 0x3b7   :  { %v5417_v20 = vpop.f32.mrf.mxu3  ;;  %3250 = vmatpush.msrb.mxu0 %v2699_v33  ;;  %3279 = vmatpush.msrb.mxu1 %v2763_v30  ;;  %v2874_v33 = vld [vmem:[#allocation4 + $0x14b0] sm:$0xff] }
 0x3b8   :  { %4038 = vmatmul.msk.f32.gmra.mxu3 %vm1573_vm3, %v5417_v20  ;;  %3192 = vmatpush.msrb.mxu2 %v2826_v61  ;;  %v2814_v30 = vld [vmem:[#allocation4 + $0x12d0] sm:$0xff]  ;;  %v2683_v61 = vld [vmem:[#allocation4 + $0xeb8] sm:$0xff] }
 0x3b9   :  { %v5415_v19 = vpop.f32.mrf.mxu2  ;;  %3251 = vmatpush.msrb.mxu0 %v2695_v59  ;;  %3224 = vmatpush.msrb.mxu3 %v2878_v31  ;;  %v2751_v59 = vld [vmem:[#allocation4 + $0x10d8] sm:$0xff] }
 0x3ba   :  { %2976 = vmatmul.f32.gmra.mxu2 %v5415_v19  ;;  %3280 = vmatpush.msrb.mxu1 %v2759_v37  ;;  %v2747_v31 = vld [vmem:[#allocation4 + $0x10b8] sm:$0xff]  ;;  %v2810_v37 = vld [vmem:[#allocation4 + $0x12b0] sm:$0xff] }
 0x3bb   :  { %3193 = vmatpush.msrb.mxu2 %v2822_v17  ;;  %3252 = vmatpush.msrb.mxu0 %v2691_v0  ;;  %v2679_v17 = vld [vmem:[#allocation4 + $0xe98] sm:$0xff]  ;;  %v2806_v0 = vld [vmem:[#allocation4 + $0x1290] sm:$0xff] }
 0x3bc   :  { %3281 = vmatpush.msrb.mxu1 %v2755_v39  ;;  %3225 = vmatpush.msrb.mxu3 %v2874_v33  ;;  %v2870_v39 = vld [vmem:[#allocation4 + $0x1490] sm:$0xff] }
 0x3bd   :  { %3194 = vmatpush.msrb.mxu2 %v2818_v63  ;;  %3253 = vmatpush.msrb.mxu0 %v2687_v8  ;;  %v2675_v63 = vld [vmem:[#allocation4 + $0xe78] sm:$0xff]  ;;  %v2802_v33 = vld [vmem:[#allocation4 + $0x1270] sm:$0xff] }
 0x3be   :  { %3037 = vmatmul.f32.gmra.mxu0 %v5385_v46  ;;  %3066 = vmatmul.f32.gmra.mxu1 %v5388_v3  ;;  %v2866_v8 = vld [vmem:[#allocation4 + $0x1470] sm:$0xff] }
 0x3bf   :  { %v5426_v26 = vpop.f32.mrf.mxu3  ;;  %3282 = vmatpush.msrb.mxu1 %v2751_v59  ;;  %3195 = vmatpush.msrb.mxu2 %v2814_v30  ;;  %v2735_v59 = vld [vmem:[#allocation4 + $0x1058] sm:$0xff] }
 0x3c0   :  { %4039 = vmatmul.msk.f32.gmra.mxu3 %vm1573_vm3, %v5426_v26  ;;  %3254 = vmatpush.msrb.mxu0 %v2683_v61  ;;  %v2671_v30 = vld [vmem:[#allocation4 + $0xe58] sm:$0xff]  ;;  %v2798_v61 = vld [vmem:[#allocation4 + $0x1250] sm:$0xff] }
 0x3c1   :  { %v5424_v1 = vpop.f32.mrf.mxu2  ;;  %3283 = vmatpush.msrb.mxu1 %v2747_v31  ;;  %3196 = vmatpush.msrb.mxu2 %v2810_v37  ;;  %v2862_v31 = vld [vmem:[#allocation4 + $0x1450] sm:$0xff]  ;;  %v2731_v37 = vld [vmem:[#allocation4 + $0x1038] sm:$0xff] }
 0x3c2   :  { %2979 = vmatmul.f32.gmra.mxu2 %v5424_v1  ;;  %3255 = vmatpush.msrb.mxu0 %v2679_v17  ;;  %v2794_v17 = vld [vmem:[#allocation4 + $0x1230] sm:$0xff] }
 0x3c3   :  { %3284 = vmatpush.msrb.mxu1 %v2743_v21  ;;  %3197 = vmatpush.msrb.mxu2 %v2806_v0  ;;  %v2667_v21 = vld [vmem:[#allocation4 + $0xe38] sm:$0xff]  ;;  %v2858_v0 = vld [vmem:[#allocation4 + $0x1430] sm:$0xff] }
 0x3c4   :  { %3226 = vmatpush.msrb.mxu3 %v2870_v39  ;;  %3256 = vmatpush.msrb.mxu0 %v2675_v63  ;;  %v2727_v39 = vld [vmem:[#allocation4 + $0x1018] sm:$0xff]  ;;  %v2790_v63 = vld [vmem:[#allocation4 + $0x1210] sm:$0xff] }
 0x3c5   :  { %3285 = vmatpush.msrb.mxu1 %v2739_v34  ;;  %3198 = vmatpush.msrb.mxu2 %v2802_v33  ;;  %v2663_v34 = vld [vmem:[#allocation4 + $0xe18] sm:$0xff]  ;;  %v2854_v33 = vld [vmem:[#allocation4 + $0x1410] sm:$0xff] }
 0x3c6   :  { %3144 = vmatmul.f32.vlgmr.msra.gmra.mxu0 %v5355_v51  ;;  %3173 = vmatmul.f32.vlgmr.msra.gmra.mxu1 %v5358_v18 }
 0x3c7   :  { %3227 = vmatpush.msrb.mxu3 %v2866_v8  ;;  %3286 = vmatpush.msrb.mxu1 %v2735_v59  ;;  %v2851_v8 = vld [vmem:[#allocation4 + $0x13f8] sm:$0xff] }
 0x3c8   :  { %4040 = vmatmul.msk.f32.vlgmr.msra.gmra.mxu3 %vm1573_vm3, %v5399_v55  ;;  %3257 = vmatpush.msrb.mxu0 %v2671_v30  ;;  %v2847_v59 = vld [vmem:[#allocation4 + $0x13d8] sm:$0xff] }
 0x3c9   :  { %3199 = vmatpush.msrb.mxu2 %v2798_v61  ;;  %3228 = vmatpush.msrb.mxu3 %v2862_v31  ;;  %v2843_v30 = vld [vmem:[#allocation4 + $0x13b8] sm:$0xff] }
 0x3ca   :  { %3086 = vmatmul.f32.vlgmr.msra.gmra.mxu2 %v5397_v22  ;;  %3258 = vmatpush.msrb.mxu0 %v2667_v21  ;;  %v2839_v61 = vld [vmem:[#allocation4 + $0x1398] sm:$0xff] }
 0x3cb   :  { %3287 = vmatpush.msrb.mxu1 %v2731_v37  ;;  %3200 = vmatpush.msrb.mxu2 %v2794_v17  ;;  %v2883_v31 = vld [vmem:[#allocation4 + $0x14f8] sm:$0xff] }
 0x3cc   :  { %3229 = vmatpush.msrb.mxu3 %v2858_v0  ;;  %3259 = vmatpush.msrb.mxu0 %v2663_v34  ;;  %v2879_v21 = vld [vmem:[#allocation4 + $0x14d8] sm:$0xff] }
 0x3cd   :  { %3288 = vmatpush.msrb.mxu1 %v2727_v39  ;;  %3201 = vmatpush.msrb.mxu2 %v2790_v63  ;;  %v2835_v37 = vld [vmem:[#allocation4 + $0x1378] sm:$0xff] }
 0x3ce   :  { %3147 = vmatmul.f32.gmra.mxu0 %v5365_v2  ;;  %3176 = vmatmul.f32.gmra.mxu1 %v5368_v11  ;;  %v2875_v17 = vld [vmem:[#allocation4 + $0x14b8] sm:$0xff] }
 0x3cf   :  { %3230 = vmatpush.msrb.mxu3 %v2854_v33  ;;  %3302 = vmatpush.msra.mxu2 %v2851_v8  ;;  %v2831_v0 = vld [vmem:[#allocation4 + $0x1358] sm:$0xff] }
 0x3d0   :  { %4041 = vmatmul.msk.f32.gmra.mxu3 %vm1573_vm3, %v5408_v48  ;;  %v2827_v34 = vld [vmem:[#allocation4 + $0x1338] sm:$0xff] }
 0x3d1   :  { %3303 = vmatpush.msra.mxu2 %v2847_v59  ;;  %3339 = vmatpush.msra.mxu3 %v2883_v31  ;;  %v2871_v39 = vld [vmem:[#allocation4 + $0x1498] sm:$0xff] }
 0x3d2   :  { %3089 = vmatmul.f32.gmra.mxu2 %v5406_v41  ;;  %v2823_v63 = vld [vmem:[#allocation4 + $0x1318] sm:$0xff] }
 0x3d3   :  { %3304 = vmatpush.msra.mxu2 %v2843_v30  ;;  %3340 = vmatpush.msra.mxu3 %v2879_v21  ;;  %v2867_v33 = vld [vmem:[#allocation4 + $0x1478] sm:$0xff] }
 0x3d4   :  { %v2819_v8 = vld [vmem:[#allocation4 + $0x12f8] sm:$0xff] }
 0x3d5   :  { %3305 = vmatpush.msra.mxu2 %v2839_v61  ;;  %3341 = vmatpush.msra.mxu3 %v2875_v17  ;;  %v2863_v59 = vld [vmem:[#allocation4 + $0x1458] sm:$0xff] }
 0x3d6   :  { %3150 = vmatmul.f32.gmra.mxu0 %v5375_v57  ;;  %3179 = vmatmul.f32.gmra.mxu1 %v5378_v52  ;;  %v2815_v30 = vld [vmem:[#allocation4 + $0x12d8] sm:$0xff] }
 0x3d7   :  { %3306 = vmatpush.msra.mxu2 %v2835_v37  ;;  %3342 = vmatpush.msra.mxu3 %v2871_v39  ;;  %v2859_v61 = vld [vmem:[#allocation4 + $0x1438] sm:$0xff] }
 0x3d8   :  { %4042 = vmatmul.msk.f32.gmra.mxu3 %vm1573_vm3, %v5417_v20  ;;  %v2811_v31 = vld [vmem:[#allocation4 + $0x12b8] sm:$0xff] }
 0x3d9   :  { %3307 = vmatpush.msra.mxu2 %v2831_v0  ;;  %3343 = vmatpush.msra.mxu3 %v2867_v33  ;;  %v2855_v21 = vld [vmem:[#allocation4 + $0x1418] sm:$0xff] }
 0x3da   :  { %3092 = vmatmul.f32.gmra.mxu2 %v5415_v19  ;;  %v2807_v37 = vld [vmem:[#allocation4 + $0x1298] sm:$0xff] }
 0x3db   :  { %3308 = vmatpush.msra.mxu2 %v2827_v34  ;;  %3344 = vmatpush.msra.mxu3 %v2863_v59  ;;  %v2803_v17 = vld [vmem:[#allocation4 + $0x1278] sm:$0xff] }
 0x3dc   :  { %v2791_v0 = vld [vmem:[#allocation4 + $0x1218] sm:$0xff] }
 0x3dd   :  { %3309 = vmatpush.msra.mxu2 %v2823_v63  ;;  %3345 = vmatpush.msra.mxu3 %v2859_v61 }
 0x3de   :  { %3153 = vmatmul.f32.gmra.mxu0 %v5385_v46  ;;  %3182 = vmatmul.f32.gmra.mxu1 %v5388_v3 }
 0x3df   :  { %3310 = vmatpush.msra.mxu2 %v2819_v8  ;;  %3346 = vmatpush.msra.mxu3 %v2855_v21 }
 0x3e0   :  { %4043 = vmatmul.msk.f32.gmra.mxu3 %vm1573_vm3, %v5426_v26 }
 0x3e1   :  { %3311 = vmatpush.msra.mxu2 %v2815_v30 }
 0x3e2   :  { %3095 = vmatmul.f32.gmra.mxu2 %v5424_v1 }
 0x3e3   :  { %3312 = vmatpush.msra.mxu2 %v2811_v31 }
 0x3e5   :  { %3313 = vmatpush.msra.mxu2 %v2807_v37 }
 0x3e6   :  { %3260 = vmatmul.f32.vlgmr.msrb.gmra.mxu0 %v5355_v51  ;;  %3289 = vmatmul.f32.vlgmr.msrb.gmra.mxu1 %v5358_v18  ;;  %v2799_v51 = vld [vmem:[#allocation4 + $0x1258] sm:$0xff] }
 0x3e7   :  { %3314 = vmatpush.msra.mxu2 %v2803_v17  ;;  %v2795_v18 = vld [vmem:[#allocation4 + $0x1238] sm:$0xff] }
 0x3e8   :  { %4044 = vmatmul.msk.f32.vlgmr.msrb.gmra.mxu3 %vm1573_vm3, %v5399_v55 }
 0x3e9   :  { %3315 = vmatpush.msra.mxu2 %v2799_v51 }
 0x3ea   :  { %3202 = vmatmul.f32.vlgmr.msrb.gmra.mxu2 %v5397_v22 }
 0x3eb   :  { %3316 = vmatpush.msra.mxu2 %v2795_v18 }
 0x3ed   :  { %3317 = vmatpush.msra.mxu2 %v2791_v0 }
 0x3ee   :  { %3263 = vmatmul.f32.gmra.mxu0 %v5365_v2  ;;  %3292 = vmatmul.f32.gmra.mxu1 %v5368_v11 }
 0x3f0   :  { %4045 = vmatmul.msk.f32.gmra.mxu3 %vm1573_vm3, %v5408_v48 }
 0x3f2   :  { %3205 = vmatmul.f32.gmra.mxu2 %v5406_v41 }
 0x3f6   :  { %3266 = vmatmul.f32.gmra.mxu0 %v5375_v57  ;;  %3295 = vmatmul.f32.gmra.mxu1 %v5378_v52 }
 0x3f8   :  { %4046 = vmatmul.msk.f32.gmra.mxu3 %vm1573_vm3, %v5417_v20 }
 0x3fa   :  { %3208 = vmatmul.f32.gmra.mxu2 %v5415_v19 }
 0x3fe   :  { %3269 = vmatmul.f32.gmra.mxu0 %v5385_v46  ;;  %3298 = vmatmul.f32.gmra.mxu1 %v5388_v3 }
 0x400   :  { %4047 = vmatmul.msk.f32.gmra.mxu3 %vm1573_vm3, %v5426_v26 }
 0x402   :  { %3211 = vmatmul.f32.gmra.mxu2 %v5424_v1 }
 0x403   :  { %v2913_v2 = vpop.f32.mrf.mxu0  ;;  %v2942_v11 = vpop.f32.mrf.mxu1 }
 0x404   :  { %v2943_v21 = vadd.f32 %v2942_v11, %v2913_v2 }
 0x408   :  { %4048 = vmatmul.msk.f32.vlgmr.msra.gmra.mxu3 %vm1573_vm3, %v5399_v55 }
 0x40a   :  { %3318 = vmatmul.f32.vlgmr.msra.gmra.mxu2 %v5397_v22 }
 0x40b   :  { %v2916_v46 = vpop.f32.mrf.mxu0  ;;  %v2945_v57 = vpop.f32.mrf.mxu1 }
 0x410   :  { %4049 = vmatmul.msk.f32.gmra.mxu3 %vm1573_vm3, %v5408_v48  ;;  %v1639_v48 = vadd.f32 %v4996_v23, %v4994_v32 }
 0x412   :  { %3321 = vmatmul.f32.gmra.mxu2 %v5406_v41  ;;  %v1668_v8 = vadd.f32 %v5040_v54, %v1639_v48 }
 0x413   :  { %v2919_v52 = vpop.f32.mrf.mxu0  ;;  %v2948_v3 = vpop.f32.mrf.mxu1 }
 0x414   :  { %v1697_v30 = vadd.f32 %v5042_v4, %v1668_v8  ;;  %v2946_v4 = vadd.f32 %v2945_v57, %v2916_v46 }
 0x418   :  { %4050 = vmatmul.msk.f32.gmra.mxu3 %vm1573_vm3, %v5417_v20  ;;  %v1636_v20 = vadd.f32 %v4988_v44, %v4986_v45 }
 0x41a   :  { %3324 = vmatmul.f32.gmra.mxu2 %v5415_v19  ;;  %v1665_v59 = vadd.f32 %v5027_v35, %v1636_v20 }
 0x41b   :  { %v2922_v22 = vpop.f32.mrf.mxu0  ;;  %v2951_v55 = vpop.f32.mrf.mxu1 }
 0x41c   :  { %v1694_v45 = vadd.f32 %v5029_v50, %v1665_v59 }
 0x420   :  { %4051 = vmatmul.msk.f32.gmra.mxu3 %vm1573_vm3, %v5426_v26  ;;  %v1633_v26 = vadd.f32 %v4979_v49, %v4977_v29  ;;  %v2083_v49 = vadd.f32 %v5207_v16, %v1694_v45  ;;  %v2952_v16 = vadd.f32 %v2951_v55, %v2922_v22  ;;  %v5521_v55 = vld [vmem:[#allocation7] sm:$0xf]  ;;  %v5873_v45 = vld [vmem:[#allocation17_spill] sm:$0xff] }
 0x422   :  { %3327 = vmatmul.f32.gmra.mxu2 %v5424_v1  ;;  %v1642_v1 = vadd.f32 %v5003_v43, %v5001_v47  ;;  %v1662_v23 = vadd.f32 %v5016_v5, %v1633_v26  ;;  %v2086_v47 = vadd.f32 %v5220_v12, %v1697_v30  ;;  %v2949_v43 = vadd.f32 %v2948_v3, %v2919_v52 }
 0x423   :  { %v5485_v39 = vpop.f32.mrf.mxu0  ;;  %v5487_v19 = vpop.f32.mrf.mxu1  ;;  %v2112_v37 = vadd.f32 %v5209_v36, %v2083_v49  ;;  %v5875_v49 = vld [vmem:[#allocation37_spill] sm:$0xff] }
 0x424   :  { %v1671_v32 = vadd.f32 %v5052_v58, %v1642_v1  ;;  %v5871_v58 = vld [vmem:[#allocation18_spill] sm:$0xff] }
 0x425   :  { %v1691_v31 = vadd.f32 %v5871_v58, %v1662_v23  ;;  %v2141_v0 = vadd.f32 %v5267_v10, %v2112_v37 }
 0x426   :  { %v1700_v44 = vadd.f32 %v5054_v27, %v1671_v32  ;;  %v2115_v27 = vadd.f32 %v5222_v24, %v2086_v47 }
 0x427   :  { %v2080_v50 = vadd.f32 %v5193_v9, %v1691_v31  ;;  %v2170_v22 = vadd.f32 %v5263_v53, %v2141_v0  ;;  %v5876_v31 = vld [vmem:[#allocation25_spill] sm:$0xff] }
 0x428   :  { %v2089_v5 = vadd.f32 %v5233_v62, %v1700_v44  ;;  %v2144_v51 = vadd.f32 %v5277_v13, %v2115_v27  ;;  %v5878_v27 = vld [vmem:[#allocation19_spill] sm:$0xff] }
 0x429   :  { %v2109_v52 = vadd.f32 %v5196_v14, %v2080_v50 }
 0x42a   :  { %v2118_v17 = vadd.f32 %v5235_v7, %v2089_v5  ;;  %v2173_v36 = vadd.f32 %v5273_v60, %v2144_v51  ;;  %v5877_v5 = vld [vmem:[#allocation35_spill] sm:$0xff]  ;;  %v5880_v51 = vld [vmem:[#allocation34_spill] sm:$0xff] }
 0x42b   :  { %v3000_v34 = vpop.f32.mrf.mxu3  ;;  %v5503_v61 = vpop.f32.mrf.mxu0  ;;  %v2138_v2 = vadd.f32 %v5253_v38, %v2109_v52  ;;  %v3378_v38 = vperm.slane %v5521_v55, 0 }
 0x42c   :  { %v5505_v29 = vpop.f32.mrf.mxu1  ;;  %v2147_v62 = vadd.f32 %v5287_v56, %v2118_v17 }
 0x42d   :  { %v2971_v41 = vpop.f32.mrf.mxu2  ;;  %v2167_v48 = vadd.f32 %v5255_v42, %v2138_v2  ;;  %v5872_v42 = vld [vmem:[#allocation38_spill] sm:$0xff]  ;;  %v5884_v2 = vld [vmem:[#allocation39_spill] sm:$0xff] }
 0x42e   :  { %v2972_v46 = vadd.f32 %v2971_v41, %v2943_v21  ;;  %v2176_v14 = vadd.f32 %v5285_v40, %v2147_v62  ;;  %v1755_v44 = vadd.f32 %v5873_v45, %v5872_v42  ;;  %v5879_v21 = vld [vmem:[#allocation27_spill] sm:$0xff]  ;;  %v5881_v62 = vld [vmem:[#allocation42_spill] sm:$0xff]  ;;  %v5894_v45 = vld [vmem:[#allocation85_spill] sm:$0xff] }
 0x430   :  { %v3001_v10 = vadd.f32 %v3000_v34, %v2972_v46  ;;  %v1784_v50 = vadd.f32 %v5092_v28, %v1755_v44 }
 0x432   :  { %v3360_v60 = vadd.f32 %v3001_v10, %v2167_v48 }
 0x433   :  { %v3003_v33 = vpop.f32.mrf.mxu3  ;;  %v3035_v7 = vpop.f32.mrf.mxu0 }
 0x434   :  { %v3064_v3 = vpop.f32.mrf.mxu1  ;;  %v3386_v34 = vadd.f32 %v3378_v38, %v3360_v60 }
 0x435   :  { %v2974_v63 = vpop.f32.mrf.mxu2  ;;  %v3065_v10 = vadd.f32 %v3064_v3, %v3035_v7  ;;  %v5893_v3 = vld [vmem:[#allocation76_spill] sm:$0xff] }
 0x436   :  { %v2975_v18 = vadd.f32 %v2974_v63, %v2946_v4  ;;  %v3402_v47 = vmax.f32 %v3386_v34, 0.0  ;;  %v1758_v4 = vadd.f32 %v5877_v5, %v5876_v31  ;;  %v5895_v5 = vld [vmem:[#allocation72_spill] sm:$0xff] }
 0x438   :  { %v3004_v11 = vadd.f32 %v3003_v33, %v2975_v18  ;;  %v1787_v17 = vadd.f32 %v5112_v15, %v1758_v4  ;;  %v1813_v18 = vadd.f32 %v5090_v25, %v1784_v50  ;;  %v5887_v25 = vld [vmem:[#allocation62_spill] sm:$0xff]  ;;  %v5896_v50 = vld [vmem:[#allocation81_spill] sm:$0xff] }
 0x43a   :  { %v3364_v20 = vadd.f32 %v3004_v11, %v2170_v22  ;;  %v5885_v11 = vld [vmem:[#allocation64_spill] sm:$0xff] }
 0x43b   :  { %v3006_v54 = vpop.f32.mrf.mxu3  ;;  %v3038_v32 = vpop.f32.mrf.mxu0  ;;  %v5886_v22 = vld [vmem:[#allocation68_spill] sm:$0xff] }
 0x43c   :  { %v3390_v53 = vadd.f32 %v3378_v38, %v3364_v20  ;;  %v3067_v23 = vpop.f32.mrf.mxu1  ;;  %v3062_v20 = vadd.f32 %v5505_v29, %v5503_v61 }
 0x43d   :  { %v2977_v35 = vpop.f32.mrf.mxu2 }
 0x43e   :  { %v2978_v12 = vadd.f32 %v2977_v35, %v2949_v43  ;;  %v3406_v30 = vmax.f32 %v3390_v53, 0.0  ;;  %v5874_v43 = vld [vmem:[#allocation26_spill] sm:$0xff] }
 0x43f   :  { %v1752_v35 = vadd.f32 %v5875_v49, %v5874_v43 }
 0x440   :  { %v3007_v9 = vadd.f32 %v3006_v54, %v2978_v12  ;;  %v1749_v12 = vadd.f32 %v5879_v21, %v5878_v27 }
 0x441   :  { %v1781_v37 = vadd.f32 %v5078_v6, %v1752_v35 }
 0x442   :  { %v3368_v56 = vadd.f32 %v3007_v9, %v2173_v36  ;;  %v5882_v9 = vld [vmem:[#allocation47_spill] sm:$0xff] }
 0x443   :  { %v3009_v24 = vpop.f32.mrf.mxu3  ;;  %v5540_v0 = vpop.f32.mrf.mxu0  ;;  %v1810_v46 = vadd.f32 %v5881_v62, %v1781_v37  ;;  %v1816_v28 = vadd.f32 %v5882_v9, %v1787_v17  ;;  %v3379_v62 = vperm.slane %v5521_v55, 1 }
 0x444   :  { %v3394_v33 = vadd.f32 %v3378_v38, %v3368_v56  ;;  %v5542_v52 = vpop.f32.mrf.mxu1 }
 0x445   :  { %v2980_v57 = vpop.f32.mrf.mxu2  ;;  %v2199_v6 = vadd.f32 %v5885_v11, %v1810_v46 }
 0x446   :  { %v2981_v13 = vadd.f32 %v2980_v57, %v2952_v16  ;;  %v3410_v40 = vmax.f32 %v3394_v33, 0.0  ;;  %v1778_v16 = vadd.f32 %v5880_v51, %v1749_v12  ;;  %v5883_v57 = vld [vmem:[#allocation66_spill] sm:$0xff]  ;;  %v5898_v12 = vld [vmem:[#allocation84_spill] sm:$0xff] }
 0x448   :  { %v3010_v41 = vadd.f32 %v3009_v24, %v2981_v13  ;;  %v2202_v24 = vadd.f32 %v5883_v57, %v1813_v18  ;;  %v1807_v36 = vadd.f32 %v5884_v2, %v1778_v16 }
 0x44a   :  { %v3372_v1 = vadd.f32 %v3010_v41, %v2176_v14  ;;  %v2205_v14 = vadd.f32 %v5886_v22, %v1816_v28  ;;  %v2196_v56 = vadd.f32 %v5887_v25, %v1807_v36  ;;  %v5888_v41 = vld [vmem:[#allocation67_spill] sm:$0xff]  ;;  %v5901_v22 = vld [vmem:[#allocation44_spill] sm:$0xff] }
 0x44b   :  { %v3116_v8 = vpop.f32.mrf.mxu3  ;;  %v2231_v48 = vadd.f32 %v5888_v41, %v2202_v24  ;;  %v3148_v61 = vpop.f32.mrf.mxu0  ;;  %v5902_v25 = vld [vmem:[#allocation40_spill] sm:$0xff] }
 0x44c   :  { %v3398_v63 = vadd.f32 %v3378_v38, %v3372_v1  ;;  %v5889_v38 = vld [vmem:[#allocation65_spill] sm:$0xff]  ;;  %v3177_v29 = vpop.f32.mrf.mxu1 }
 0x44d   :  { %v3087_v26 = vpop.f32.mrf.mxu2  ;;  %v2228_v60 = vadd.f32 %v5889_v38, %v2199_v6 }
 0x44e   :  { %v3414_v59 = vmax.f32 %v3398_v63, 0.0  ;;  %v5890_v63 = vld [vmem:[#allocation69_spill] sm:$0xff] }
 0x44f   :  { %v2234_v33 = vadd.f32 %v5890_v63, %v2205_v14  ;;  %v2257_v42 = vadd.f32 %v5893_v3, %v2228_v60  ;;  %v5906_v63 = vld [vmem:[#allocation58_spill] sm:$0xff] }
 0x450   :  { %4052 = vmatpush.msk.msra.mxu0 %vm204_vm0, %v3414_v59  ;;  %v5891_v59 = vld [vmem:[#allocation80_spill] sm:$0xff] }
 0x451   :  { %v2260_v53 = vadd.f32 %v5891_v59, %v2231_v48  ;;  %v2263_v44 = vadd.f32 %v5894_v45, %v2234_v33  ;;  %v5904_v48 = vld [vmem:[#allocation45_spill] sm:$0xff]  ;;  %v5907_v59 = vld [vmem:[#allocation54_spill] sm:$0xff] }
 0x452   :  { %3451 = vmatpush.msra.mxu0 %v3410_v40  ;;  %v3059_v40 = vadd.f32 %v5487_v19, %v5485_v39  ;;  %v5897_v19 = vld [vmem:[#allocation77_spill] sm:$0xff] }
 0x453   :  { %v3119_v58 = vpop.f32.mrf.mxu3  ;;  %v2289_v27 = vadd.f32 %v5896_v50, %v2260_v53  ;;  %v2292_v37 = vadd.f32 %v5898_v12, %v2263_v44  ;;  %v5911_v44 = vld [vmem:[#allocation50_spill] sm:$0xff] }
 0x454   :  { %3452 = vmatpush.msra.mxu0 %v3406_v30  ;;  %v5892_v30 = vld [vmem:[#allocation63_spill] sm:$0xff]  ;;  %v3088_v43 = vadd.f32 %v3087_v26, %v3059_v40  ;;  %v3180_v2 = vpop.f32.mrf.mxu1  ;;  %v5915_v50 = vld [vmem:[#allocation78_spill] sm:$0xff] }
 0x455   :  { %v3090_v54 = vpop.f32.mrf.mxu2  ;;  %v2225_v7 = vadd.f32 %v5892_v30, %v2196_v56  ;;  %v5903_v56 = vld [vmem:[#allocation41_spill] sm:$0xff]  ;;  %v5908_v40 = vld [vmem:[#allocation23_spill] sm:$0xff]  ;;  %v5909_v30 = vld [vmem:[#allocation36_spill] sm:$0xff] }
 0x456   :  { %3453 = vmatpush.msra.mxu0 %v3402_v47  ;;  %v3091_v34 = vadd.f32 %v3090_v54, %v3062_v20  ;;  %v3068_v47 = vadd.f32 %v3067_v23, %v3038_v32  ;;  %v2286_v54 = vadd.f32 %v5897_v19, %v2257_v42  ;;  %v3117_v17 = vadd.f32 %v3116_v8, %v3088_v43  ;;  %v5899_v32 = vld [vmem:[#allocation73_spill] sm:$0xff]  ;;  %v5905_v20 = vld [vmem:[#allocation46_spill] sm:$0xff]  ;;  %v5912_v43 = vld [vmem:[#allocation59_spill] sm:$0xff] }
 0x457   :  { %v2254_v4 = vadd.f32 %v5895_v5, %v2225_v7  ;;  %v1868_v41 = vadd.f32 %v5903_v56, %v5902_v25  ;;  %v5910_v7 = vld [vmem:[#allocation33_spill] sm:$0xff]  ;;  %v5914_v5 = vld [vmem:[#allocation31_spill] sm:$0xff]  ;;  %v5917_v19 = vld [vmem:[#allocation82_spill] sm:$0xff] }
 0x458   :  { %v3120_v21 = vadd.f32 %v3119_v58, %v3091_v34  ;;  %v3151_v58 = vpop.f32.mrf.mxu0  ;;  %v1865_v3 = vadd.f32 %v5910_v7, %v5909_v30  ;;  %v5606_v7 = vld [vmem:[#allocation10] sm:$0xff] }
 0x459   :  { %v2283_v26 = vadd.f32 %v5899_v32, %v2254_v4  ;;  %v1897_v53 = vadd.f32 %v5907_v59, %v1868_v41  ;;  %v5919_v32 = vld [vmem:[#allocation70_spill] sm:$0xff]  ;;  %v5928_v59 = vld [vmem:[#allocation97_spill] sm:$0xff]  ;;  %4053 = vmatmul.msk.f32.vlgmr.msra.gmra.mxu0 %vm182_vm1, %v5606_v7 }
 0x45a   :  { %v3365_v23 = vadd.f32 %v3120_v21, %v2286_v54  ;;  %v5916_v21 = vld [vmem:[#allocation74_spill] sm:$0xff] }
 0x45b   :  { %v3122_v15 = vpop.f32.mrf.mxu3  ;;  %v3361_v46 = vadd.f32 %v3117_v17, %v2283_v26  ;;  %v5918_v17 = vld [vmem:[#allocation51_spill] sm:$0xff] }
 0x45c   :  { %v3391_v11 = vadd.f32 %v3379_v62, %v3365_v23  ;;  %v3183_v45 = vpop.f32.mrf.mxu1  ;;  %v5920_v23 = vld [vmem:[#allocation79_spill] sm:$0xff] }
 0x45d   :  { %v3093_v13 = vpop.f32.mrf.mxu2  ;;  %v3387_v6 = vadd.f32 %v3379_v62, %v3361_v46 }
 0x45e   :  { %v3094_v1 = vadd.f32 %v3093_v13, %v3065_v10  ;;  %v3407_v13 = vmax.f32 %v3391_v11, 0.0 }
 0x45f   :  { %v3403_v10 = vmax.f32 %v3387_v6, 0.0 }
 0x460   :  { %v3123_v49 = vadd.f32 %v3122_v15, %v3094_v1  ;;  %v5900_v15 = vld [vmem:[#allocation43_spill] sm:$0xff]  ;;  %v1874_v1 = vadd.f32 %v5905_v20, %v5904_v48  ;;  %v3154_v42 = vpop.f32.mrf.mxu0 }
 0x461   :  { %v1871_v14 = vadd.f32 %v5901_v22, %v5900_v15  ;;  %v3184_v56 = vadd.f32 %v3183_v45, %v3154_v42 }
 0x462   :  { %v3369_v51 = vadd.f32 %v3123_v49, %v2289_v27  ;;  %v1903_v34 = vadd.f32 %v5908_v40, %v1874_v1  ;;  %v5929_v40 = vld [vmem:[#allocation93_spill] sm:$0xff] }
 0x463   :  { %v3125_v31 = vpop.f32.mrf.mxu3  ;;  %v1900_v33 = vadd.f32 %v5906_v63, %v1871_v14  ;;  %v5927_v63 = vld [vmem:[#allocation89_spill] sm:$0xff] }
 0x464   :  { %v3395_v28 = vadd.f32 %v3379_v62, %v3369_v51  ;;  %v1932_v4 = vadd.f32 %v5914_v5, %v1903_v34  ;;  %v5597_v22 = vpop.f32.mrf.mxu1 }
 0x465   :  { %v3096_v35 = vpop.f32.mrf.mxu2  ;;  %v1929_v49 = vadd.f32 %v5912_v43, %v1900_v33  ;;  %v3380_v43 = vperm.slane %v5521_v55, 2 }
 0x466   :  { %v3097_v39 = vadd.f32 %v3096_v35, %v3068_v47  ;;  %v3411_v8 = vmax.f32 %v3395_v28, 0.0  ;;  %v1894_v47 = vadd.f32 %v5911_v44, %v1865_v3  ;;  %v5913_v35 = vld [vmem:[#allocation55_spill] sm:$0xff]  ;;  %v2321_v54 = vadd.f32 %v5917_v19, %v1932_v4 }
 0x467   :  { %v2318_v27 = vadd.f32 %v5915_v50, %v1929_v49 }
 0x468   :  { %v3126_v16 = vadd.f32 %v3125_v31, %v3097_v39  ;;  %v1926_v31 = vadd.f32 %v5913_v35, %v1897_v53  ;;  %v1923_v51 = vadd.f32 %v5918_v17, %v1894_v47  ;;  %v5595_v15 = vpop.f32.mrf.mxu0  ;;  %v5933_v17 = vld [vmem:[#allocation57_spill] sm:$0xff] }
 0x46a   :  { %v3373_v18 = vadd.f32 %v3126_v16, %v2292_v37  ;;  %v2315_v39 = vadd.f32 %v5916_v21, %v1926_v31  ;;  %v3181_v16 = vadd.f32 %v3180_v2, %v3151_v58  ;;  %v2312_v26 = vadd.f32 %v5919_v32, %v1923_v51  ;;  %v5924_v2 = vld [vmem:[#allocation92_spill] sm:$0xff] }
 0x46b   :  { %v3232_v24 = vpop.f32.mrf.mxu3  ;;  %v5934_v32 = vld [vmem:[#allocation52_spill] sm:$0xff] }
 0x46c   :  { %v3399_v9 = vadd.f32 %v3379_v62, %v3373_v18  ;;  %v2347_v18 = vadd.f32 %v5920_v23, %v2318_v27  ;;  %v3178_v62 = vadd.f32 %v3177_v29, %v3148_v61  ;;  %v5926_v61 = vld [vmem:[#allocation71_spill] sm:$0xff]  ;;  %v3293_v31 = vpop.f32.mrf.mxu1 }
 0x46d   :  { %v3203_v57 = vpop.f32.mrf.mxu2  ;;  %v2341_v29 = vadd.f32 %v5926_v61, %v2312_v26  ;;  %v5935_v26 = vld [vmem:[#allocation53_spill] sm:$0xff] }
 0x46e   :  { %v3415_v36 = vmax.f32 %v3399_v9, 0.0  ;;  %v5921_v9 = vld [vmem:[#allocation75_spill] sm:$0xff]  ;;  %v1984_v23 = vadd.f32 %v5935_v26, %v5934_v32  ;;  %v5955_v26 = vld [vmem:[#allocation106_spill] sm:$0xff] }
 0x46f   :  { %v2344_v28 = vadd.f32 %v5921_v9, %v2315_v39  ;;  %v2370_v33 = vadd.f32 %v5927_v63, %v2341_v29  ;;  %v5618_v39 = vld [vmem:[#allocation10 + $0x8] sm:$0x3f]  ;;  %v3588_v32 = vld [vmem:[#allocation12 + $0x1d0] sm:$0xff] }
 0x470   :  { %4055 = vmatpush.msk.msra.mxu1 %vm204_vm0, %v3415_v36  ;;  %v5922_v36 = vld [vmem:[#allocation83_spill] sm:$0xff]  ;;  %v3264_v35 = vpop.f32.mrf.mxu0  ;;  %4054 = vmatmul.msk.f32.gmra.mxu0 %vm182_vm1, %v5618_v39  ;;  %v5943_v29 = vld [vmem:[#allocation24_spill] sm:$0xff] }
 0x471   :  { %v2350_v11 = vadd.f32 %v5922_v36, %v2321_v54  ;;  %v2373_v14 = vadd.f32 %v5924_v2, %v2344_v28  ;;  %v5938_v36 = vld [vmem:[#allocation29_spill] sm:$0xff]  ;;  %v5946_v63 = vld [vmem:[#allocation60_spill] sm:$0xff] }
 0x472   :  { %3474 = vmatpush.msra.mxu1 %v3411_v8  ;;  %v5923_v8 = vld [vmem:[#allocation96_spill] sm:$0xff] }
 0x473   :  { %v3235_v60 = vpop.f32.mrf.mxu3  ;;  %v2376_v6 = vadd.f32 %v5923_v8, %v2347_v18  ;;  %v2402_v34 = vadd.f32 %v5929_v40, %v2373_v14  ;;  %v5936_v18 = vld [vmem:[#allocation22_spill] sm:$0xff]  ;;  %v5939_v8 = vld [vmem:[#allocation48_spill] sm:$0xff]  ;;  %v5942_v14 = vld [vmem:[#allocation61_spill] sm:$0xff] }
 0x474   :  { %3475 = vmatpush.msra.mxu1 %v3407_v13  ;;  %v3175_v13 = vadd.f32 %v5542_v52, %v5540_v0  ;;  %v3296_v61 = vpop.f32.mrf.mxu1  ;;  %v5949_v40 = vld [vmem:[#allocation90_spill] sm:$0xff] }
 0x475   :  { %v3206_v38 = vpop.f32.mrf.mxu2  ;;  %v2405_v0 = vadd.f32 %v5928_v59, %v2376_v6  ;;  %v5940_v6 = vld [vmem:[#allocation49_spill] sm:$0xff]  ;;  %v5947_v59 = vld [vmem:[#allocation94_spill] sm:$0xff] }
 0x476   :  { %3476 = vmatpush.msra.mxu1 %v3403_v10  ;;  %v3207_v58 = vadd.f32 %v3206_v38, %v3178_v62  ;;  %v5925_v10 = vld [vmem:[#allocation100_spill] sm:$0xff]  ;;  %v3204_v41 = vadd.f32 %v3203_v57, %v3175_v13  ;;  %v5930_v38 = vld [vmem:[#allocation101_spill] sm:$0xff]  ;;  %v5937_v62 = vld [vmem:[#allocation30_spill] sm:$0xff]  ;;  %v1981_v13 = vadd.f32 %v5940_v6, %v5939_v8 }
 0x477   :  { %v2379_v25 = vadd.f32 %v5925_v10, %v2350_v11  ;;  %4056 = vmatmul.msk.f32.vlgmr.msra.gmra.mxu1 %vm182_vm1, %v5606_v7  ;;  %v5931_v57 = vld [vmem:[#allocation88_spill] sm:$0xff]  ;;  %v3554_v6 = vld [vmem:[#allocation12 + $0xc0] sm:$0xff] }
 0x478   :  { %v3236_v52 = vadd.f32 %v3235_v60, %v3207_v58  ;;  %v3233_v3 = vadd.f32 %v3232_v24, %v3204_v41  ;;  %v2399_v42 = vadd.f32 %v5931_v57, %v2370_v33  ;;  %v5941_v58 = vld [vmem:[#allocation28_spill] sm:$0xff]  ;;  %v5944_v41 = vld [vmem:[#allocation21_spill] sm:$0xff]  ;;  %v5951_v57 = vld [vmem:[#allocation86_spill] sm:$0xff] }
 0x479   :  { %v2408_v30 = vadd.f32 %v5930_v38, %v2379_v25  ;;  %v2013_v2 = vadd.f32 %v5941_v58, %v1984_v23  ;;  %v3267_v25 = vpop.f32.mrf.mxu0  ;;  %v5950_v38 = vld [vmem:[#allocation98_spill] sm:$0xff] }
 0x47a   :  { %v3366_v45 = vadd.f32 %v3236_v52, %v2402_v34  ;;  %v3362_v49 = vadd.f32 %v3233_v3, %v2399_v42  ;;  %v5948_v52 = vld [vmem:[#allocation32_spill] sm:$0xff] }
 0x47b   :  { %v3238_v37 = vpop.f32.mrf.mxu3 }
 0x47c   :  { %v3392_v21 = vadd.f32 %v3380_v43, %v3366_v45  ;;  %v3388_v54 = vadd.f32 %v3380_v43, %v3362_v49  ;;  %v3560_v45 = vld [vmem:[#allocation12 + $0xf0] sm:$0xff] }
 0x47d   :  { %v3209_v12 = vpop.f32.mrf.mxu2  ;;  %v5952_v49 = vld [vmem:[#allocation95_spill] sm:$0xff]  ;;  %3648 = vmatpush.msrb.mxu0 %v3560_v45  ;;  %v3381_v45 = vperm.slane %v5521_v55, 3 }
 0x47e   :  { %v3210_v46 = vadd.f32 %v3209_v12, %v3181_v16  ;;  %v3408_v12 = vmax.f32 %v3392_v21, 0.0  ;;  %v3404_v16 = vmax.f32 %v3388_v54, 0.0  ;;  %v3590_v21 = vld [vmem:[#allocation12 + $0x1e0] sm:$0xff]  ;;  %v3612_v55 = vld [vmem:[#allocation12 + $0x290] sm:$0xff] }
 0x47f   :  { %4057 = vmatmul.msk.f32.gmra.mxu1 %vm182_vm1, %v5618_v39 }
 0x480   :  { %v3239_v48 = vadd.f32 %v3238_v37, %v3210_v46  ;;  %v5932_v37 = vld [vmem:[#allocation56_spill] sm:$0xff]  ;;  %v1990_v46 = vadd.f32 %v5937_v62, %v5936_v18  ;;  %v3291_v18 = vadd.f32 %v5597_v22, %v5595_v15 }
 0x481   :  { %v1987_v51 = vadd.f32 %v5933_v17, %v5932_v37  ;;  %v3270_v17 = vpop.f32.mrf.mxu0 }
 0x482   :  { %v3370_v44 = vadd.f32 %v3239_v48, %v2405_v0  ;;  %v2019_v10 = vadd.f32 %v5942_v14, %v1990_v46  ;;  %v5957_v46 = vld [vmem:[#allocation104_spill] sm:$0xff] }
 0x483   :  { %v3241_v1 = vpop.f32.mrf.mxu3  ;;  %v2016_v11 = vadd.f32 %v5938_v36, %v1987_v51  ;;  %v3299_v51 = vpop.f32.mrf.mxu1 }
 0x484   :  { %v3396_v4 = vadd.f32 %v3380_v43, %v3370_v44  ;;  %v2048_v33 = vadd.f32 %v5946_v63, %v2019_v10  ;;  %v3300_v58 = vadd.f32 %v3299_v51, %v3270_v17  ;;  %v3624_v10 = vld [vmem:[#allocation12 + $0x2f0] sm:$0xff]  ;;  %v5961_v63 = vld [vmem:[#allocation105_spill] sm:$0xff] }
 0x485   :  { %v3212_v20 = vpop.f32.mrf.mxu2  ;;  %v2045_v48 = vadd.f32 %v5944_v41, %v2016_v11  ;;  %v5958_v11 = vld [vmem:[#allocation108_spill] sm:$0xff] }
 0x486   :  { %v3213_v53 = vadd.f32 %v3212_v20, %v3184_v56  ;;  %v3412_v19 = vmax.f32 %v3396_v4, 0.0  ;;  %v2010_v56 = vadd.f32 %v5943_v29, %v1981_v13  ;;  %v5945_v20 = vld [vmem:[#allocation20_spill] sm:$0xff]  ;;  %v3294_v4 = vadd.f32 %v3293_v31, %v3264_v35  ;;  %v5956_v35 = vld [vmem:[#allocation87_spill] sm:$0xff]  ;;  %v3586_v13 = vld [vmem:[#allocation12 + $0x1c0] sm:$0xff] }
 0x487   :  { %v2434_v0 = vadd.f32 %v5947_v59, %v2045_v48  ;;  %v3622_v29 = vld [vmem:[#allocation12 + $0x2e0] sm:$0xff] }
 0x488   :  { %v3242_v47 = vadd.f32 %v3241_v1, %v3213_v53  ;;  %v2042_v1 = vadd.f32 %v5945_v20, %v2013_v2  ;;  %v2039_v53 = vadd.f32 %v5948_v52, %v2010_v56  ;;  %v5960_v56 = vld [vmem:[#allocation107_spill] sm:$0xff]  ;;  %v3550_v52 = vld [vmem:[#allocation12 + $0xa0] sm:$0xff] }
 0x48a   :  { %v3374_v60 = vadd.f32 %v3242_v47, %v2408_v30  ;;  %v2431_v34 = vadd.f32 %v5949_v40, %v2042_v1  ;;  %v2437_v30 = vadd.f32 %v5950_v38, %v2048_v33  ;;  %v3297_v47 = vadd.f32 %v3296_v61, %v3267_v25  ;;  %v5959_v25 = vld [vmem:[#allocation102_spill] sm:$0xff]  ;;  %v3584_v61 = vld [vmem:[#allocation12 + $0x1b0] sm:$0xff]  ;;  %v5962_v33 = vld [vmem:[#allocation109_spill] sm:$0xff] }
 0x48b   :  { %v5616_v50 = vpop.f32.mrf.mxu3  ;;  %v2428_v42 = vadd.f32 %v5951_v57, %v2039_v53  ;;  %v3620_v1 = vld [vmem:[#allocation12 + $0x2d0] sm:$0xff]  ;;  %v3582_v53 = vld [vmem:[#allocation12 + $0x1a0] sm:$0xff] }
 0x48c   :  { %v3400_v5 = vadd.f32 %v3380_v43, %v3374_v60  ;;  %v3558_v60 = vld [vmem:[#allocation12 + $0xe0] sm:$0xff]  ;;  %v3592_v43 = vld [vmem:[#allocation12 + $0x1f0] sm:$0xff] }
 0x48d   :  { %v5614_v24 = vpop.f32.mrf.mxu2  ;;  %3671 = vmatpush.msrb.mxu1 %v3592_v43  ;;  %3649 = vmatpush.msrb.mxu0 %v3558_v60  ;;  %v2457_v31 = vadd.f32 %v5956_v35, %v2428_v42  ;;  %v3616_v60 = vld [vmem:[#allocation12 + $0x2b0] sm:$0xff]  ;;  %v3546_v43 = vld [vmem:[#allocation12 + $0x80] sm:$0xff] }
 0x48e   :  { %v3416_v27 = vmax.f32 %v3400_v5, 0.0  ;;  %v2463_v5 = vadd.f32 %v5952_v49, %v2434_v0  ;;  %v3320_v2 = vadd.f32 %v5614_v24, %v3291_v18  ;;  %v3578_v49 = vld [vmem:[#allocation12 + $0x180] sm:$0xff]  ;;  %v3572_v18 = vld [vmem:[#allocation12 + $0x150] sm:$0xff] }
 0x48f   :  { %3672 = vmatpush.msrb.mxu1 %v3590_v21  ;;  %v2486_v15 = vadd.f32 %v5959_v25, %v2457_v31  ;;  %v3544_v21 = vld [vmem:[#allocation12 + $0x70] sm:$0xff]  ;;  %v3538_v35 = vld [vmem:[#allocation12 + $0x40] sm:$0xff] }
 0x490   :  { %4058 = vmatpush.msk.msrb.mxu2 %vm204_vm0, %v3416_v27  ;;  %v2492_v23 = vadd.f32 %v5955_v26, %v2463_v5  ;;  %v3349_v40 = vadd.f32 %v5616_v50, %v3320_v2  ;;  %v3540_v26 = vld [vmem:[#allocation12 + $0x50] sm:$0xff]  ;;  %v3566_v2 = vld [vmem:[#allocation12 + $0x120] sm:$0xff] }
 0x491   :  { %3673 = vmatpush.msrb.mxu1 %v3588_v32  ;;  %v3610_v32 = vld [vmem:[#allocation12 + $0x280] sm:$0xff]  ;;  %v3532_v25 = vld [vmem:[#allocation12 + $0x10] sm:$0xff] }
 0x492   :  { %3497 = vmatpush.msrb.mxu2 %v3412_v19  ;;  %v5953_v19 = vld [vmem:[#allocation91_spill] sm:$0xff]  ;;  %v2521_v41 = vadd.f32 %v5960_v56, %v2492_v23  ;;  %v3562_v56 = vld [vmem:[#allocation12 + $0x100] sm:$0xff] }
 0x493   :  { %v3351_v28 = vpop.f32.mrf.mxu3  ;;  %v2460_v54 = vadd.f32 %v5953_v19, %v2431_v34  ;;  %3674 = vmatpush.msrb.mxu1 %v3586_v13  ;;  %v3638_v13 = vld [vmem:[#allocation12 + $0x360] sm:$0xff] }
 0x494   :  { %3498 = vmatpush.msrb.mxu2 %v3408_v12  ;;  %v5954_v12 = vld [vmem:[#allocation99_spill] sm:$0xff] }
 0x495   :  { %v3322_v9 = vpop.f32.mrf.mxu2  ;;  %v2466_v37 = vadd.f32 %v5954_v12, %v2437_v30  ;;  %v2489_v36 = vadd.f32 %v5957_v46, %v2460_v54  ;;  %3675 = vmatpush.msrb.mxu1 %v3584_v61  ;;  %v3618_v30 = vld [vmem:[#allocation12 + $0x2c0] sm:$0xff]  ;;  %v3576_v12 = vld [vmem:[#allocation12 + $0x170] sm:$0xff] }
 0x496   :  { %3499 = vmatpush.msrb.mxu2 %v3404_v16  ;;  %v3556_v16 = vld [vmem:[#allocation12 + $0xd0] sm:$0xff]  ;;  %v3323_v62 = vadd.f32 %v3322_v9, %v3294_v4  ;;  %v3570_v46 = vld [vmem:[#allocation12 + $0x140] sm:$0xff] }
 0x497   :  { %4059 = vmatmul.msk.f32.vlgmr.msrb.gmra.mxu2 %vm182_vm1, %v5606_v7  ;;  %v2495_v8 = vadd.f32 %v5958_v11, %v2466_v37  ;;  %3650 = vmatpush.msrb.mxu0 %v3556_v16  ;;  %v3552_v9 = vld [vmem:[#allocation12 + $0xb0] sm:$0xff]  ;;  %v2518_v24 = vadd.f32 %v5961_v63, %v2489_v36  ;;  %v3542_v37 = vld [vmem:[#allocation12 + $0x60] sm:$0xff]  ;;  %v3589_v63 = vld [vmem:[#allocation12 + $0x1d8] sm:$0xff] }
 0x498   :  { %3694 = vmatpush.msra.mxu2 %v3624_v10  ;;  %v3352_v48 = vadd.f32 %v3351_v28, %v3323_v62  ;;  %v3548_v28 = vld [vmem:[#allocation12 + $0x90] sm:$0xff]  ;;  %3676 = vmatpush.msrb.mxu1 %v3582_v53  ;;  %v3574_v16 = vld [vmem:[#allocation12 + $0x160] sm:$0xff]  ;;  %v3561_v53 = vld [vmem:[#allocation12 + $0xf8] sm:$0xff] }
 0x499   :  { %3651 = vmatpush.msrb.mxu0 %v3554_v6  ;;  %v2524_v59 = vadd.f32 %v5962_v33, %v2495_v8  ;;  %v3608_v62 = vld [vmem:[#allocation12 + $0x270] sm:$0xff]  ;;  %v3606_v6 = vld [vmem:[#allocation12 + $0x260] sm:$0xff] }
 0x49a   :  { %3695 = vmatpush.msra.mxu2 %v3622_v29  ;;  %v3367_v57 = vadd.f32 %v3352_v48, %v2518_v24  ;;  %v3640_v36 = vld [vmem:[#allocation12 + $0x370] sm:$0xff]  ;;  %v3530_v61 = vld [vmem:[#allocation12] sm:$0xff]  ;;  %v3625_v48 = vld [vmem:[#allocation12 + $0x2f8] sm:$0xff] }
 0x49b   :  { %v3354_v44 = vpop.f32.mrf.mxu3  ;;  %3652 = vmatpush.msrb.mxu0 %v3552_v9  ;;  %v3536_v11 = vld [vmem:[#allocation12 + $0x30] sm:$0xff]  ;;  %v3634_v9 = vld [vmem:[#allocation12 + $0x340] sm:$0xff]  ;;  %v3623_v24 = vld [vmem:[#allocation12 + $0x2e8] sm:$0xff] }
 0x49c   :  { %3696 = vmatpush.msra.mxu2 %v3620_v1  ;;  %v3393_v54 = vadd.f32 %v3381_v45, %v3367_v57  ;;  %v3568_v8 = vld [vmem:[#allocation12 + $0x130] sm:$0xff]  ;;  %v3617_v57 = vld [vmem:[#allocation12 + $0x2b8] sm:$0xff] }
 0x49d   :  { %v3325_v3 = vpop.f32.mrf.mxu2  ;;  %3653 = vmatpush.msrb.mxu0 %v3550_v52  ;;  %v3636_v10 = vld [vmem:[#allocation12 + $0x350] sm:$0xff]  ;;  %v3626_v52 = vld [vmem:[#allocation12 + $0x300] sm:$0xff] }
 0x49e   :  { %v3326_v27 = vadd.f32 %v3325_v3, %v3297_v47  ;;  %v3580_v3 = vld [vmem:[#allocation12 + $0x190] sm:$0xff]  ;;  %3697 = vmatpush.msra.mxu2 %v3618_v30  ;;  %v3409_v23 = vmax.f32 %v3393_v54, 0.0  ;;  %v3551_v30 = vld [vmem:[#allocation12 + $0xa8] sm:$0xff]  ;;  %v3637_v54 = vld [vmem:[#allocation12 + $0x358] sm:$0xff] }
 0x49f   :  { %4060 = vmatmul.msk.f32.gmra.mxu2 %vm182_vm1, %v5618_v39  ;;  %3654 = vmatpush.msrb.mxu0 %v3548_v28  ;;  %v3632_v29 = vld [vmem:[#allocation12 + $0x330] sm:$0xff]  ;;  %v3549_v28 = vld [vmem:[#allocation12 + $0x98] sm:$0xff] }
 0x4a0   :  { %v3355_v14 = vadd.f32 %v3354_v44, %v3326_v27  ;;  %v5963_v44 = vld [vmem:[#allocation103_spill] sm:$0xff]  ;;  %3677 = vmatpush.msrb.mxu1 %v3580_v3  ;;  %v3614_v27 = vld [vmem:[#allocation12 + $0x2a0] sm:$0xff]  ;;  %3698 = vmatpush.msra.mxu2 %v3616_v60  ;;  %v3585_v60 = vld [vmem:[#allocation12 + $0x1b8] sm:$0xff] }
 0x4a1   :  { %v2515_v47 = vadd.f32 %v5963_v44, %v2486_v15  ;;  %3655 = vmatpush.msrb.mxu0 %v3546_v43  ;;  %v3564_v15 = vld [vmem:[#allocation12 + $0x110] sm:$0xff]  ;;  %v3598_v3 = vld [vmem:[#allocation12 + $0x220] sm:$0xff]  ;;  %v3619_v44 = vld [vmem:[#allocation12 + $0x2c8] sm:$0xff] }
 0x4a2   :  { %v3371_v34 = vadd.f32 %v3355_v14, %v2521_v41  ;;  %3678 = vmatpush.msrb.mxu1 %v3578_v49  ;;  %3699 = vmatpush.msra.mxu2 %v3614_v27  ;;  %v3604_v14 = vld [vmem:[#allocation12 + $0x250] sm:$0xff]  ;;  %v3591_v41 = vld [vmem:[#allocation12 + $0x1e8] sm:$0xff]  ;;  %v3613_v43 = vld [vmem:[#allocation12 + $0x298] sm:$0xff] }
 0x4a3   :  { %v3357_v0 = vpop.f32.mrf.mxu3  ;;  %v3363_v50 = vadd.f32 %v3349_v40, %v2515_v47  ;;  %3656 = vmatpush.msrb.mxu0 %v3544_v21  ;;  %v3600_v1 = vld [vmem:[#allocation12 + $0x230] sm:$0xff]  ;;  %v3557_v40 = vld [vmem:[#allocation12 + $0xd8] sm:$0xff] }
 0x4a4   :  { %v3397_v4 = vadd.f32 %v3381_v45, %v3371_v34  ;;  %3679 = vmatpush.msrb.mxu1 %v3576_v12  ;;  %3700 = vmatpush.msra.mxu2 %v3612_v55  ;;  %v3628_v33 = vld [vmem:[#allocation12 + $0x310] sm:$0xff]  ;;  %v3555_v34 = vld [vmem:[#allocation12 + $0xc8] sm:$0xff]  ;;  %v3641_v49 = vld [vmem:[#allocation12 + $0x378] sm:$0xff] }
 0x4a5   :  { %v3328_v22 = vpop.f32.mrf.mxu2  ;;  %v3389_v51 = vadd.f32 %v3381_v45, %v3363_v50  ;;  %3657 = vmatpush.msrb.mxu0 %v3542_v37  ;;  %v3596_v47 = vld [vmem:[#allocation12 + $0x210] sm:$0xff]  ;;  %v3583_v50 = vld [vmem:[#allocation12 + $0x1a8] sm:$0xff]  ;;  %v3581_v21 = vld [vmem:[#allocation12 + $0x198] sm:$0xff] }
 0x4a6   :  { %v3329_v20 = vadd.f32 %v3328_v22, %v3300_v58  ;;  %v3413_v17 = vmax.f32 %v3397_v4, 0.0  ;;  %3680 = vmatpush.msrb.mxu1 %v3574_v16  ;;  %3701 = vmatpush.msra.mxu2 %v3610_v32  ;;  %v3534_v58 = vld [vmem:[#allocation12 + $0x20] sm:$0xff]  ;;  %v3639_v4 = vld [vmem:[#allocation12 + $0x368] sm:$0xff]  ;;  %v3605_v16 = vld [vmem:[#allocation12 + $0x258] sm:$0xff] }
 0x4a7   :  { %v3405_v31 = vmax.f32 %v3389_v51, 0.0  ;;  %3658 = vmatpush.msrb.mxu0 %v3540_v26  ;;  %v3602_v22 = vld [vmem:[#allocation12 + $0x240] sm:$0xff]  ;;  %v3579_v12 = vld [vmem:[#allocation12 + $0x188] sm:$0xff]  ;;  %v3577_v51 = vld [vmem:[#allocation12 + $0x178] sm:$0xff] }
 0x4a8   :  { %v3358_v38 = vadd.f32 %v3357_v0, %v3329_v20  ;;  %3681 = vmatpush.msrb.mxu1 %v3572_v18  ;;  %3702 = vmatpush.msra.mxu2 %v3608_v62  ;;  %v3630_v20 = vld [vmem:[#allocation12 + $0x320] sm:$0xff]  ;;  %v3621_v0 = vld [vmem:[#allocation12 + $0x2d8] sm:$0xff]  ;;  %v3607_v55 = vld [vmem:[#allocation12 + $0x268] sm:$0xff] }
 0x4a9   :  { %3659 = vmatpush.msrb.mxu0 %v3538_v35  ;;  %v3635_v37 = vld [vmem:[#allocation12 + $0x348] sm:$0xff]  ;;  %v3633_v32 = vld [vmem:[#allocation12 + $0x338] sm:$0xff] }
 0x4aa   :  { %v3375_v42 = vadd.f32 %v3358_v38, %v2524_v59  ;;  %3682 = vmatpush.msrb.mxu1 %v3570_v46  ;;  %3703 = vmatpush.msra.mxu2 %v3606_v6  ;;  %v3587_v59 = vld [vmem:[#allocation12 + $0x1c8] sm:$0xff]  ;;  %v3553_v38 = vld [vmem:[#allocation12 + $0xb8] sm:$0xff] }
 0x4ab   :  { %3660 = vmatpush.msrb.mxu0 %v3536_v11  ;;  %v3575_v26 = vld [vmem:[#allocation12 + $0x168] sm:$0xff]  ;;  %v3573_v35 = vld [vmem:[#allocation12 + $0x158] sm:$0xff] }
 0x4ac   :  { %v3401_v5 = vadd.f32 %v3381_v45, %v3375_v42  ;;  %3683 = vmatpush.msrb.mxu1 %v3568_v8  ;;  %3704 = vmatpush.msra.mxu2 %v3604_v14  ;;  %v3594_v42 = vld [vmem:[#allocation12 + $0x200] sm:$0xff]  ;;  %v3615_v45 = vld [vmem:[#allocation12 + $0x2a8] sm:$0xff]  ;;  %v3629_v46 = vld [vmem:[#allocation12 + $0x318] sm:$0xff] }
 0x4ad   :  { %3661 = vmatpush.msrb.mxu0 %v3534_v58  ;;  %v3631_v18 = vld [vmem:[#allocation12 + $0x328] sm:$0xff]  ;;  %v3569_v14 = vld [vmem:[#allocation12 + $0x138] sm:$0xff] }
 0x4ae   :  { %v3417_v19 = vmax.f32 %v3401_v5, 0.0  ;;  %3684 = vmatpush.msrb.mxu1 %v3566_v2  ;;  %3705 = vmatpush.msra.mxu2 %v3602_v22  ;;  %v3611_v5 = vld [vmem:[#allocation12 + $0x288] sm:$0xff] }
 0x4af   :  { %3662 = vmatpush.msrb.mxu0 %v3532_v25  ;;  %v3571_v8 = vld [vmem:[#allocation12 + $0x148] sm:$0xff]  ;;  %v3597_v25 = vld [vmem:[#allocation12 + $0x218] sm:$0xff] }
 0x4b0   :  { %4061 = vmatpush.msk.msrb.mxu3 %vm204_vm0, %v3417_v19  ;;  %3685 = vmatpush.msrb.mxu1 %v3564_v15  ;;  %v3609_v19 = vld [vmem:[#allocation12 + $0x278] sm:$0xff]  ;;  %v3599_v6 = vld [vmem:[#allocation12 + $0x228] sm:$0xff] }
 0x4b1   :  { %3663 = vmatpush.msrb.mxu0 %v3530_v61  ;;  %3706 = vmatpush.msra.mxu2 %v3600_v1  ;;  %v3543_v58 = vld [vmem:[#allocation12 + $0x68] sm:$0xff]  ;;  %v3541_v15 = vld [vmem:[#allocation12 + $0x58] sm:$0xff] }
 0x4b2   :  { %3520 = vmatpush.msrb.mxu3 %v3413_v17  ;;  %3686 = vmatpush.msrb.mxu1 %v3562_v56  ;;  %v3567_v22 = vld [vmem:[#allocation12 + $0x128] sm:$0xff]  ;;  %v3565_v61 = vld [vmem:[#allocation12 + $0x118] sm:$0xff] }
 0x4b3   :  { %3707 = vmatpush.msra.mxu2 %v3598_v3  ;;  %v3563_v56 = vld [vmem:[#allocation12 + $0x108] sm:$0xff] }
 0x4b4   :  { %3521 = vmatpush.msrb.mxu3 %v3409_v23  ;;  %3786 = vmatpush.msra.mxu1 %v3625_v48  ;;  %v3603_v23 = vld [vmem:[#allocation12 + $0x248] sm:$0xff] }
 0x4b5   :  { %3708 = vmatpush.msra.mxu2 %v3596_v47  ;;  %v3535_v48 = vld [vmem:[#allocation12 + $0x28] sm:$0xff] }
 0x4b6   :  { %3522 = vmatpush.msrb.mxu3 %v3405_v31  ;;  %3787 = vmatpush.msra.mxu1 %v3623_v24  ;;  %v3601_v31 = vld [vmem:[#allocation12 + $0x238] sm:$0xff]  ;;  %v3531_v1 = vld [vmem:[#allocation12 + $0x8] sm:$0xff] }
 0x4b7   :  { %4062 = vmatmul.msk.f32.vlgmr.msrb.gmra.mxu3 %vm182_vm1, %v5606_v7  ;;  %v3593_v7 = vld [vmem:[#allocation12 + $0x1f8] sm:$0xff]  ;;  %3709 = vmatpush.msra.mxu2 %v3594_v42 }
 0x4b8   :  { %3725 = vmatpush.msra.mxu3 %v3640_v36  ;;  %3763 = vmatpush.msra.mxu0 %v3593_v7  ;;  %v3547_v36 = vld [vmem:[#allocation12 + $0x88] sm:$0xff] }
 0x4b9   :  { %3788 = vmatpush.msra.mxu1 %v3621_v0  ;;  %3817 = vmatpush.msrb.mxu2 %v3641_v49  ;;  %v3539_v7 = vld [vmem:[#allocation12 + $0x48] sm:$0xff] }
 0x4ba   :  { %3726 = vmatpush.msra.mxu3 %v3638_v13  ;;  %3764 = vmatpush.msra.mxu0 %v3591_v41  ;;  %v3545_v13 = vld [vmem:[#allocation12 + $0x78] sm:$0xff] }
 0x4bb   :  { %3789 = vmatpush.msra.mxu1 %v3619_v44  ;;  %3818 = vmatpush.msrb.mxu2 %v3639_v4  ;;  %v3537_v41 = vld [vmem:[#allocation12 + $0x38] sm:$0xff] }
 0x4bc   :  { %3727 = vmatpush.msra.mxu3 %v3636_v10  ;;  %3765 = vmatpush.msra.mxu0 %v3589_v63  ;;  %v3627_v10 = vld [vmem:[#allocation12 + $0x308] sm:$0xff] }
 0x4bd   :  { %3790 = vmatpush.msra.mxu1 %v3617_v57  ;;  %3819 = vmatpush.msrb.mxu2 %v3637_v54 }
 0x4be   :  { %3728 = vmatpush.msra.mxu3 %v3634_v9  ;;  %3766 = vmatpush.msra.mxu0 %v3587_v59  ;;  %v3595_v9 = vld [vmem:[#allocation12 + $0x208] sm:$0xff] }
 0x4bf   :  { %4063 = vmatmul.msk.f32.gmra.mxu3 %vm182_vm1, %v5618_v39  ;;  %v3559_v39 = vld [vmem:[#allocation12 + $0xe8] sm:$0xff]  ;;  %3791 = vmatpush.msra.mxu1 %v3615_v45 }
 0x4c0   :  { %3729 = vmatpush.msra.mxu3 %v3632_v29  ;;  %3767 = vmatpush.msra.mxu0 %v3585_v60 }
 0x4c1   :  { %3792 = vmatpush.msra.mxu1 %v3613_v43  ;;  %3820 = vmatpush.msrb.mxu2 %v3635_v37 }
 0x4c2   :  { %3730 = vmatpush.msra.mxu3 %v3630_v20  ;;  %3768 = vmatpush.msra.mxu0 %v3583_v50  ;;  %v3533_v20 = vld [vmem:[#allocation12 + $0x18] sm:$0xff] }
 0x4c3   :  { %3793 = vmatpush.msra.mxu1 %v3611_v5  ;;  %3821 = vmatpush.msrb.mxu2 %v3633_v32 }
 0x4c4   :  { %3731 = vmatpush.msra.mxu3 %v3628_v33  ;;  %3769 = vmatpush.msra.mxu0 %v3581_v21 }
 0x4c5   :  { %3794 = vmatpush.msra.mxu1 %v3609_v19  ;;  %3822 = vmatpush.msrb.mxu2 %v3631_v18 }
 0x4c6   :  { %3732 = vmatpush.msra.mxu3 %v3626_v52  ;;  %3770 = vmatpush.msra.mxu0 %v3579_v12 }
 0x4c7   :  { %3795 = vmatpush.msra.mxu1 %v3607_v55  ;;  %3823 = vmatpush.msrb.mxu2 %v3629_v46 }
 0x4c8   :  { %3740 = vmatpush.msrb.mxu3 %v3561_v53  ;;  %3771 = vmatpush.msra.mxu0 %v3577_v51 }
 0x4c9   :  { %3796 = vmatpush.msra.mxu1 %v3605_v16  ;;  %3824 = vmatpush.msrb.mxu2 %v3627_v10 }
 0x4ca   :  { %3741 = vmatpush.msrb.mxu3 %v3559_v39  ;;  %3772 = vmatpush.msra.mxu0 %v3575_v26 }
 0x4cb   :  { %3797 = vmatpush.msra.mxu1 %v3603_v23 }
 0x4cc   :  { %3742 = vmatpush.msrb.mxu3 %v3557_v40  ;;  %3773 = vmatpush.msra.mxu0 %v3573_v35 }
 0x4cd   :  { %3798 = vmatpush.msra.mxu1 %v3601_v31 }
 0x4ce   :  { %3743 = vmatpush.msrb.mxu3 %v3555_v34  ;;  %3774 = vmatpush.msra.mxu0 %v3571_v8 }
 0x4cf   :  { %3799 = vmatpush.msra.mxu1 %v3599_v6 }
 0x4d0   :  { %3744 = vmatpush.msrb.mxu3 %v3553_v38  ;;  %3775 = vmatpush.msra.mxu0 %v3569_v14 }
 0x4d1   :  { %3800 = vmatpush.msra.mxu1 %v3597_v25 }
 0x4d2   :  { %3745 = vmatpush.msrb.mxu3 %v3551_v30  ;;  %3776 = vmatpush.msra.mxu0 %v3567_v22 }
 0x4d3   :  { %3801 = vmatpush.msra.mxu1 %v3595_v9 }
 0x4d4   :  { %3746 = vmatpush.msrb.mxu3 %v3549_v28  ;;  %3777 = vmatpush.msra.mxu0 %v3565_v61 }
 0x4d6   :  { %v5674_v17 = vpop.f32.mrf.mxu0  ;;  %3747 = vmatpush.msrb.mxu3 %v3547_v36  ;;  %3778 = vmatpush.msra.mxu0 %v3563_v56 }
 0x4d7   :  { %3664 = vmatmul.f32.vlgmr.msrb.gmra.mxu0 %v5674_v17 }
 0x4d8   :  { %3748 = vmatpush.msrb.mxu3 %v3545_v13 }
 0x4da   :  { %3749 = vmatpush.msrb.mxu3 %v3543_v58 }
 0x4dc   :  { %3750 = vmatpush.msrb.mxu3 %v3541_v15 }
 0x4de   :  { %3751 = vmatpush.msrb.mxu3 %v3539_v7 }
 0x4e0   :  { %3752 = vmatpush.msrb.mxu3 %v3537_v41 }
 0x4e2   :  { %3753 = vmatpush.msrb.mxu3 %v3535_v48 }
 0x4e4   :  { %3754 = vmatpush.msrb.mxu3 %v3533_v20 }
 0x4e6   :  { %3755 = vmatpush.msrb.mxu3 %v3531_v1 }
 0x4ed   :  { %v3458_v2 = vpop.f32.mrf.mxu0 }
 0x4ee   :  { %3667 = vmatmul.f32.gmra.mxu0 %v3458_v2 }
 0x4f4   :  { %v5671_v27 = vpop.f32.mrf.mxu1 }
 0x4f5   :  { %3687 = vmatmul.f32.vlgmr.msrb.gmra.mxu1 %v5671_v27 }
 0x4f6   :  { %3779 = vmatmul.f32.vlgmr.msra.gmra.mxu0 %v5671_v27 }
 0x4fc   :  { %v3481_v62 = vpop.f32.mrf.mxu1 }
 0x4fd   :  { %3690 = vmatmul.f32.gmra.mxu1 %v3481_v62 }
 0x4fe   :  { %3782 = vmatmul.f32.gmra.mxu0 %v3481_v62 }
 0x51a   :  { %v3501_v11 = vpop.f32.mrf.mxu2 }
 0x51b   :  { %3710 = vmatmul.f32.vlgmr.msra.gmra.mxu2 %v3501_v11  ;;  %3802 = vmatmul.f32.vlgmr.msra.gmra.mxu1 %v3501_v11 }
 0x522   :  { %v3504_v29 = vpop.f32.mrf.mxu2 }
 0x523   :  { %3713 = vmatmul.f32.gmra.mxu2 %v3504_v29  ;;  %3805 = vmatmul.f32.gmra.mxu1 %v3504_v29 }
 0x53a   :  { %v3524_v63 = vpop.f32.mrf.mxu3 }
 0x53b   :  { %4064 = vmatmul.msk.f32.vlgmr.msra.gmra.mxu3 %vm1573_vm3, %v3524_v63  ;;  %4066 = vmatmul.msk.f32.vlgmr.msrb.gmra.mxu2 %vm1573_vm3, %v3524_v63 }
 0x542   :  { %v3527_v24 = vpop.f32.mrf.mxu3 }
 0x543   :  { %4065 = vmatmul.msk.f32.gmra.mxu3 %vm1573_vm3, %v3527_v24  ;;  %4067 = vmatmul.msk.f32.gmra.mxu2 %vm1573_vm3, %v3527_v24 }
 0x54b   :  { %3756 = vmatmul.f32.vlgmr.msrb.gmra.mxu3 %v5674_v17 }
 0x553   :  { %3759 = vmatmul.f32.gmra.mxu3 %v3458_v2 }
 0x554   :  { %v3665_v59 = vpop.f32.mrf.mxu0 }
 0x56b   :  { %v3668_v34 = vpop.f32.mrf.mxu0 }
 0x572   :  { %v3688_v33 = vpop.f32.mrf.mxu1 }
 0x573   :  { %v3689_v0 = vadd.f32 %v3688_v33, %v3665_v59  ;;  %v3780_v57 = vpop.f32.mrf.mxu0 }
 0x57a   :  { %v3691_v39 = vpop.f32.mrf.mxu1 }
 0x57b   :  { %v3692_v30 = vadd.f32 %v3691_v39, %v3668_v34  ;;  %v3783_v4 = vpop.f32.mrf.mxu0 }
 0x598   :  { %v3803_v45 = vpop.f32.mrf.mxu1 }
 0x59e   :  { %v3711_v52 = vpop.f32.mrf.mxu2 }
 0x59f   :  { %v3712_v53 = vadd.f32 %v3711_v52, %v3689_v0 }
 0x5a0   :  { %v3806_v21 = vpop.f32.mrf.mxu1 }
 0x5a6   :  { %v3714_v28 = vpop.f32.mrf.mxu2 }
 0x5a7   :  { %v3715_v3 = vadd.f32 %v3714_v28, %v3692_v30 }
 0x5be   :  { %v3734_v40 = vpop.f32.mrf.mxu3  ;;  %v3826_v43 = vpop.f32.mrf.mxu2 }
 0x5bf   :  { %v3735_v38 = vadd.f32 %v3734_v40, %v3712_v53 }
 0x5c1   :  { %3832 = vst [vmem:[%s5703_s8] sm:$0xff] %v3735_v38 }
 0x5c6   :  { %v3737_v44 = vpop.f32.mrf.mxu3  ;;  %v3829_v54 = vpop.f32.mrf.mxu2 }
 0x5c7   :  { %v3738_v47 = vadd.f32 %v3737_v44, %v3715_v3 }
 0x5c9   :  { %3835 = vst [vmem:[%s5703_s8 + $0x10] sm:$0x3f] %v3738_v47 }
 0x5ce   :  { %v3757_v42 = vpop.f32.mrf.mxu3 }
 0x5cf   :  { %v3781_v60 = vadd.f32 %v3780_v57, %v3757_v42 }
 0x5d1   :  { %v3804_v49 = vadd.f32 %v3803_v45, %v3781_v60 }
 0x5d3   :  { %v3827_v50 = vadd.f32 %v3826_v43, %v3804_v49 }
 0x5d5   :  { %3834 = vst.msk [vmem:[%s5703_s8 + $0x8] sm:$0xff] %vm3833_vm4, %v3827_v50 }
 0x5d6   :  { %v3760_v5 = vpop.f32.mrf.mxu3 }
 0x5d7   :  { %v3784_v27 = vadd.f32 %v3783_v4, %v3760_v5 }
 0x5d9   :  { %v3807_v19 = vadd.f32 %v3806_v21, %v3784_v27 }
 0x5db   :  { %v3830_v12 = vadd.f32 %v3829_v54, %v3807_v19 }
 0x5dd   :  { %3837 = vst.msk [vmem:[%s5703_s8 + $0x18] sm:$0x3f] %vm3836_vm5, %v3830_v12 }
 0x5de   :  { %3842 = vsyncpa [#allocation3], 1 }
 0x5df   :  { %3843 = vsyncpa [#allocation5], 1 }
 0x5e0   :  { %3844 = vsyncpa [#allocation8], 1 }
 0x5e1   :  { %3845 = vsyncpa [#allocation11], 1 }

</bundles_post_ra>
